<compile_context>
chip_gen: v7x
topology: tpu7x:2x2x1
jax: 0.10.0
libtpu: 0.0.40
codegen_flags: <defaults>
</compile_context>

<pallas_src>
import functools

import jax
import jax.numpy as jnp
from jax import lax
from jax.experimental import pallas as pl
from jax.experimental.pallas import tpu as pltpu


def _round_up(x, m):
    return (x + m - 1) // m * m


def _conv3x3_chunked(src_ref, w_ref, scale_ref, bias_ref, store_chunk, *, H, W, rpc):
    """3x3 'same' conv from a zero-padded VMEM scratch, fused BN scale/bias + ReLU.

    src_ref:    (H+2, Wp, Cs) f32 scratch; data in rows 1..H, cols 1..W; the
                1-wide halo (row 0, row H+1, col 0, col W+1) is zero.
    w_ref:      (9, Cs, Cn) bf16 per-tap weight matrices, tap t = kh*3 + kw.
    scale/bias: (1, Cn) f32 folded BatchNorm scale / bias.
    store_chunk(c, y): consumes the activated (rpc*W, Cn) f32 chunk covering
                output image rows [c*rpc, (c+1)*rpc).
    """
    Cs = src_ref.shape[-1]
    scale = scale_ref[...]
    bias = bias_ref[...]
    for c in range(H // rpc):
        r0 = c * rpc
        acc = None
        for t in range(9):                      # statically unrolled; vreg accumulation
            kh, kw = divmod(t, 3)
            win = src_ref[r0 + kh:r0 + kh + rpc, kw:kw + W, :]
            win = win.reshape(rpc * W, Cs).astype(jnp.bfloat16)
            tap = jnp.dot(win, w_ref[t], preferred_element_type=jnp.float32)
            acc = tap if acc is None else acc + tap
        store_chunk(c, jnp.maximum(acc * scale + bias, 0.0))


def _double_conv_kernel(x_ref, w1_ref, s1_ref, b1_ref, w2_ref, s2_ref, b2_ref,
                        o_ref, xpad_ref, ypad_ref, *, H, W, rpc):
    """Fused (conv3x3 -> BN -> ReLU) x 2 for one NHWC image.

    x_ref:  (1, H, W, Cin)   w1_ref: (9, Cin, Cmid) bf16   s1/b1: (1, Cmid) f32
    w2_ref: (9, Cmid, Cp) bf16   s2/b2: (1, Cp) f32        o_ref: (1, H*W, Cp)
    xpad_ref: VMEM (H+2, Wp, Cin) f32    ypad_ref: VMEM (H+2, Wp, Cmid) f32
    """
    Cin = xpad_ref.shape[-1]
    Cmid = ypad_ref.shape[-1]
    Wp = xpad_ref.shape[1]
    f32 = jnp.float32

    # Stage 0: refresh only the 1-wide zero halo of both padded scratches.
    # (Interior is fully overwritten every grid step; columns >= W+2 are never
    #  read; per-step refresh keeps this correct under megacore sharding of the
    #  "parallel" batch axis, unlike a program_id == 0 guard.)
    for pad_ref, C in ((xpad_ref, Cin), (ypad_ref, Cmid)):
        zrow = jnp.zeros((Wp, C), f32)
        pad_ref[0] = zrow
        pad_ref[H + 1] = zrow
        zcol = jnp.zeros((H, 1, C), f32)
        pad_ref[1:H + 1, 0:1, :] = zcol
        pad_ref[1:H + 1, W + 1:W + 2, :] = zcol

    # Stage 1: load this image into the padded-scratch interior.
    xpad_ref[1:H + 1, 1:W + 1, :] = x_ref[0]

    # Stage 2: conv1 + BN1 + ReLU; chunks go straight into the ypad interior
    # (the intermediate never leaves VMEM).
    def store_mid(c, y):                         # y: (rpc*W, Cmid) f32
        ypad_ref[1 + c * rpc:1 + (c + 1) * rpc, 1:W + 1, :] = y.reshape(rpc, W, Cmid)

    _conv3x3_chunked(xpad_ref, w1_ref, s1_ref, b1_ref, store_mid, H=H, W=W, rpc=rpc)

    # Stage 3: conv2 + BN2 + ReLU; chunks go straight to the lane-dense output.
    def store_out(c, y):                         # y: (rpc*W, Cp) f32
        o_ref[0, c * rpc * W:(c + 1) * rpc * W, :] = y.astype(o_ref.dtype)

    _conv3x3_chunked(ypad_ref, w2_ref, s2_ref, b2_ref, store_out, H=H, W=W, rpc=rpc)


def _double_conv_nhwc(x, w1, s1, b1, w2, s2, b2):
    """x: (N,H,W,Cin) f32; w*: bf16 per-tap weights; s*/b*: (1, Cn) f32 folded BN."""
    N, H, W, Cin = x.shape
    Cmid = w1.shape[-1]
    Cp = w2.shape[-1]
    Wp = _round_up(W + 2, 8)

    # Rows-per-chunk: ~64 flattened rows -> <= ~8 f32 accumulator vregs at Cp=128.
    rpc = max(1, min(H, 64 // max(W, 1)))
    while H % rpc:
        rpc -= 1

    kernel = functools.partial(_double_conv_kernel, H=H, W=W, rpc=rpc)

    flops = 2 * N * H * W * 9 * (Cin * Cmid + Cmid * Cp)
    bytes_accessed = (4 * x.size + 2 * (w1.size + w2.size)
                      + 4 * (s1.size + b1.size + s2.size + b2.size)
                      + 4 * N * H * W * Cp)

    return pl.pallas_call(
        kernel,
        out_shape=jax.ShapeDtypeStruct((N, H * W, Cp), jnp.float32),
        grid_spec=pltpu.PrefetchScalarGridSpec(
            num_scalar_prefetch=0,
            grid=(N,),
            in_specs=[
                pl.BlockSpec((1, H, W, Cin), lambda n: (n, 0, 0, 0)),
                pl.BlockSpec(w1.shape, lambda n: (0, 0, 0)),
                pl.BlockSpec(s1.shape, lambda n: (0, 0)),
                pl.BlockSpec(b1.shape, lambda n: (0, 0)),
                pl.BlockSpec(w2.shape, lambda n: (0, 0, 0)),
                pl.BlockSpec(s2.shape, lambda n: (0, 0)),
                pl.BlockSpec(b2.shape, lambda n: (0, 0)),
            ],
            out_specs=pl.BlockSpec((1, H * W, Cp), lambda n: (n, 0, 0)),
            scratch_shapes=[
                pltpu.VMEM((H + 2, Wp, Cin), jnp.float32),    # zero-padded input
                pltpu.VMEM((H + 2, Wp, Cmid), jnp.float32),   # zero-padded intermediate
            ],
        ),
        compiler_params=pltpu.CompilerParams(
            dimension_semantics=("parallel",),
            vmem_limit_bytes=32 * 1024 * 1024,
        ),
        cost_estimate=pl.CostEstimate(
            flops=int(flops), transcendentals=0, bytes_accessed=int(bytes_accessed)),
    )(x, w1, s1, b1, w2, s2, b2)


@functools.partial(jax.jit, static_argnames=("cout",))
def double_conv_pallas(x_nchw, w1, s1, b1, w2, s2, b2, *, cout):
    # NCHW (PyTorch) -> NHWC for the kernel, back to NCHW at the end.
    # TODO(synk): keep the surrounding model NHWC end-to-end to drop these transposes.
    N, _, H, W = x_nchw.shape
    Cp = w2.shape[-1]
    x = jnp.transpose(x_nchw, (0, 2, 3, 1))
    y = _double_conv_nhwc(x, w1, s1, b1, w2, s2, b2)     # (N, H*W, Cp) lane-dense
    y = y.reshape(N, H, W, Cp)[..., :cout]               # slice padded lanes in XLA
    return jnp.transpose(y, (0, 3, 1, 2))


def _fold_bn(conv_bias, gamma, beta, running_mean, running_var, eps=1e-5):
    """Fold conv bias + eval-mode BatchNorm into a per-channel scale / bias."""
    scale = gamma / jnp.sqrt(running_var + eps)
    bias = (conv_bias - running_mean) * scale + beta
    return scale, bias


def make_double_conv_params(key, in_channels, out_channels):
    """Deterministic params matching nn.Conv2d/BatchNorm2d shapes + packed kernel forms."""
    cp = _round_up(out_channels, 128)     # lane padding: final output lanes only
    cmid = _round_up(out_channels, 8)     # intermediate stays near its real width
    ks = jax.random.split(key, 4)
    params = []
    cin = in_channels
    for i in range(2):
        cout = out_channels
        # PyTorch Conv2d weight is (Cout, Cin, 3, 3); HWIO view is (3, 3, Cin, Cout).
        w_oihw = 0.1 * jax.random.normal(ks[2 * i], (cout, cin, 3, 3), jnp.float32)
        w_hwio = jnp.transpose(w_oihw, (2, 3, 1, 0))
        conv_b = 0.05 * jax.random.normal(ks[2 * i + 1], (cout,), jnp.float32)
        gamma = 1.0 + 0.1 * jnp.arange(cout, dtype=jnp.float32)
        beta = 0.01 * jnp.arange(cout, dtype=jnp.float32)
        running_mean = 0.02 * jnp.arange(cout, dtype=jnp.float32)
        running_var = 1.0 + 0.05 * jnp.arange(cout, dtype=jnp.float32)
        scale, bias = _fold_bn(conv_b, gamma, beta, running_mean, running_var)

        # Packed forms consumed by the fused kernel:
        #   conv1: K = Cin,  N = Cmid   |   conv2: K = Cmid, N = Cp (lane-dense out)
        k_dim = cin if i == 0 else cmid
        n_dim = cmid if i == 0 else cp
        w_taps = jnp.zeros((9, k_dim, n_dim), jnp.float32)
        w_taps = w_taps.at[:, :cin, :cout].set(w_hwio.reshape(9, cin, cout))
        w_taps = w_taps.astype(jnp.bfloat16)          # bf16 MXU operands stored in HBM
        scale_p = jnp.zeros((1, n_dim), jnp.float32).at[0, :cout].set(scale)
        bias_p = jnp.zeros((1, n_dim), jnp.float32).at[0, :cout].set(bias)

        params.append(dict(
            w_oihw=w_oihw, conv_b=conv_b, gamma=gamma, beta=beta,
            running_mean=running_mean, running_var=running_var,
            w_taps=w_taps, scale_p=scale_p, bias_p=bias_p))
        cin = cout
    return params


def double_conv_reference(x_nchw, params, eps=1e-5):
    """Pure-JAX reference mimicking PyTorch (eval-mode BN) in NCHW."""
    x = x_nchw
    for p in params:
        y = lax.conv_general_dilated(
            x, p["w_oihw"], window_strides=(1, 1), padding=((1, 1), (1, 1)),
            dimension_numbers=("NCHW", "OIHW", "NCHW"),
            precision=lax.Precision.HIGHEST,
        ) + p["conv_b"][None, :, None, None]
        y = (y - p["running_mean"][None, :, None, None]) / jnp.sqrt(
            p["running_var"][None, :, None, None] + eps)
        y = y * p["gamma"][None, :, None, None] + p["beta"][None, :, None, None]
        x = jnp.maximum(y, 0.0)
    return x


if __name__ == "__main__":
    key = jax.random.PRNGKey(0)
    k_x, k_p = jax.random.split(key)

    N, C_in, H, W = 2, 4, 16, 16
    C_out = 8

    x = jax.random.normal(k_x, (N, C_in, H, W), jnp.float32)
    params = make_double_conv_params(k_p, C_in, C_out)

    out = double_conv_pallas(
        x,
        params[0]["w_taps"], params[0]["scale_p"], params[0]["bias_p"],
        params[1]["w_taps"], params[1]["scale_p"], params[1]["bias_p"],
        cout=C_out,
    )
    out = jax.block_until_ready(out)

    ref = double_conv_reference(x, params)
    assert out.shape == (N, C_out, H, W)
    max_err = float(jnp.max(jnp.abs(out - ref)))
    # bf16 MXU operands (per perf review) -> looser tolerance than the pure-f32 version.
    assert max_err < 8e-2, f"mismatch vs reference: {max_err}"

    print("KERNEL_OK")
</pallas_src>

<mosaic_0001>
module attributes {stable_mosaic.version = 11 : i64} {
  func.func @_double_conv_kernel(%arg0: i32, %arg1: memref<1x16x16x4xf32, #tpu.memory_space<vmem>>, %arg2: memref<9x4x8xbf16, #tpu.memory_space<vmem>>, %arg3: memref<1x8xf32, #tpu.memory_space<vmem>>, %arg4: memref<1x8xf32, #tpu.memory_space<vmem>>, %arg5: memref<9x8x128xbf16, #tpu.memory_space<vmem>>, %arg6: memref<1x128xf32, #tpu.memory_space<vmem>>, %arg7: memref<1x128xf32, #tpu.memory_space<vmem>>, %arg8: memref<1x256x128xf32, #tpu.memory_space<vmem>>, %arg9: memref<18x24x4xf32, #tpu.memory_space<vmem>>, %arg10: memref<18x24x8xf32, #tpu.memory_space<vmem>>) attributes {dimension_semantics = [#tpu.dimension_semantics<parallel>], iteration_bounds = array<i64: 2>, scalar_prefetch = 0 : i64, scratch_operands = 2 : i64, tpu.core_type = #tpu.core_type<tc>, window_params = [{transform_indices = @transform_0, window_bounds = array<i64: 1, 16, 16, 4>}, {pipeline_mode = #tpu.pipeline_mode<synchronous>, transform_indices = @transform_1, window_bounds = array<i64: 9, 4, 8>}, {pipeline_mode = #tpu.pipeline_mode<synchronous>, transform_indices = @transform_2, window_bounds = array<i64: 1, 8>}, {pipeline_mode = #tpu.pipeline_mode<synchronous>, transform_indices = @transform_3, window_bounds = array<i64: 1, 8>}, {pipeline_mode = #tpu.pipeline_mode<synchronous>, transform_indices = @transform_4, window_bounds = array<i64: 9, 8, 128>}, {pipeline_mode = #tpu.pipeline_mode<synchronous>, transform_indices = @transform_5, window_bounds = array<i64: 1, 128>}, {pipeline_mode = #tpu.pipeline_mode<synchronous>, transform_indices = @transform_6, window_bounds = array<i64: 1, 128>}, {transform_indices = @transform_7, window_bounds = array<i64: 1, 256, 128>}]} {
    %cst = arith.constant 0.000000e+00 : f32
    %0 = vector.broadcast %cst : f32 to vector<24x4xf32>
    %c0 = arith.constant 0 : index
    %c0_0 = arith.constant 0 : index
    %c0_1 = arith.constant 0 : index
    %1 = vector.load %arg9[%c0, %c0_0, %c0_1] : memref<18x24x4xf32, #tpu.memory_space<vmem>>, vector<1x24x4xf32>
    %2 = vector.shape_cast %1 : vector<1x24x4xf32> to vector<24x4xf32>
    %3 = vector.shape_cast %0 : vector<24x4xf32> to vector<1x24x4xf32>
    tpu.vector_store %arg9[%c0, %c0_0, %c0_1], %3 {strides = array<i32>} : memref<18x24x4xf32, #tpu.memory_space<vmem>>, vector<1x24x4xf32>,
    %c17 = arith.constant 17 : index
    %c0_2 = arith.constant 0 : index
    %c0_3 = arith.constant 0 : index
    %4 = vector.load %arg9[%c17, %c0_2, %c0_3] : memref<18x24x4xf32, #tpu.memory_space<vmem>>, vector<1x24x4xf32>
    %5 = vector.shape_cast %4 : vector<1x24x4xf32> to vector<24x4xf32>
    %6 = vector.shape_cast %0 : vector<24x4xf32> to vector<1x24x4xf32>
    tpu.vector_store %arg9[%c17, %c0_2, %c0_3], %6 {strides = array<i32>} : memref<18x24x4xf32, #tpu.memory_space<vmem>>, vector<1x24x4xf32>,
    %cst_4 = arith.constant 0.000000e+00 : f32
    %7 = vector.broadcast %cst_4 : f32 to vector<16x1x4xf32>
    %c1 = arith.constant 1 : index
    %c0_5 = arith.constant 0 : index
    %c0_6 = arith.constant 0 : index
    %8 = vector.load %arg9[%c1, %c0_5, %c0_6] : memref<18x24x4xf32, #tpu.memory_space<vmem>>, vector<16x1x4xf32>
    tpu.vector_store %arg9[%c1, %c0_5, %c0_6], %7 {strides = array<i32>} : memref<18x24x4xf32, #tpu.memory_space<vmem>>, vector<16x1x4xf32>,
    %c1_7 = arith.constant 1 : index
    %c17_8 = arith.constant 17 : index
    %c0_9 = arith.constant 0 : index
    %9 = vector.load %arg9[%c1_7, %c17_8, %c0_9] : memref<18x24x4xf32, #tpu.memory_space<vmem>>, vector<16x1x4xf32>
    tpu.vector_store %arg9[%c1_7, %c17_8, %c0_9], %7 {strides = array<i32>} : memref<18x24x4xf32, #tpu.memory_space<vmem>>, vector<16x1x4xf32>,
    %cst_10 = arith.constant 0.000000e+00 : f32
    %10 = vector.broadcast %cst_10 : f32 to vector<24x8xf32>
    %c0_11 = arith.constant 0 : index
    %c0_12 = arith.constant 0 : index
    %c0_13 = arith.constant 0 : index
    %11 = vector.load %arg10[%c0_11, %c0_12, %c0_13] : memref<18x24x8xf32, #tpu.memory_space<vmem>>, vector<1x24x8xf32>
    %12 = vector.shape_cast %11 : vector<1x24x8xf32> to vector<24x8xf32>
    %13 = vector.shape_cast %10 : vector<24x8xf32> to vector<1x24x8xf32>
    tpu.vector_store %arg10[%c0_11, %c0_12, %c0_13], %13 {strides = array<i32>} : memref<18x24x8xf32, #tpu.memory_space<vmem>>, vector<1x24x8xf32>,
    %c17_14 = arith.constant 17 : index
    %c0_15 = arith.constant 0 : index
    %c0_16 = arith.constant 0 : index
    %14 = vector.load %arg10[%c17_14, %c0_15, %c0_16] : memref<18x24x8xf32, #tpu.memory_space<vmem>>, vector<1x24x8xf32>
    %15 = vector.shape_cast %14 : vector<1x24x8xf32> to vector<24x8xf32>
    %16 = vector.shape_cast %10 : vector<24x8xf32> to vector<1x24x8xf32>
    tpu.vector_store %arg10[%c17_14, %c0_15, %c0_16], %16 {strides = array<i32>} : memref<18x24x8xf32, #tpu.memory_space<vmem>>, vector<1x24x8xf32>,
    %cst_17 = arith.constant 0.000000e+00 : f32
    %17 = vector.broadcast %cst_17 : f32 to vector<16x1x8xf32>
    %c1_18 = arith.constant 1 : index
    %c0_19 = arith.constant 0 : index
    %c0_20 = arith.constant 0 : index
    %18 = vector.load %arg10[%c1_18, %c0_19, %c0_20] : memref<18x24x8xf32, #tpu.memory_space<vmem>>, vector<16x1x8xf32>
    tpu.vector_store %arg10[%c1_18, %c0_19, %c0_20], %17 {strides = array<i32>} : memref<18x24x8xf32, #tpu.memory_space<vmem>>, vector<16x1x8xf32>,
    %c1_21 = arith.constant 1 : index
    %c17_22 = arith.constant 17 : index
    %c0_23 = arith.constant 0 : index
    %19 = vector.load %arg10[%c1_21, %c17_22, %c0_23] : memref<18x24x8xf32, #tpu.memory_space<vmem>>, vector<16x1x8xf32>
    tpu.vector_store %arg10[%c1_21, %c17_22, %c0_23], %17 {strides = array<i32>} : memref<18x24x8xf32, #tpu.memory_space<vmem>>, vector<16x1x8xf32>,
    %c0_24 = arith.constant 0 : index
    %c0_25 = arith.constant 0 : index
    %c0_26 = arith.constant 0 : index
    %c0_27 = arith.constant 0 : index
    %20 = vector.load %arg1[%c0_24, %c0_25, %c0_26, %c0_27] : memref<1x16x16x4xf32, #tpu.memory_space<vmem>>, vector<1x16x16x4xf32>
    %21 = vector.shape_cast %20 : vector<1x16x16x4xf32> to vector<16x16x4xf32>
    %c1_28 = arith.constant 1 : index
    %c1_29 = arith.constant 1 : index
    %c0_30 = arith.constant 0 : index
    %22 = vector.load %arg9[%c1_28, %c1_29, %c0_30] : memref<18x24x4xf32, #tpu.memory_space<vmem>>, vector<16x16x4xf32>
    tpu.vector_store %arg9[%c1_28, %c1_29, %c0_30], %21 {strides = array<i32>} : memref<18x24x4xf32, #tpu.memory_space<vmem>>, vector<16x16x4xf32>,
    %c0_31 = arith.constant 0 : index
    %c0_32 = arith.constant 0 : index
    %23 = vector.load %arg3[%c0_31, %c0_32] : memref<1x8xf32, #tpu.memory_space<vmem>>, vector<1x8xf32>
    %c0_33 = arith.constant 0 : index
    %c0_34 = arith.constant 0 : index
    %24 = vector.load %arg4[%c0_33, %c0_34] : memref<1x8xf32, #tpu.memory_space<vmem>>, vector<1x8xf32>
    %c0_35 = arith.constant 0 : index
    %c0_36 = arith.constant 0 : index
    %c0_37 = arith.constant 0 : index
    %25 = vector.load %arg9[%c0_35, %c0_36, %c0_37] : memref<18x24x4xf32, #tpu.memory_space<vmem>>, vector<4x16x4xf32>
    %26 = vector.shape_cast %25 : vector<4x16x4xf32> to vector<64x4xf32>
    %27 = arith.truncf %26 : vector<64x4xf32> to vector<64x4xbf16>
    %c0_38 = arith.constant 0 : index
    %c0_39 = arith.constant 0 : index
    %c0_40 = arith.constant 0 : index
    %28 = vector.load %arg2[%c0_38, %c0_39, %c0_40] : memref<9x4x8xbf16, #tpu.memory_space<vmem>>, vector<1x4x8xbf16>
    %29 = vector.shape_cast %28 : vector<1x4x8xbf16> to vector<4x8xbf16>
    %cst_41 = arith.constant dense<0.000000e+00> : vector<64x8xf32>
    %30 = tpu.matmul %27, %29, %cst_41 {dimension_numbers = #tpu.dot_dimension_numbers<[1], [0], [0], [1], [0, 0, 1, 1], [], []>} : vector<64x4xbf16>, vector<4x8xbf16>, vector<64x8xf32> -> vector<64x8xf32>
    %c0_42 = arith.constant 0 : index
    %c1_43 = arith.constant 1 : index
    %c0_44 = arith.constant 0 : index
    %31 = vector.load %arg9[%c0_42, %c1_43, %c0_44] : memref<18x24x4xf32, #tpu.memory_space<vmem>>, vector<4x16x4xf32>
    %32 = vector.shape_cast %31 : vector<4x16x4xf32> to vector<64x4xf32>
    %33 = arith.truncf %32 : vector<64x4xf32> to vector<64x4xbf16>
    %c1_45 = arith.constant 1 : index
    %c0_46 = arith.constant 0 : index
    %c0_47 = arith.constant 0 : index
    %34 = vector.load %arg2[%c1_45, %c0_46, %c0_47] : memref<9x4x8xbf16, #tpu.memory_space<vmem>>, vector<1x4x8xbf16>
    %35 = vector.shape_cast %34 : vector<1x4x8xbf16> to vector<4x8xbf16>
    %cst_48 = arith.constant dense<0.000000e+00> : vector<64x8xf32>
    %36 = tpu.matmul %33, %35, %cst_48 {dimension_numbers = #tpu.dot_dimension_numbers<[1], [0], [0], [1], [0, 0, 1, 1], [], []>} : vector<64x4xbf16>, vector<4x8xbf16>, vector<64x8xf32> -> vector<64x8xf32>
    %37 = arith.addf %30, %36 : vector<64x8xf32>
    %c0_49 = arith.constant 0 : index
    %c2 = arith.constant 2 : index
    %c0_50 = arith.constant 0 : index
    %38 = vector.load %arg9[%c0_49, %c2, %c0_50] : memref<18x24x4xf32, #tpu.memory_space<vmem>>, vector<4x16x4xf32>
    %39 = vector.shape_cast %38 : vector<4x16x4xf32> to vector<64x4xf32>
    %40 = arith.truncf %39 : vector<64x4xf32> to vector<64x4xbf16>
    %c2_51 = arith.constant 2 : index
    %c0_52 = arith.constant 0 : index
    %c0_53 = arith.constant 0 : index
    %41 = vector.load %arg2[%c2_51, %c0_52, %c0_53] : memref<9x4x8xbf16, #tpu.memory_space<vmem>>, vector<1x4x8xbf16>
    %42 = vector.shape_cast %41 : vector<1x4x8xbf16> to vector<4x8xbf16>
    %cst_54 = arith.constant dense<0.000000e+00> : vector<64x8xf32>
    %43 = tpu.matmul %40, %42, %cst_54 {dimension_numbers = #tpu.dot_dimension_numbers<[1], [0], [0], [1], [0, 0, 1, 1], [], []>} : vector<64x4xbf16>, vector<4x8xbf16>, vector<64x8xf32> -> vector<64x8xf32>
    %44 = arith.addf %37, %43 : vector<64x8xf32>
    %c1_55 = arith.constant 1 : index
    %c0_56 = arith.constant 0 : index
    %c0_57 = arith.constant 0 : index
    %45 = vector.load %arg9[%c1_55, %c0_56, %c0_57] : memref<18x24x4xf32, #tpu.memory_space<vmem>>, vector<4x16x4xf32>
    %46 = vector.shape_cast %45 : vector<4x16x4xf32> to vector<64x4xf32>
    %47 = arith.truncf %46 : vector<64x4xf32> to vector<64x4xbf16>
    %c3 = arith.constant 3 : index
    %c0_58 = arith.constant 0 : index
    %c0_59 = arith.constant 0 : index
    %48 = vector.load %arg2[%c3, %c0_58, %c0_59] : memref<9x4x8xbf16, #tpu.memory_space<vmem>>, vector<1x4x8xbf16>
    %49 = vector.shape_cast %48 : vector<1x4x8xbf16> to vector<4x8xbf16>
    %cst_60 = arith.constant dense<0.000000e+00> : vector<64x8xf32>
    %50 = tpu.matmul %47, %49, %cst_60 {dimension_numbers = #tpu.dot_dimension_numbers<[1], [0], [0], [1], [0, 0, 1, 1], [], []>} : vector<64x4xbf16>, vector<4x8xbf16>, vector<64x8xf32> -> vector<64x8xf32>
    %51 = arith.addf %44, %50 : vector<64x8xf32>
    %c1_61 = arith.constant 1 : index
    %c1_62 = arith.constant 1 : index
    %c0_63 = arith.constant 0 : index
    %52 = vector.load %arg9[%c1_61, %c1_62, %c0_63] : memref<18x24x4xf32, #tpu.memory_space<vmem>>, vector<4x16x4xf32>
    %53 = vector.shape_cast %52 : vector<4x16x4xf32> to vector<64x4xf32>
    %54 = arith.truncf %53 : vector<64x4xf32> to vector<64x4xbf16>
    %c4 = arith.constant 4 : index
    %c0_64 = arith.constant 0 : index
    %c0_65 = arith.constant 0 : index
    %55 = vector.load %arg2[%c4, %c0_64, %c0_65] : memref<9x4x8xbf16, #tpu.memory_space<vmem>>, vector<1x4x8xbf16>
    %56 = vector.shape_cast %55 : vector<1x4x8xbf16> to vector<4x8xbf16>
    %cst_66 = arith.constant dense<0.000000e+00> : vector<64x8xf32>
    %57 = tpu.matmul %54, %56, %cst_66 {dimension_numbers = #tpu.dot_dimension_numbers<[1], [0], [0], [1], [0, 0, 1, 1], [], []>} : vector<64x4xbf16>, vector<4x8xbf16>, vector<64x8xf32> -> vector<64x8xf32>
    %58 = arith.addf %51, %57 : vector<64x8xf32>
    %c1_67 = arith.constant 1 : index
    %c2_68 = arith.constant 2 : index
    %c0_69 = arith.constant 0 : index
    %59 = vector.load %arg9[%c1_67, %c2_68, %c0_69] : memref<18x24x4xf32, #tpu.memory_space<vmem>>, vector<4x16x4xf32>
    %60 = vector.shape_cast %59 : vector<4x16x4xf32> to vector<64x4xf32>
    %61 = arith.truncf %60 : vector<64x4xf32> to vector<64x4xbf16>
    %c5 = arith.constant 5 : index
    %c0_70 = arith.constant 0 : index
    %c0_71 = arith.constant 0 : index
    %62 = vector.load %arg2[%c5, %c0_70, %c0_71] : memref<9x4x8xbf16, #tpu.memory_space<vmem>>, vector<1x4x8xbf16>
    %63 = vector.shape_cast %62 : vector<1x4x8xbf16> to vector<4x8xbf16>
    %cst_72 = arith.constant dense<0.000000e+00> : vector<64x8xf32>
    %64 = tpu.matmul %61, %63, %cst_72 {dimension_numbers = #tpu.dot_dimension_numbers<[1], [0], [0], [1], [0, 0, 1, 1], [], []>} : vector<64x4xbf16>, vector<4x8xbf16>, vector<64x8xf32> -> vector<64x8xf32>
    %65 = arith.addf %58, %64 : vector<64x8xf32>
    %c2_73 = arith.constant 2 : index
    %c0_74 = arith.constant 0 : index
    %c0_75 = arith.constant 0 : index
    %66 = vector.load %arg9[%c2_73, %c0_74, %c0_75] : memref<18x24x4xf32, #tpu.memory_space<vmem>>, vector<4x16x4xf32>
    %67 = vector.shape_cast %66 : vector<4x16x4xf32> to vector<64x4xf32>
    %68 = arith.truncf %67 : vector<64x4xf32> to vector<64x4xbf16>
    %c6 = arith.constant 6 : index
    %c0_76 = arith.constant 0 : index
    %c0_77 = arith.constant 0 : index
    %69 = vector.load %arg2[%c6, %c0_76, %c0_77] : memref<9x4x8xbf16, #tpu.memory_space<vmem>>, vector<1x4x8xbf16>
    %70 = vector.shape_cast %69 : vector<1x4x8xbf16> to vector<4x8xbf16>
    %cst_78 = arith.constant dense<0.000000e+00> : vector<64x8xf32>
    %71 = tpu.matmul %68, %70, %cst_78 {dimension_numbers = #tpu.dot_dimension_numbers<[1], [0], [0], [1], [0, 0, 1, 1], [], []>} : vector<64x4xbf16>, vector<4x8xbf16>, vector<64x8xf32> -> vector<64x8xf32>
    %72 = arith.addf %65, %71 : vector<64x8xf32>
    %c2_79 = arith.constant 2 : index
    %c1_80 = arith.constant 1 : index
    %c0_81 = arith.constant 0 : index
    %73 = vector.load %arg9[%c2_79, %c1_80, %c0_81] : memref<18x24x4xf32, #tpu.memory_space<vmem>>, vector<4x16x4xf32>
    %74 = vector.shape_cast %73 : vector<4x16x4xf32> to vector<64x4xf32>
    %75 = arith.truncf %74 : vector<64x4xf32> to vector<64x4xbf16>
    %c7 = arith.constant 7 : index
    %c0_82 = arith.constant 0 : index
    %c0_83 = arith.constant 0 : index
    %76 = vector.load %arg2[%c7, %c0_82, %c0_83] : memref<9x4x8xbf16, #tpu.memory_space<vmem>>, vector<1x4x8xbf16>
    %77 = vector.shape_cast %76 : vector<1x4x8xbf16> to vector<4x8xbf16>
    %cst_84 = arith.constant dense<0.000000e+00> : vector<64x8xf32>
    %78 = tpu.matmul %75, %77, %cst_84 {dimension_numbers = #tpu.dot_dimension_numbers<[1], [0], [0], [1], [0, 0, 1, 1], [], []>} : vector<64x4xbf16>, vector<4x8xbf16>, vector<64x8xf32> -> vector<64x8xf32>
    %79 = arith.addf %72, %78 : vector<64x8xf32>
    %c2_85 = arith.constant 2 : index
    %c2_86 = arith.constant 2 : index
    %c0_87 = arith.constant 0 : index
    %80 = vector.load %arg9[%c2_85, %c2_86, %c0_87] : memref<18x24x4xf32, #tpu.memory_space<vmem>>, vector<4x16x4xf32>
    %81 = vector.shape_cast %80 : vector<4x16x4xf32> to vector<64x4xf32>
    %82 = arith.truncf %81 : vector<64x4xf32> to vector<64x4xbf16>
    %c8 = arith.constant 8 : index
    %c0_88 = arith.constant 0 : index
    %c0_89 = arith.constant 0 : index
    %83 = vector.load %arg2[%c8, %c0_88, %c0_89] : memref<9x4x8xbf16, #tpu.memory_space<vmem>>, vector<1x4x8xbf16>
    %84 = vector.shape_cast %83 : vector<1x4x8xbf16> to vector<4x8xbf16>
    %cst_90 = arith.constant dense<0.000000e+00> : vector<64x8xf32>
    %85 = tpu.matmul %82, %84, %cst_90 {dimension_numbers = #tpu.dot_dimension_numbers<[1], [0], [0], [1], [0, 0, 1, 1], [], []>} : vector<64x4xbf16>, vector<4x8xbf16>, vector<64x8xf32> -> vector<64x8xf32>
    %86 = arith.addf %79, %85 : vector<64x8xf32>
    %87 = vector.broadcast %23 : vector<1x8xf32> to vector<64x8xf32>
    %88 = arith.mulf %86, %87 : vector<64x8xf32>
    %89 = vector.broadcast %24 : vector<1x8xf32> to vector<64x8xf32>
    %90 = arith.addf %88, %89 : vector<64x8xf32>
    %cst_91 = arith.constant 0.000000e+00 : f32
    %91 = vector.broadcast %cst_91 : f32 to vector<64x8xf32>
    %92 = arith.maximumf %90, %91 : vector<64x8xf32>
    %93 = vector.shape_cast %92 : vector<64x8xf32> to vector<4x16x8xf32>
    %c1_92 = arith.constant 1 : index
    %c1_93 = arith.constant 1 : index
    %c0_94 = arith.constant 0 : index
    %94 = vector.load %arg10[%c1_92, %c1_93, %c0_94] : memref<18x24x8xf32, #tpu.memory_space<vmem>>, vector<4x16x8xf32>
    tpu.vector_store %arg10[%c1_92, %c1_93, %c0_94], %93 {strides = array<i32>} : memref<18x24x8xf32, #tpu.memory_space<vmem>>, vector<4x16x8xf32>,
    %c4_95 = arith.constant 4 : index
    %c0_96 = arith.constant 0 : index
    %c0_97 = arith.constant 0 : index
    %95 = vector.load %arg9[%c4_95, %c0_96, %c0_97] : memref<18x24x4xf32, #tpu.memory_space<vmem>>, vector<4x16x4xf32>
    %96 = vector.shape_cast %95 : vector<4x16x4xf32> to vector<64x4xf32>
    %97 = arith.truncf %96 : vector<64x4xf32> to vector<64x4xbf16>
    %c0_98 = arith.constant 0 : index
    %c0_99 = arith.constant 0 : index
    %c0_100 = arith.constant 0 : index
    %98 = vector.load %arg2[%c0_98, %c0_99, %c0_100] : memref<9x4x8xbf16, #tpu.memory_space<vmem>>, vector<1x4x8xbf16>
    %99 = vector.shape_cast %98 : vector<1x4x8xbf16> to vector<4x8xbf16>
    %cst_101 = arith.constant dense<0.000000e+00> : vector<64x8xf32>
    %100 = tpu.matmul %97, %99, %cst_101 {dimension_numbers = #tpu.dot_dimension_numbers<[1], [0], [0], [1], [0, 0, 1, 1], [], []>} : vector<64x4xbf16>, vector<4x8xbf16>, vector<64x8xf32> -> vector<64x8xf32>
    %c4_102 = arith.constant 4 : index
    %c1_103 = arith.constant 1 : index
    %c0_104 = arith.constant 0 : index
    %101 = vector.load %arg9[%c4_102, %c1_103, %c0_104] : memref<18x24x4xf32, #tpu.memory_space<vmem>>, vector<4x16x4xf32>
    %102 = vector.shape_cast %101 : vector<4x16x4xf32> to vector<64x4xf32>
    %103 = arith.truncf %102 : vector<64x4xf32> to vector<64x4xbf16>
    %c1_105 = arith.constant 1 : index
    %c0_106 = arith.constant 0 : index
    %c0_107 = arith.constant 0 : index
    %104 = vector.load %arg2[%c1_105, %c0_106, %c0_107] : memref<9x4x8xbf16, #tpu.memory_space<vmem>>, vector<1x4x8xbf16>
    %105 = vector.shape_cast %104 : vector<1x4x8xbf16> to vector<4x8xbf16>
    %cst_108 = arith.constant dense<0.000000e+00> : vector<64x8xf32>
    %106 = tpu.matmul %103, %105, %cst_108 {dimension_numbers = #tpu.dot_dimension_numbers<[1], [0], [0], [1], [0, 0, 1, 1], [], []>} : vector<64x4xbf16>, vector<4x8xbf16>, vector<64x8xf32> -> vector<64x8xf32>
    %107 = arith.addf %100, %106 : vector<64x8xf32>
    %c4_109 = arith.constant 4 : index
    %c2_110 = arith.constant 2 : index
    %c0_111 = arith.constant 0 : index
    %108 = vector.load %arg9[%c4_109, %c2_110, %c0_111] : memref<18x24x4xf32, #tpu.memory_space<vmem>>, vector<4x16x4xf32>
    %109 = vector.shape_cast %108 : vector<4x16x4xf32> to vector<64x4xf32>
    %110 = arith.truncf %109 : vector<64x4xf32> to vector<64x4xbf16>
    %c2_112 = arith.constant 2 : index
    %c0_113 = arith.constant 0 : index
    %c0_114 = arith.constant 0 : index
    %111 = vector.load %arg2[%c2_112, %c0_113, %c0_114] : memref<9x4x8xbf16, #tpu.memory_space<vmem>>, vector<1x4x8xbf16>
    %112 = vector.shape_cast %111 : vector<1x4x8xbf16> to vector<4x8xbf16>
    %cst_115 = arith.constant dense<0.000000e+00> : vector<64x8xf32>
    %113 = tpu.matmul %110, %112, %cst_115 {dimension_numbers = #tpu.dot_dimension_numbers<[1], [0], [0], [1], [0, 0, 1, 1], [], []>} : vector<64x4xbf16>, vector<4x8xbf16>, vector<64x8xf32> -> vector<64x8xf32>
    %114 = arith.addf %107, %113 : vector<64x8xf32>
    %c5_116 = arith.constant 5 : index
    %c0_117 = arith.constant 0 : index
    %c0_118 = arith.constant 0 : index
    %115 = vector.load %arg9[%c5_116, %c0_117, %c0_118] : memref<18x24x4xf32, #tpu.memory_space<vmem>>, vector<4x16x4xf32>
    %116 = vector.shape_cast %115 : vector<4x16x4xf32> to vector<64x4xf32>
    %117 = arith.truncf %116 : vector<64x4xf32> to vector<64x4xbf16>
    %c3_119 = arith.constant 3 : index
    %c0_120 = arith.constant 0 : index
    %c0_121 = arith.constant 0 : index
    %118 = vector.load %arg2[%c3_119, %c0_120, %c0_121] : memref<9x4x8xbf16, #tpu.memory_space<vmem>>, vector<1x4x8xbf16>
    %119 = vector.shape_cast %118 : vector<1x4x8xbf16> to vector<4x8xbf16>
    %cst_122 = arith.constant dense<0.000000e+00> : vector<64x8xf32>
    %120 = tpu.matmul %117, %119, %cst_122 {dimension_numbers = #tpu.dot_dimension_numbers<[1], [0], [0], [1], [0, 0, 1, 1], [], []>} : vector<64x4xbf16>, vector<4x8xbf16>, vector<64x8xf32> -> vector<64x8xf32>
    %121 = arith.addf %114, %120 : vector<64x8xf32>
    %c5_123 = arith.constant 5 : index
    %c1_124 = arith.constant 1 : index
    %c0_125 = arith.constant 0 : index
    %122 = vector.load %arg9[%c5_123, %c1_124, %c0_125] : memref<18x24x4xf32, #tpu.memory_space<vmem>>, vector<4x16x4xf32>
    %123 = vector.shape_cast %122 : vector<4x16x4xf32> to vector<64x4xf32>
    %124 = arith.truncf %123 : vector<64x4xf32> to vector<64x4xbf16>
    %c4_126 = arith.constant 4 : index
    %c0_127 = arith.constant 0 : index
    %c0_128 = arith.constant 0 : index
    %125 = vector.load %arg2[%c4_126, %c0_127, %c0_128] : memref<9x4x8xbf16, #tpu.memory_space<vmem>>, vector<1x4x8xbf16>
    %126 = vector.shape_cast %125 : vector<1x4x8xbf16> to vector<4x8xbf16>
    %cst_129 = arith.constant dense<0.000000e+00> : vector<64x8xf32>
    %127 = tpu.matmul %124, %126, %cst_129 {dimension_numbers = #tpu.dot_dimension_numbers<[1], [0], [0], [1], [0, 0, 1, 1], [], []>} : vector<64x4xbf16>, vector<4x8xbf16>, vector<64x8xf32> -> vector<64x8xf32>
    %128 = arith.addf %121, %127 : vector<64x8xf32>
    %c5_130 = arith.constant 5 : index
    %c2_131 = arith.constant 2 : index
    %c0_132 = arith.constant 0 : index
    %129 = vector.load %arg9[%c5_130, %c2_131, %c0_132] : memref<18x24x4xf32, #tpu.memory_space<vmem>>, vector<4x16x4xf32>
    %130 = vector.shape_cast %129 : vector<4x16x4xf32> to vector<64x4xf32>
    %131 = arith.truncf %130 : vector<64x4xf32> to vector<64x4xbf16>
    %c5_133 = arith.constant 5 : index
    %c0_134 = arith.constant 0 : index
    %c0_135 = arith.constant 0 : index
    %132 = vector.load %arg2[%c5_133, %c0_134, %c0_135] : memref<9x4x8xbf16, #tpu.memory_space<vmem>>, vector<1x4x8xbf16>
    %133 = vector.shape_cast %132 : vector<1x4x8xbf16> to vector<4x8xbf16>
    %cst_136 = arith.constant dense<0.000000e+00> : vector<64x8xf32>
    %134 = tpu.matmul %131, %133, %cst_136 {dimension_numbers = #tpu.dot_dimension_numbers<[1], [0], [0], [1], [0, 0, 1, 1], [], []>} : vector<64x4xbf16>, vector<4x8xbf16>, vector<64x8xf32> -> vector<64x8xf32>
    %135 = arith.addf %128, %134 : vector<64x8xf32>
    %c6_137 = arith.constant 6 : index
    %c0_138 = arith.constant 0 : index
    %c0_139 = arith.constant 0 : index
    %136 = vector.load %arg9[%c6_137, %c0_138, %c0_139] : memref<18x24x4xf32, #tpu.memory_space<vmem>>, vector<4x16x4xf32>
    %137 = vector.shape_cast %136 : vector<4x16x4xf32> to vector<64x4xf32>
    %138 = arith.truncf %137 : vector<64x4xf32> to vector<64x4xbf16>
    %c6_140 = arith.constant 6 : index
    %c0_141 = arith.constant 0 : index
    %c0_142 = arith.constant 0 : index
    %139 = vector.load %arg2[%c6_140, %c0_141, %c0_142] : memref<9x4x8xbf16, #tpu.memory_space<vmem>>, vector<1x4x8xbf16>
    %140 = vector.shape_cast %139 : vector<1x4x8xbf16> to vector<4x8xbf16>
    %cst_143 = arith.constant dense<0.000000e+00> : vector<64x8xf32>
    %141 = tpu.matmul %138, %140, %cst_143 {dimension_numbers = #tpu.dot_dimension_numbers<[1], [0], [0], [1], [0, 0, 1, 1], [], []>} : vector<64x4xbf16>, vector<4x8xbf16>, vector<64x8xf32> -> vector<64x8xf32>
    %142 = arith.addf %135, %141 : vector<64x8xf32>
    %c6_144 = arith.constant 6 : index
    %c1_145 = arith.constant 1 : index
    %c0_146 = arith.constant 0 : index
    %143 = vector.load %arg9[%c6_144, %c1_145, %c0_146] : memref<18x24x4xf32, #tpu.memory_space<vmem>>, vector<4x16x4xf32>
    %144 = vector.shape_cast %143 : vector<4x16x4xf32> to vector<64x4xf32>
    %145 = arith.truncf %144 : vector<64x4xf32> to vector<64x4xbf16>
    %c7_147 = arith.constant 7 : index
    %c0_148 = arith.constant 0 : index
    %c0_149 = arith.constant 0 : index
    %146 = vector.load %arg2[%c7_147, %c0_148, %c0_149] : memref<9x4x8xbf16, #tpu.memory_space<vmem>>, vector<1x4x8xbf16>
    %147 = vector.shape_cast %146 : vector<1x4x8xbf16> to vector<4x8xbf16>
    %cst_150 = arith.constant dense<0.000000e+00> : vector<64x8xf32>
    %148 = tpu.matmul %145, %147, %cst_150 {dimension_numbers = #tpu.dot_dimension_numbers<[1], [0], [0], [1], [0, 0, 1, 1], [], []>} : vector<64x4xbf16>, vector<4x8xbf16>, vector<64x8xf32> -> vector<64x8xf32>
    %149 = arith.addf %142, %148 : vector<64x8xf32>
    %c6_151 = arith.constant 6 : index
    %c2_152 = arith.constant 2 : index
    %c0_153 = arith.constant 0 : index
    %150 = vector.load %arg9[%c6_151, %c2_152, %c0_153] : memref<18x24x4xf32, #tpu.memory_space<vmem>>, vector<4x16x4xf32>
    %151 = vector.shape_cast %150 : vector<4x16x4xf32> to vector<64x4xf32>
    %152 = arith.truncf %151 : vector<64x4xf32> to vector<64x4xbf16>
    %c8_154 = arith.constant 8 : index
    %c0_155 = arith.constant 0 : index
    %c0_156 = arith.constant 0 : index
    %153 = vector.load %arg2[%c8_154, %c0_155, %c0_156] : memref<9x4x8xbf16, #tpu.memory_space<vmem>>, vector<1x4x8xbf16>
    %154 = vector.shape_cast %153 : vector<1x4x8xbf16> to vector<4x8xbf16>
    %cst_157 = arith.constant dense<0.000000e+00> : vector<64x8xf32>
    %155 = tpu.matmul %152, %154, %cst_157 {dimension_numbers = #tpu.dot_dimension_numbers<[1], [0], [0], [1], [0, 0, 1, 1], [], []>} : vector<64x4xbf16>, vector<4x8xbf16>, vector<64x8xf32> -> vector<64x8xf32>
    %156 = arith.addf %149, %155 : vector<64x8xf32>
    %157 = vector.broadcast %23 : vector<1x8xf32> to vector<64x8xf32>
    %158 = arith.mulf %156, %157 : vector<64x8xf32>
    %159 = vector.broadcast %24 : vector<1x8xf32> to vector<64x8xf32>
    %160 = arith.addf %158, %159 : vector<64x8xf32>
    %cst_158 = arith.constant 0.000000e+00 : f32
    %161 = vector.broadcast %cst_158 : f32 to vector<64x8xf32>
    %162 = arith.maximumf %160, %161 : vector<64x8xf32>
    %163 = vector.shape_cast %162 : vector<64x8xf32> to vector<4x16x8xf32>
    %c5_159 = arith.constant 5 : index
    %c1_160 = arith.constant 1 : index
    %c0_161 = arith.constant 0 : index
    %164 = vector.load %arg10[%c5_159, %c1_160, %c0_161] : memref<18x24x8xf32, #tpu.memory_space<vmem>>, vector<4x16x8xf32>
    tpu.vector_store %arg10[%c5_159, %c1_160, %c0_161], %163 {strides = array<i32>} : memref<18x24x8xf32, #tpu.memory_space<vmem>>, vector<4x16x8xf32>,
    %c8_162 = arith.constant 8 : index
    %c0_163 = arith.constant 0 : index
    %c0_164 = arith.constant 0 : index
    %165 = vector.load %arg9[%c8_162, %c0_163, %c0_164] : memref<18x24x4xf32, #tpu.memory_space<vmem>>, vector<4x16x4xf32>
    %166 = vector.shape_cast %165 : vector<4x16x4xf32> to vector<64x4xf32>
    %167 = arith.truncf %166 : vector<64x4xf32> to vector<64x4xbf16>
    %c0_165 = arith.constant 0 : index
    %c0_166 = arith.constant 0 : index
    %c0_167 = arith.constant 0 : index
    %168 = vector.load %arg2[%c0_165, %c0_166, %c0_167] : memref<9x4x8xbf16, #tpu.memory_space<vmem>>, vector<1x4x8xbf16>
    %169 = vector.shape_cast %168 : vector<1x4x8xbf16> to vector<4x8xbf16>
    %cst_168 = arith.constant dense<0.000000e+00> : vector<64x8xf32>
    %170 = tpu.matmul %167, %169, %cst_168 {dimension_numbers = #tpu.dot_dimension_numbers<[1], [0], [0], [1], [0, 0, 1, 1], [], []>} : vector<64x4xbf16>, vector<4x8xbf16>, vector<64x8xf32> -> vector<64x8xf32>
    %c8_169 = arith.constant 8 : index
    %c1_170 = arith.constant 1 : index
    %c0_171 = arith.constant 0 : index
    %171 = vector.load %arg9[%c8_169, %c1_170, %c0_171] : memref<18x24x4xf32, #tpu.memory_space<vmem>>, vector<4x16x4xf32>
    %172 = vector.shape_cast %171 : vector<4x16x4xf32> to vector<64x4xf32>
    %173 = arith.truncf %172 : vector<64x4xf32> to vector<64x4xbf16>
    %c1_172 = arith.constant 1 : index
    %c0_173 = arith.constant 0 : index
    %c0_174 = arith.constant 0 : index
    %174 = vector.load %arg2[%c1_172, %c0_173, %c0_174] : memref<9x4x8xbf16, #tpu.memory_space<vmem>>, vector<1x4x8xbf16>
    %175 = vector.shape_cast %174 : vector<1x4x8xbf16> to vector<4x8xbf16>
    %cst_175 = arith.constant dense<0.000000e+00> : vector<64x8xf32>
    %176 = tpu.matmul %173, %175, %cst_175 {dimension_numbers = #tpu.dot_dimension_numbers<[1], [0], [0], [1], [0, 0, 1, 1], [], []>} : vector<64x4xbf16>, vector<4x8xbf16>, vector<64x8xf32> -> vector<64x8xf32>
    %177 = arith.addf %170, %176 : vector<64x8xf32>
    %c8_176 = arith.constant 8 : index
    %c2_177 = arith.constant 2 : index
    %c0_178 = arith.constant 0 : index
    %178 = vector.load %arg9[%c8_176, %c2_177, %c0_178] : memref<18x24x4xf32, #tpu.memory_space<vmem>>, vector<4x16x4xf32>
    %179 = vector.shape_cast %178 : vector<4x16x4xf32> to vector<64x4xf32>
    %180 = arith.truncf %179 : vector<64x4xf32> to vector<64x4xbf16>
    %c2_179 = arith.constant 2 : index
    %c0_180 = arith.constant 0 : index
    %c0_181 = arith.constant 0 : index
    %181 = vector.load %arg2[%c2_179, %c0_180, %c0_181] : memref<9x4x8xbf16, #tpu.memory_space<vmem>>, vector<1x4x8xbf16>
    %182 = vector.shape_cast %181 : vector<1x4x8xbf16> to vector<4x8xbf16>
    %cst_182 = arith.constant dense<0.000000e+00> : vector<64x8xf32>
    %183 = tpu.matmul %180, %182, %cst_182 {dimension_numbers = #tpu.dot_dimension_numbers<[1], [0], [0], [1], [0, 0, 1, 1], [], []>} : vector<64x4xbf16>, vector<4x8xbf16>, vector<64x8xf32> -> vector<64x8xf32>
    %184 = arith.addf %177, %183 : vector<64x8xf32>
    %c9 = arith.constant 9 : index
    %c0_183 = arith.constant 0 : index
    %c0_184 = arith.constant 0 : index
    %185 = vector.load %arg9[%c9, %c0_183, %c0_184] : memref<18x24x4xf32, #tpu.memory_space<vmem>>, vector<4x16x4xf32>
    %186 = vector.shape_cast %185 : vector<4x16x4xf32> to vector<64x4xf32>
    %187 = arith.truncf %186 : vector<64x4xf32> to vector<64x4xbf16>
    %c3_185 = arith.constant 3 : index
    %c0_186 = arith.constant 0 : index
    %c0_187 = arith.constant 0 : index
    %188 = vector.load %arg2[%c3_185, %c0_186, %c0_187] : memref<9x4x8xbf16, #tpu.memory_space<vmem>>, vector<1x4x8xbf16>
    %189 = vector.shape_cast %188 : vector<1x4x8xbf16> to vector<4x8xbf16>
    %cst_188 = arith.constant dense<0.000000e+00> : vector<64x8xf32>
    %190 = tpu.matmul %187, %189, %cst_188 {dimension_numbers = #tpu.dot_dimension_numbers<[1], [0], [0], [1], [0, 0, 1, 1], [], []>} : vector<64x4xbf16>, vector<4x8xbf16>, vector<64x8xf32> -> vector<64x8xf32>
    %191 = arith.addf %184, %190 : vector<64x8xf32>
    %c9_189 = arith.constant 9 : index
    %c1_190 = arith.constant 1 : index
    %c0_191 = arith.constant 0 : index
    %192 = vector.load %arg9[%c9_189, %c1_190, %c0_191] : memref<18x24x4xf32, #tpu.memory_space<vmem>>, vector<4x16x4xf32>
    %193 = vector.shape_cast %192 : vector<4x16x4xf32> to vector<64x4xf32>
    %194 = arith.truncf %193 : vector<64x4xf32> to vector<64x4xbf16>
    %c4_192 = arith.constant 4 : index
    %c0_193 = arith.constant 0 : index
    %c0_194 = arith.constant 0 : index
    %195 = vector.load %arg2[%c4_192, %c0_193, %c0_194] : memref<9x4x8xbf16, #tpu.memory_space<vmem>>, vector<1x4x8xbf16>
    %196 = vector.shape_cast %195 : vector<1x4x8xbf16> to vector<4x8xbf16>
    %cst_195 = arith.constant dense<0.000000e+00> : vector<64x8xf32>
    %197 = tpu.matmul %194, %196, %cst_195 {dimension_numbers = #tpu.dot_dimension_numbers<[1], [0], [0], [1], [0, 0, 1, 1], [], []>} : vector<64x4xbf16>, vector<4x8xbf16>, vector<64x8xf32> -> vector<64x8xf32>
    %198 = arith.addf %191, %197 : vector<64x8xf32>
    %c9_196 = arith.constant 9 : index
    %c2_197 = arith.constant 2 : index
    %c0_198 = arith.constant 0 : index
    %199 = vector.load %arg9[%c9_196, %c2_197, %c0_198] : memref<18x24x4xf32, #tpu.memory_space<vmem>>, vector<4x16x4xf32>
    %200 = vector.shape_cast %199 : vector<4x16x4xf32> to vector<64x4xf32>
    %201 = arith.truncf %200 : vector<64x4xf32> to vector<64x4xbf16>
    %c5_199 = arith.constant 5 : index
    %c0_200 = arith.constant 0 : index
    %c0_201 = arith.constant 0 : index
    %202 = vector.load %arg2[%c5_199, %c0_200, %c0_201] : memref<9x4x8xbf16, #tpu.memory_space<vmem>>, vector<1x4x8xbf16>
    %203 = vector.shape_cast %202 : vector<1x4x8xbf16> to vector<4x8xbf16>
    %cst_202 = arith.constant dense<0.000000e+00> : vector<64x8xf32>
    %204 = tpu.matmul %201, %203, %cst_202 {dimension_numbers = #tpu.dot_dimension_numbers<[1], [0], [0], [1], [0, 0, 1, 1], [], []>} : vector<64x4xbf16>, vector<4x8xbf16>, vector<64x8xf32> -> vector<64x8xf32>
    %205 = arith.addf %198, %204 : vector<64x8xf32>
    %c10 = arith.constant 10 : index
    %c0_203 = arith.constant 0 : index
    %c0_204 = arith.constant 0 : index
    %206 = vector.load %arg9[%c10, %c0_203, %c0_204] : memref<18x24x4xf32, #tpu.memory_space<vmem>>, vector<4x16x4xf32>
    %207 = vector.shape_cast %206 : vector<4x16x4xf32> to vector<64x4xf32>
    %208 = arith.truncf %207 : vector<64x4xf32> to vector<64x4xbf16>
    %c6_205 = arith.constant 6 : index
    %c0_206 = arith.constant 0 : index
    %c0_207 = arith.constant 0 : index
    %209 = vector.load %arg2[%c6_205, %c0_206, %c0_207] : memref<9x4x8xbf16, #tpu.memory_space<vmem>>, vector<1x4x8xbf16>
    %210 = vector.shape_cast %209 : vector<1x4x8xbf16> to vector<4x8xbf16>
    %cst_208 = arith.constant dense<0.000000e+00> : vector<64x8xf32>
    %211 = tpu.matmul %208, %210, %cst_208 {dimension_numbers = #tpu.dot_dimension_numbers<[1], [0], [0], [1], [0, 0, 1, 1], [], []>} : vector<64x4xbf16>, vector<4x8xbf16>, vector<64x8xf32> -> vector<64x8xf32>
    %212 = arith.addf %205, %211 : vector<64x8xf32>
    %c10_209 = arith.constant 10 : index
    %c1_210 = arith.constant 1 : index
    %c0_211 = arith.constant 0 : index
    %213 = vector.load %arg9[%c10_209, %c1_210, %c0_211] : memref<18x24x4xf32, #tpu.memory_space<vmem>>, vector<4x16x4xf32>
    %214 = vector.shape_cast %213 : vector<4x16x4xf32> to vector<64x4xf32>
    %215 = arith.truncf %214 : vector<64x4xf32> to vector<64x4xbf16>
    %c7_212 = arith.constant 7 : index
    %c0_213 = arith.constant 0 : index
    %c0_214 = arith.constant 0 : index
    %216 = vector.load %arg2[%c7_212, %c0_213, %c0_214] : memref<9x4x8xbf16, #tpu.memory_space<vmem>>, vector<1x4x8xbf16>
    %217 = vector.shape_cast %216 : vector<1x4x8xbf16> to vector<4x8xbf16>
    %cst_215 = arith.constant dense<0.000000e+00> : vector<64x8xf32>
    %218 = tpu.matmul %215, %217, %cst_215 {dimension_numbers = #tpu.dot_dimension_numbers<[1], [0], [0], [1], [0, 0, 1, 1], [], []>} : vector<64x4xbf16>, vector<4x8xbf16>, vector<64x8xf32> -> vector<64x8xf32>
    %219 = arith.addf %212, %218 : vector<64x8xf32>
    %c10_216 = arith.constant 10 : index
    %c2_217 = arith.constant 2 : index
    %c0_218 = arith.constant 0 : index
    %220 = vector.load %arg9[%c10_216, %c2_217, %c0_218] : memref<18x24x4xf32, #tpu.memory_space<vmem>>, vector<4x16x4xf32>
    %221 = vector.shape_cast %220 : vector<4x16x4xf32> to vector<64x4xf32>
    %222 = arith.truncf %221 : vector<64x4xf32> to vector<64x4xbf16>
    %c8_219 = arith.constant 8 : index
    %c0_220 = arith.constant 0 : index
    %c0_221 = arith.constant 0 : index
    %223 = vector.load %arg2[%c8_219, %c0_220, %c0_221] : memref<9x4x8xbf16, #tpu.memory_space<vmem>>, vector<1x4x8xbf16>
    %224 = vector.shape_cast %223 : vector<1x4x8xbf16> to vector<4x8xbf16>
    %cst_222 = arith.constant dense<0.000000e+00> : vector<64x8xf32>
    %225 = tpu.matmul %222, %224, %cst_222 {dimension_numbers = #tpu.dot_dimension_numbers<[1], [0], [0], [1], [0, 0, 1, 1], [], []>} : vector<64x4xbf16>, vector<4x8xbf16>, vector<64x8xf32> -> vector<64x8xf32>
    %226 = arith.addf %219, %225 : vector<64x8xf32>
    %227 = vector.broadcast %23 : vector<1x8xf32> to vector<64x8xf32>
    %228 = arith.mulf %226, %227 : vector<64x8xf32>
    %229 = vector.broadcast %24 : vector<1x8xf32> to vector<64x8xf32>
    %230 = arith.addf %228, %229 : vector<64x8xf32>
    %cst_223 = arith.constant 0.000000e+00 : f32
    %231 = vector.broadcast %cst_223 : f32 to vector<64x8xf32>
    %232 = arith.maximumf %230, %231 : vector<64x8xf32>
    %233 = vector.shape_cast %232 : vector<64x8xf32> to vector<4x16x8xf32>
    %c9_224 = arith.constant 9 : index
    %c1_225 = arith.constant 1 : index
    %c0_226 = arith.constant 0 : index
    %234 = vector.load %arg10[%c9_224, %c1_225, %c0_226] : memref<18x24x8xf32, #tpu.memory_space<vmem>>, vector<4x16x8xf32>
    tpu.vector_store %arg10[%c9_224, %c1_225, %c0_226], %233 {strides = array<i32>} : memref<18x24x8xf32, #tpu.memory_space<vmem>>, vector<4x16x8xf32>,
    %c12 = arith.constant 12 : index
    %c0_227 = arith.constant 0 : index
    %c0_228 = arith.constant 0 : index
    %235 = vector.load %arg9[%c12, %c0_227, %c0_228] : memref<18x24x4xf32, #tpu.memory_space<vmem>>, vector<4x16x4xf32>
    %236 = vector.shape_cast %235 : vector<4x16x4xf32> to vector<64x4xf32>
    %237 = arith.truncf %236 : vector<64x4xf32> to vector<64x4xbf16>
    %c0_229 = arith.constant 0 : index
    %c0_230 = arith.constant 0 : index
    %c0_231 = arith.constant 0 : index
    %238 = vector.load %arg2[%c0_229, %c0_230, %c0_231] : memref<9x4x8xbf16, #tpu.memory_space<vmem>>, vector<1x4x8xbf16>
    %239 = vector.shape_cast %238 : vector<1x4x8xbf16> to vector<4x8xbf16>
    %cst_232 = arith.constant dense<0.000000e+00> : vector<64x8xf32>
    %240 = tpu.matmul %237, %239, %cst_232 {dimension_numbers = #tpu.dot_dimension_numbers<[1], [0], [0], [1], [0, 0, 1, 1], [], []>} : vector<64x4xbf16>, vector<4x8xbf16>, vector<64x8xf32> -> vector<64x8xf32>
    %c12_233 = arith.constant 12 : index
    %c1_234 = arith.constant 1 : index
    %c0_235 = arith.constant 0 : index
    %241 = vector.load %arg9[%c12_233, %c1_234, %c0_235] : memref<18x24x4xf32, #tpu.memory_space<vmem>>, vector<4x16x4xf32>
    %242 = vector.shape_cast %241 : vector<4x16x4xf32> to vector<64x4xf32>
    %243 = arith.truncf %242 : vector<64x4xf32> to vector<64x4xbf16>
    %c1_236 = arith.constant 1 : index
    %c0_237 = arith.constant 0 : index
    %c0_238 = arith.constant 0 : index
    %244 = vector.load %arg2[%c1_236, %c0_237, %c0_238] : memref<9x4x8xbf16, #tpu.memory_space<vmem>>, vector<1x4x8xbf16>
    %245 = vector.shape_cast %244 : vector<1x4x8xbf16> to vector<4x8xbf16>
    %cst_239 = arith.constant dense<0.000000e+00> : vector<64x8xf32>
    %246 = tpu.matmul %243, %245, %cst_239 {dimension_numbers = #tpu.dot_dimension_numbers<[1], [0], [0], [1], [0, 0, 1, 1], [], []>} : vector<64x4xbf16>, vector<4x8xbf16>, vector<64x8xf32> -> vector<64x8xf32>
    %247 = arith.addf %240, %246 : vector<64x8xf32>
    %c12_240 = arith.constant 12 : index
    %c2_241 = arith.constant 2 : index
    %c0_242 = arith.constant 0 : index
    %248 = vector.load %arg9[%c12_240, %c2_241, %c0_242] : memref<18x24x4xf32, #tpu.memory_space<vmem>>, vector<4x16x4xf32>
    %249 = vector.shape_cast %248 : vector<4x16x4xf32> to vector<64x4xf32>
    %250 = arith.truncf %249 : vector<64x4xf32> to vector<64x4xbf16>
    %c2_243 = arith.constant 2 : index
    %c0_244 = arith.constant 0 : index
    %c0_245 = arith.constant 0 : index
    %251 = vector.load %arg2[%c2_243, %c0_244, %c0_245] : memref<9x4x8xbf16, #tpu.memory_space<vmem>>, vector<1x4x8xbf16>
    %252 = vector.shape_cast %251 : vector<1x4x8xbf16> to vector<4x8xbf16>
    %cst_246 = arith.constant dense<0.000000e+00> : vector<64x8xf32>
    %253 = tpu.matmul %250, %252, %cst_246 {dimension_numbers = #tpu.dot_dimension_numbers<[1], [0], [0], [1], [0, 0, 1, 1], [], []>} : vector<64x4xbf16>, vector<4x8xbf16>, vector<64x8xf32> -> vector<64x8xf32>
    %254 = arith.addf %247, %253 : vector<64x8xf32>
    %c13 = arith.constant 13 : index
    %c0_247 = arith.constant 0 : index
    %c0_248 = arith.constant 0 : index
    %255 = vector.load %arg9[%c13, %c0_247, %c0_248] : memref<18x24x4xf32, #tpu.memory_space<vmem>>, vector<4x16x4xf32>
    %256 = vector.shape_cast %255 : vector<4x16x4xf32> to vector<64x4xf32>
    %257 = arith.truncf %256 : vector<64x4xf32> to vector<64x4xbf16>
    %c3_249 = arith.constant 3 : index
    %c0_250 = arith.constant 0 : index
    %c0_251 = arith.constant 0 : index
    %258 = vector.load %arg2[%c3_249, %c0_250, %c0_251] : memref<9x4x8xbf16, #tpu.memory_space<vmem>>, vector<1x4x8xbf16>
    %259 = vector.shape_cast %258 : vector<1x4x8xbf16> to vector<4x8xbf16>
    %cst_252 = arith.constant dense<0.000000e+00> : vector<64x8xf32>
    %260 = tpu.matmul %257, %259, %cst_252 {dimension_numbers = #tpu.dot_dimension_numbers<[1], [0], [0], [1], [0, 0, 1, 1], [], []>} : vector<64x4xbf16>, vector<4x8xbf16>, vector<64x8xf32> -> vector<64x8xf32>
    %261 = arith.addf %254, %260 : vector<64x8xf32>
    %c13_253 = arith.constant 13 : index
    %c1_254 = arith.constant 1 : index
    %c0_255 = arith.constant 0 : index
    %262 = vector.load %arg9[%c13_253, %c1_254, %c0_255] : memref<18x24x4xf32, #tpu.memory_space<vmem>>, vector<4x16x4xf32>
    %263 = vector.shape_cast %262 : vector<4x16x4xf32> to vector<64x4xf32>
    %264 = arith.truncf %263 : vector<64x4xf32> to vector<64x4xbf16>
    %c4_256 = arith.constant 4 : index
    %c0_257 = arith.constant 0 : index
    %c0_258 = arith.constant 0 : index
    %265 = vector.load %arg2[%c4_256, %c0_257, %c0_258] : memref<9x4x8xbf16, #tpu.memory_space<vmem>>, vector<1x4x8xbf16>
    %266 = vector.shape_cast %265 : vector<1x4x8xbf16> to vector<4x8xbf16>
    %cst_259 = arith.constant dense<0.000000e+00> : vector<64x8xf32>
    %267 = tpu.matmul %264, %266, %cst_259 {dimension_numbers = #tpu.dot_dimension_numbers<[1], [0], [0], [1], [0, 0, 1, 1], [], []>} : vector<64x4xbf16>, vector<4x8xbf16>, vector<64x8xf32> -> vector<64x8xf32>
    %268 = arith.addf %261, %267 : vector<64x8xf32>
    %c13_260 = arith.constant 13 : index
    %c2_261 = arith.constant 2 : index
    %c0_262 = arith.constant 0 : index
    %269 = vector.load %arg9[%c13_260, %c2_261, %c0_262] : memref<18x24x4xf32, #tpu.memory_space<vmem>>, vector<4x16x4xf32>
    %270 = vector.shape_cast %269 : vector<4x16x4xf32> to vector<64x4xf32>
    %271 = arith.truncf %270 : vector<64x4xf32> to vector<64x4xbf16>
    %c5_263 = arith.constant 5 : index
    %c0_264 = arith.constant 0 : index
    %c0_265 = arith.constant 0 : index
    %272 = vector.load %arg2[%c5_263, %c0_264, %c0_265] : memref<9x4x8xbf16, #tpu.memory_space<vmem>>, vector<1x4x8xbf16>
    %273 = vector.shape_cast %272 : vector<1x4x8xbf16> to vector<4x8xbf16>
    %cst_266 = arith.constant dense<0.000000e+00> : vector<64x8xf32>
    %274 = tpu.matmul %271, %273, %cst_266 {dimension_numbers = #tpu.dot_dimension_numbers<[1], [0], [0], [1], [0, 0, 1, 1], [], []>} : vector<64x4xbf16>, vector<4x8xbf16>, vector<64x8xf32> -> vector<64x8xf32>
    %275 = arith.addf %268, %274 : vector<64x8xf32>
    %c14 = arith.constant 14 : index
    %c0_267 = arith.constant 0 : index
    %c0_268 = arith.constant 0 : index
    %276 = vector.load %arg9[%c14, %c0_267, %c0_268] : memref<18x24x4xf32, #tpu.memory_space<vmem>>, vector<4x16x4xf32>
    %277 = vector.shape_cast %276 : vector<4x16x4xf32> to vector<64x4xf32>
    %278 = arith.truncf %277 : vector<64x4xf32> to vector<64x4xbf16>
    %c6_269 = arith.constant 6 : index
    %c0_270 = arith.constant 0 : index
    %c0_271 = arith.constant 0 : index
    %279 = vector.load %arg2[%c6_269, %c0_270, %c0_271] : memref<9x4x8xbf16, #tpu.memory_space<vmem>>, vector<1x4x8xbf16>
    %280 = vector.shape_cast %279 : vector<1x4x8xbf16> to vector<4x8xbf16>
    %cst_272 = arith.constant dense<0.000000e+00> : vector<64x8xf32>
    %281 = tpu.matmul %278, %280, %cst_272 {dimension_numbers = #tpu.dot_dimension_numbers<[1], [0], [0], [1], [0, 0, 1, 1], [], []>} : vector<64x4xbf16>, vector<4x8xbf16>, vector<64x8xf32> -> vector<64x8xf32>
    %282 = arith.addf %275, %281 : vector<64x8xf32>
    %c14_273 = arith.constant 14 : index
    %c1_274 = arith.constant 1 : index
    %c0_275 = arith.constant 0 : index
    %283 = vector.load %arg9[%c14_273, %c1_274, %c0_275] : memref<18x24x4xf32, #tpu.memory_space<vmem>>, vector<4x16x4xf32>
    %284 = vector.shape_cast %283 : vector<4x16x4xf32> to vector<64x4xf32>
    %285 = arith.truncf %284 : vector<64x4xf32> to vector<64x4xbf16>
    %c7_276 = arith.constant 7 : index
    %c0_277 = arith.constant 0 : index
    %c0_278 = arith.constant 0 : index
    %286 = vector.load %arg2[%c7_276, %c0_277, %c0_278] : memref<9x4x8xbf16, #tpu.memory_space<vmem>>, vector<1x4x8xbf16>
    %287 = vector.shape_cast %286 : vector<1x4x8xbf16> to vector<4x8xbf16>
    %cst_279 = arith.constant dense<0.000000e+00> : vector<64x8xf32>
    %288 = tpu.matmul %285, %287, %cst_279 {dimension_numbers = #tpu.dot_dimension_numbers<[1], [0], [0], [1], [0, 0, 1, 1], [], []>} : vector<64x4xbf16>, vector<4x8xbf16>, vector<64x8xf32> -> vector<64x8xf32>
    %289 = arith.addf %282, %288 : vector<64x8xf32>
    %c14_280 = arith.constant 14 : index
    %c2_281 = arith.constant 2 : index
    %c0_282 = arith.constant 0 : index
    %290 = vector.load %arg9[%c14_280, %c2_281, %c0_282] : memref<18x24x4xf32, #tpu.memory_space<vmem>>, vector<4x16x4xf32>
    %291 = vector.shape_cast %290 : vector<4x16x4xf32> to vector<64x4xf32>
    %292 = arith.truncf %291 : vector<64x4xf32> to vector<64x4xbf16>
    %c8_283 = arith.constant 8 : index
    %c0_284 = arith.constant 0 : index
    %c0_285 = arith.constant 0 : index
    %293 = vector.load %arg2[%c8_283, %c0_284, %c0_285] : memref<9x4x8xbf16, #tpu.memory_space<vmem>>, vector<1x4x8xbf16>
    %294 = vector.shape_cast %293 : vector<1x4x8xbf16> to vector<4x8xbf16>
    %cst_286 = arith.constant dense<0.000000e+00> : vector<64x8xf32>
    %295 = tpu.matmul %292, %294, %cst_286 {dimension_numbers = #tpu.dot_dimension_numbers<[1], [0], [0], [1], [0, 0, 1, 1], [], []>} : vector<64x4xbf16>, vector<4x8xbf16>, vector<64x8xf32> -> vector<64x8xf32>
    %296 = arith.addf %289, %295 : vector<64x8xf32>
    %297 = vector.broadcast %23 : vector<1x8xf32> to vector<64x8xf32>
    %298 = arith.mulf %296, %297 : vector<64x8xf32>
    %299 = vector.broadcast %24 : vector<1x8xf32> to vector<64x8xf32>
    %300 = arith.addf %298, %299 : vector<64x8xf32>
    %cst_287 = arith.constant 0.000000e+00 : f32
    %301 = vector.broadcast %cst_287 : f32 to vector<64x8xf32>
    %302 = arith.maximumf %300, %301 : vector<64x8xf32>
    %303 = vector.shape_cast %302 : vector<64x8xf32> to vector<4x16x8xf32>
    %c13_288 = arith.constant 13 : index
    %c1_289 = arith.constant 1 : index
    %c0_290 = arith.constant 0 : index
    %304 = vector.load %arg10[%c13_288, %c1_289, %c0_290] : memref<18x24x8xf32, #tpu.memory_space<vmem>>, vector<4x16x8xf32>
    tpu.vector_store %arg10[%c13_288, %c1_289, %c0_290], %303 {strides = array<i32>} : memref<18x24x8xf32, #tpu.memory_space<vmem>>, vector<4x16x8xf32>,
    %c0_291 = arith.constant 0 : index
    %c0_292 = arith.constant 0 : index
    %305 = vector.load %arg6[%c0_291, %c0_292] : memref<1x128xf32, #tpu.memory_space<vmem>>, vector<1x128xf32>
    %c0_293 = arith.constant 0 : index
    %c0_294 = arith.constant 0 : index
    %306 = vector.load %arg7[%c0_293, %c0_294] : memref<1x128xf32, #tpu.memory_space<vmem>>, vector<1x128xf32>
    %c0_295 = arith.constant 0 : index
    %c0_296 = arith.constant 0 : index
    %c0_297 = arith.constant 0 : index
    %307 = vector.load %arg10[%c0_295, %c0_296, %c0_297] : memref<18x24x8xf32, #tpu.memory_space<vmem>>, vector<4x16x8xf32>
    %308 = vector.shape_cast %307 : vector<4x16x8xf32> to vector<64x8xf32>
    %309 = arith.truncf %308 : vector<64x8xf32> to vector<64x8xbf16>
    %c0_298 = arith.constant 0 : index
    %c0_299 = arith.constant 0 : index
    %c0_300 = arith.constant 0 : index
    %310 = vector.load %arg5[%c0_298, %c0_299, %c0_300] : memref<9x8x128xbf16, #tpu.memory_space<vmem>>, vector<1x8x128xbf16>
    %311 = vector.shape_cast %310 : vector<1x8x128xbf16> to vector<8x128xbf16>
    %cst_301 = arith.constant dense<0.000000e+00> : vector<64x128xf32>
    %312 = tpu.matmul %309, %311, %cst_301 {dimension_numbers = #tpu.dot_dimension_numbers<[1], [0], [0], [1], [0, 0, 1, 1], [], []>} : vector<64x8xbf16>, vector<8x128xbf16>, vector<64x128xf32> -> vector<64x128xf32>
    %c0_302 = arith.constant 0 : index
    %c1_303 = arith.constant 1 : index
    %c0_304 = arith.constant 0 : index
    %313 = vector.load %arg10[%c0_302, %c1_303, %c0_304] : memref<18x24x8xf32, #tpu.memory_space<vmem>>, vector<4x16x8xf32>
    %314 = vector.shape_cast %313 : vector<4x16x8xf32> to vector<64x8xf32>
    %315 = arith.truncf %314 : vector<64x8xf32> to vector<64x8xbf16>
    %c1_305 = arith.constant 1 : index
    %c0_306 = arith.constant 0 : index
    %c0_307 = arith.constant 0 : index
    %316 = vector.load %arg5[%c1_305, %c0_306, %c0_307] : memref<9x8x128xbf16, #tpu.memory_space<vmem>>, vector<1x8x128xbf16>
    %317 = vector.shape_cast %316 : vector<1x8x128xbf16> to vector<8x128xbf16>
    %cst_308 = arith.constant dense<0.000000e+00> : vector<64x128xf32>
    %318 = tpu.matmul %315, %317, %cst_308 {dimension_numbers = #tpu.dot_dimension_numbers<[1], [0], [0], [1], [0, 0, 1, 1], [], []>} : vector<64x8xbf16>, vector<8x128xbf16>, vector<64x128xf32> -> vector<64x128xf32>
    %319 = arith.addf %312, %318 : vector<64x128xf32>
    %c0_309 = arith.constant 0 : index
    %c2_310 = arith.constant 2 : index
    %c0_311 = arith.constant 0 : index
    %320 = vector.load %arg10[%c0_309, %c2_310, %c0_311] : memref<18x24x8xf32, #tpu.memory_space<vmem>>, vector<4x16x8xf32>
    %321 = vector.shape_cast %320 : vector<4x16x8xf32> to vector<64x8xf32>
    %322 = arith.truncf %321 : vector<64x8xf32> to vector<64x8xbf16>
    %c2_312 = arith.constant 2 : index
    %c0_313 = arith.constant 0 : index
    %c0_314 = arith.constant 0 : index
    %323 = vector.load %arg5[%c2_312, %c0_313, %c0_314] : memref<9x8x128xbf16, #tpu.memory_space<vmem>>, vector<1x8x128xbf16>
    %324 = vector.shape_cast %323 : vector<1x8x128xbf16> to vector<8x128xbf16>
    %cst_315 = arith.constant dense<0.000000e+00> : vector<64x128xf32>
    %325 = tpu.matmul %322, %324, %cst_315 {dimension_numbers = #tpu.dot_dimension_numbers<[1], [0], [0], [1], [0, 0, 1, 1], [], []>} : vector<64x8xbf16>, vector<8x128xbf16>, vector<64x128xf32> -> vector<64x128xf32>
    %326 = arith.addf %319, %325 : vector<64x128xf32>
    %c1_316 = arith.constant 1 : index
    %c0_317 = arith.constant 0 : index
    %c0_318 = arith.constant 0 : index
    %327 = vector.load %arg10[%c1_316, %c0_317, %c0_318] : memref<18x24x8xf32, #tpu.memory_space<vmem>>, vector<4x16x8xf32>
    %328 = vector.shape_cast %327 : vector<4x16x8xf32> to vector<64x8xf32>
    %329 = arith.truncf %328 : vector<64x8xf32> to vector<64x8xbf16>
    %c3_319 = arith.constant 3 : index
    %c0_320 = arith.constant 0 : index
    %c0_321 = arith.constant 0 : index
    %330 = vector.load %arg5[%c3_319, %c0_320, %c0_321] : memref<9x8x128xbf16, #tpu.memory_space<vmem>>, vector<1x8x128xbf16>
    %331 = vector.shape_cast %330 : vector<1x8x128xbf16> to vector<8x128xbf16>
    %cst_322 = arith.constant dense<0.000000e+00> : vector<64x128xf32>
    %332 = tpu.matmul %329, %331, %cst_322 {dimension_numbers = #tpu.dot_dimension_numbers<[1], [0], [0], [1], [0, 0, 1, 1], [], []>} : vector<64x8xbf16>, vector<8x128xbf16>, vector<64x128xf32> -> vector<64x128xf32>
    %333 = arith.addf %326, %332 : vector<64x128xf32>
    %c1_323 = arith.constant 1 : index
    %c1_324 = arith.constant 1 : index
    %c0_325 = arith.constant 0 : index
    %334 = vector.load %arg10[%c1_323, %c1_324, %c0_325] : memref<18x24x8xf32, #tpu.memory_space<vmem>>, vector<4x16x8xf32>
    %335 = vector.shape_cast %334 : vector<4x16x8xf32> to vector<64x8xf32>
    %336 = arith.truncf %335 : vector<64x8xf32> to vector<64x8xbf16>
    %c4_326 = arith.constant 4 : index
    %c0_327 = arith.constant 0 : index
    %c0_328 = arith.constant 0 : index
    %337 = vector.load %arg5[%c4_326, %c0_327, %c0_328] : memref<9x8x128xbf16, #tpu.memory_space<vmem>>, vector<1x8x128xbf16>
    %338 = vector.shape_cast %337 : vector<1x8x128xbf16> to vector<8x128xbf16>
    %cst_329 = arith.constant dense<0.000000e+00> : vector<64x128xf32>
    %339 = tpu.matmul %336, %338, %cst_329 {dimension_numbers = #tpu.dot_dimension_numbers<[1], [0], [0], [1], [0, 0, 1, 1], [], []>} : vector<64x8xbf16>, vector<8x128xbf16>, vector<64x128xf32> -> vector<64x128xf32>
    %340 = arith.addf %333, %339 : vector<64x128xf32>
    %c1_330 = arith.constant 1 : index
    %c2_331 = arith.constant 2 : index
    %c0_332 = arith.constant 0 : index
    %341 = vector.load %arg10[%c1_330, %c2_331, %c0_332] : memref<18x24x8xf32, #tpu.memory_space<vmem>>, vector<4x16x8xf32>
    %342 = vector.shape_cast %341 : vector<4x16x8xf32> to vector<64x8xf32>
    %343 = arith.truncf %342 : vector<64x8xf32> to vector<64x8xbf16>
    %c5_333 = arith.constant 5 : index
    %c0_334 = arith.constant 0 : index
    %c0_335 = arith.constant 0 : index
    %344 = vector.load %arg5[%c5_333, %c0_334, %c0_335] : memref<9x8x128xbf16, #tpu.memory_space<vmem>>, vector<1x8x128xbf16>
    %345 = vector.shape_cast %344 : vector<1x8x128xbf16> to vector<8x128xbf16>
    %cst_336 = arith.constant dense<0.000000e+00> : vector<64x128xf32>
    %346 = tpu.matmul %343, %345, %cst_336 {dimension_numbers = #tpu.dot_dimension_numbers<[1], [0], [0], [1], [0, 0, 1, 1], [], []>} : vector<64x8xbf16>, vector<8x128xbf16>, vector<64x128xf32> -> vector<64x128xf32>
    %347 = arith.addf %340, %346 : vector<64x128xf32>
    %c2_337 = arith.constant 2 : index
    %c0_338 = arith.constant 0 : index
    %c0_339 = arith.constant 0 : index
    %348 = vector.load %arg10[%c2_337, %c0_338, %c0_339] : memref<18x24x8xf32, #tpu.memory_space<vmem>>, vector<4x16x8xf32>
    %349 = vector.shape_cast %348 : vector<4x16x8xf32> to vector<64x8xf32>
    %350 = arith.truncf %349 : vector<64x8xf32> to vector<64x8xbf16>
    %c6_340 = arith.constant 6 : index
    %c0_341 = arith.constant 0 : index
    %c0_342 = arith.constant 0 : index
    %351 = vector.load %arg5[%c6_340, %c0_341, %c0_342] : memref<9x8x128xbf16, #tpu.memory_space<vmem>>, vector<1x8x128xbf16>
    %352 = vector.shape_cast %351 : vector<1x8x128xbf16> to vector<8x128xbf16>
    %cst_343 = arith.constant dense<0.000000e+00> : vector<64x128xf32>
    %353 = tpu.matmul %350, %352, %cst_343 {dimension_numbers = #tpu.dot_dimension_numbers<[1], [0], [0], [1], [0, 0, 1, 1], [], []>} : vector<64x8xbf16>, vector<8x128xbf16>, vector<64x128xf32> -> vector<64x128xf32>
    %354 = arith.addf %347, %353 : vector<64x128xf32>
    %c2_344 = arith.constant 2 : index
    %c1_345 = arith.constant 1 : index
    %c0_346 = arith.constant 0 : index
    %355 = vector.load %arg10[%c2_344, %c1_345, %c0_346] : memref<18x24x8xf32, #tpu.memory_space<vmem>>, vector<4x16x8xf32>
    %356 = vector.shape_cast %355 : vector<4x16x8xf32> to vector<64x8xf32>
    %357 = arith.truncf %356 : vector<64x8xf32> to vector<64x8xbf16>
    %c7_347 = arith.constant 7 : index
    %c0_348 = arith.constant 0 : index
    %c0_349 = arith.constant 0 : index
    %358 = vector.load %arg5[%c7_347, %c0_348, %c0_349] : memref<9x8x128xbf16, #tpu.memory_space<vmem>>, vector<1x8x128xbf16>
    %359 = vector.shape_cast %358 : vector<1x8x128xbf16> to vector<8x128xbf16>
    %cst_350 = arith.constant dense<0.000000e+00> : vector<64x128xf32>
    %360 = tpu.matmul %357, %359, %cst_350 {dimension_numbers = #tpu.dot_dimension_numbers<[1], [0], [0], [1], [0, 0, 1, 1], [], []>} : vector<64x8xbf16>, vector<8x128xbf16>, vector<64x128xf32> -> vector<64x128xf32>
    %361 = arith.addf %354, %360 : vector<64x128xf32>
    %c2_351 = arith.constant 2 : index
    %c2_352 = arith.constant 2 : index
    %c0_353 = arith.constant 0 : index
    %362 = vector.load %arg10[%c2_351, %c2_352, %c0_353] : memref<18x24x8xf32, #tpu.memory_space<vmem>>, vector<4x16x8xf32>
    %363 = vector.shape_cast %362 : vector<4x16x8xf32> to vector<64x8xf32>
    %364 = arith.truncf %363 : vector<64x8xf32> to vector<64x8xbf16>
    %c8_354 = arith.constant 8 : index
    %c0_355 = arith.constant 0 : index
    %c0_356 = arith.constant 0 : index
    %365 = vector.load %arg5[%c8_354, %c0_355, %c0_356] : memref<9x8x128xbf16, #tpu.memory_space<vmem>>, vector<1x8x128xbf16>
    %366 = vector.shape_cast %365 : vector<1x8x128xbf16> to vector<8x128xbf16>
    %cst_357 = arith.constant dense<0.000000e+00> : vector<64x128xf32>
    %367 = tpu.matmul %364, %366, %cst_357 {dimension_numbers = #tpu.dot_dimension_numbers<[1], [0], [0], [1], [0, 0, 1, 1], [], []>} : vector<64x8xbf16>, vector<8x128xbf16>, vector<64x128xf32> -> vector<64x128xf32>
    %368 = arith.addf %361, %367 : vector<64x128xf32>
    %369 = vector.broadcast %305 : vector<1x128xf32> to vector<64x128xf32>
    %370 = arith.mulf %368, %369 : vector<64x128xf32>
    %371 = vector.broadcast %306 : vector<1x128xf32> to vector<64x128xf32>
    %372 = arith.addf %370, %371 : vector<64x128xf32>
    %cst_358 = arith.constant 0.000000e+00 : f32
    %373 = vector.broadcast %cst_358 : f32 to vector<64x128xf32>
    %374 = arith.maximumf %372, %373 : vector<64x128xf32>
    %c0_359 = arith.constant 0 : index
    %c0_360 = arith.constant 0 : index
    %c0_361 = arith.constant 0 : index
    %375 = vector.load %arg8[%c0_359, %c0_360, %c0_361] : memref<1x256x128xf32, #tpu.memory_space<vmem>>, vector<1x64x128xf32>
    %376 = vector.shape_cast %375 : vector<1x64x128xf32> to vector<64x128xf32>
    %377 = vector.shape_cast %374 : vector<64x128xf32> to vector<1x64x128xf32>
    tpu.vector_store %arg8[%c0_359, %c0_360, %c0_361], %377 {strides = array<i32>} : memref<1x256x128xf32, #tpu.memory_space<vmem>>, vector<1x64x128xf32>,
    %c4_362 = arith.constant 4 : index
    %c0_363 = arith.constant 0 : index
    %c0_364 = arith.constant 0 : index
    %378 = vector.load %arg10[%c4_362, %c0_363, %c0_364] : memref<18x24x8xf32, #tpu.memory_space<vmem>>, vector<4x16x8xf32>
    %379 = vector.shape_cast %378 : vector<4x16x8xf32> to vector<64x8xf32>
    %380 = arith.truncf %379 : vector<64x8xf32> to vector<64x8xbf16>
    %c0_365 = arith.constant 0 : index
    %c0_366 = arith.constant 0 : index
    %c0_367 = arith.constant 0 : index
    %381 = vector.load %arg5[%c0_365, %c0_366, %c0_367] : memref<9x8x128xbf16, #tpu.memory_space<vmem>>, vector<1x8x128xbf16>
    %382 = vector.shape_cast %381 : vector<1x8x128xbf16> to vector<8x128xbf16>
    %cst_368 = arith.constant dense<0.000000e+00> : vector<64x128xf32>
    %383 = tpu.matmul %380, %382, %cst_368 {dimension_numbers = #tpu.dot_dimension_numbers<[1], [0], [0], [1], [0, 0, 1, 1], [], []>} : vector<64x8xbf16>, vector<8x128xbf16>, vector<64x128xf32> -> vector<64x128xf32>
    %c4_369 = arith.constant 4 : index
    %c1_370 = arith.constant 1 : index
    %c0_371 = arith.constant 0 : index
    %384 = vector.load %arg10[%c4_369, %c1_370, %c0_371] : memref<18x24x8xf32, #tpu.memory_space<vmem>>, vector<4x16x8xf32>
    %385 = vector.shape_cast %384 : vector<4x16x8xf32> to vector<64x8xf32>
    %386 = arith.truncf %385 : vector<64x8xf32> to vector<64x8xbf16>
    %c1_372 = arith.constant 1 : index
    %c0_373 = arith.constant 0 : index
    %c0_374 = arith.constant 0 : index
    %387 = vector.load %arg5[%c1_372, %c0_373, %c0_374] : memref<9x8x128xbf16, #tpu.memory_space<vmem>>, vector<1x8x128xbf16>
    %388 = vector.shape_cast %387 : vector<1x8x128xbf16> to vector<8x128xbf16>
    %cst_375 = arith.constant dense<0.000000e+00> : vector<64x128xf32>
    %389 = tpu.matmul %386, %388, %cst_375 {dimension_numbers = #tpu.dot_dimension_numbers<[1], [0], [0], [1], [0, 0, 1, 1], [], []>} : vector<64x8xbf16>, vector<8x128xbf16>, vector<64x128xf32> -> vector<64x128xf32>
    %390 = arith.addf %383, %389 : vector<64x128xf32>
    %c4_376 = arith.constant 4 : index
    %c2_377 = arith.constant 2 : index
    %c0_378 = arith.constant 0 : index
    %391 = vector.load %arg10[%c4_376, %c2_377, %c0_378] : memref<18x24x8xf32, #tpu.memory_space<vmem>>, vector<4x16x8xf32>
    %392 = vector.shape_cast %391 : vector<4x16x8xf32> to vector<64x8xf32>
    %393 = arith.truncf %392 : vector<64x8xf32> to vector<64x8xbf16>
    %c2_379 = arith.constant 2 : index
    %c0_380 = arith.constant 0 : index
    %c0_381 = arith.constant 0 : index
    %394 = vector.load %arg5[%c2_379, %c0_380, %c0_381] : memref<9x8x128xbf16, #tpu.memory_space<vmem>>, vector<1x8x128xbf16>
    %395 = vector.shape_cast %394 : vector<1x8x128xbf16> to vector<8x128xbf16>
    %cst_382 = arith.constant dense<0.000000e+00> : vector<64x128xf32>
    %396 = tpu.matmul %393, %395, %cst_382 {dimension_numbers = #tpu.dot_dimension_numbers<[1], [0], [0], [1], [0, 0, 1, 1], [], []>} : vector<64x8xbf16>, vector<8x128xbf16>, vector<64x128xf32> -> vector<64x128xf32>
    %397 = arith.addf %390, %396 : vector<64x128xf32>
    %c5_383 = arith.constant 5 : index
    %c0_384 = arith.constant 0 : index
    %c0_385 = arith.constant 0 : index
    %398 = vector.load %arg10[%c5_383, %c0_384, %c0_385] : memref<18x24x8xf32, #tpu.memory_space<vmem>>, vector<4x16x8xf32>
    %399 = vector.shape_cast %398 : vector<4x16x8xf32> to vector<64x8xf32>
    %400 = arith.truncf %399 : vector<64x8xf32> to vector<64x8xbf16>
    %c3_386 = arith.constant 3 : index
    %c0_387 = arith.constant 0 : index
    %c0_388 = arith.constant 0 : index
    %401 = vector.load %arg5[%c3_386, %c0_387, %c0_388] : memref<9x8x128xbf16, #tpu.memory_space<vmem>>, vector<1x8x128xbf16>
    %402 = vector.shape_cast %401 : vector<1x8x128xbf16> to vector<8x128xbf16>
    %cst_389 = arith.constant dense<0.000000e+00> : vector<64x128xf32>
    %403 = tpu.matmul %400, %402, %cst_389 {dimension_numbers = #tpu.dot_dimension_numbers<[1], [0], [0], [1], [0, 0, 1, 1], [], []>} : vector<64x8xbf16>, vector<8x128xbf16>, vector<64x128xf32> -> vector<64x128xf32>
    %404 = arith.addf %397, %403 : vector<64x128xf32>
    %c5_390 = arith.constant 5 : index
    %c1_391 = arith.constant 1 : index
    %c0_392 = arith.constant 0 : index
    %405 = vector.load %arg10[%c5_390, %c1_391, %c0_392] : memref<18x24x8xf32, #tpu.memory_space<vmem>>, vector<4x16x8xf32>
    %406 = vector.shape_cast %405 : vector<4x16x8xf32> to vector<64x8xf32>
    %407 = arith.truncf %406 : vector<64x8xf32> to vector<64x8xbf16>
    %c4_393 = arith.constant 4 : index
    %c0_394 = arith.constant 0 : index
    %c0_395 = arith.constant 0 : index
    %408 = vector.load %arg5[%c4_393, %c0_394, %c0_395] : memref<9x8x128xbf16, #tpu.memory_space<vmem>>, vector<1x8x128xbf16>
    %409 = vector.shape_cast %408 : vector<1x8x128xbf16> to vector<8x128xbf16>
    %cst_396 = arith.constant dense<0.000000e+00> : vector<64x128xf32>
    %410 = tpu.matmul %407, %409, %cst_396 {dimension_numbers = #tpu.dot_dimension_numbers<[1], [0], [0], [1], [0, 0, 1, 1], [], []>} : vector<64x8xbf16>, vector<8x128xbf16>, vector<64x128xf32> -> vector<64x128xf32>
    %411 = arith.addf %404, %410 : vector<64x128xf32>
    %c5_397 = arith.constant 5 : index
    %c2_398 = arith.constant 2 : index
    %c0_399 = arith.constant 0 : index
    %412 = vector.load %arg10[%c5_397, %c2_398, %c0_399] : memref<18x24x8xf32, #tpu.memory_space<vmem>>, vector<4x16x8xf32>
    %413 = vector.shape_cast %412 : vector<4x16x8xf32> to vector<64x8xf32>
    %414 = arith.truncf %413 : vector<64x8xf32> to vector<64x8xbf16>
    %c5_400 = arith.constant 5 : index
    %c0_401 = arith.constant 0 : index
    %c0_402 = arith.constant 0 : index
    %415 = vector.load %arg5[%c5_400, %c0_401, %c0_402] : memref<9x8x128xbf16, #tpu.memory_space<vmem>>, vector<1x8x128xbf16>
    %416 = vector.shape_cast %415 : vector<1x8x128xbf16> to vector<8x128xbf16>
    %cst_403 = arith.constant dense<0.000000e+00> : vector<64x128xf32>
    %417 = tpu.matmul %414, %416, %cst_403 {dimension_numbers = #tpu.dot_dimension_numbers<[1], [0], [0], [1], [0, 0, 1, 1], [], []>} : vector<64x8xbf16>, vector<8x128xbf16>, vector<64x128xf32> -> vector<64x128xf32>
    %418 = arith.addf %411, %417 : vector<64x128xf32>
    %c6_404 = arith.constant 6 : index
    %c0_405 = arith.constant 0 : index
    %c0_406 = arith.constant 0 : index
    %419 = vector.load %arg10[%c6_404, %c0_405, %c0_406] : memref<18x24x8xf32, #tpu.memory_space<vmem>>, vector<4x16x8xf32>
    %420 = vector.shape_cast %419 : vector<4x16x8xf32> to vector<64x8xf32>
    %421 = arith.truncf %420 : vector<64x8xf32> to vector<64x8xbf16>
    %c6_407 = arith.constant 6 : index
    %c0_408 = arith.constant 0 : index
    %c0_409 = arith.constant 0 : index
    %422 = vector.load %arg5[%c6_407, %c0_408, %c0_409] : memref<9x8x128xbf16, #tpu.memory_space<vmem>>, vector<1x8x128xbf16>
    %423 = vector.shape_cast %422 : vector<1x8x128xbf16> to vector<8x128xbf16>
    %cst_410 = arith.constant dense<0.000000e+00> : vector<64x128xf32>
    %424 = tpu.matmul %421, %423, %cst_410 {dimension_numbers = #tpu.dot_dimension_numbers<[1], [0], [0], [1], [0, 0, 1, 1], [], []>} : vector<64x8xbf16>, vector<8x128xbf16>, vector<64x128xf32> -> vector<64x128xf32>
    %425 = arith.addf %418, %424 : vector<64x128xf32>
    %c6_411 = arith.constant 6 : index
    %c1_412 = arith.constant 1 : index
    %c0_413 = arith.constant 0 : index
    %426 = vector.load %arg10[%c6_411, %c1_412, %c0_413] : memref<18x24x8xf32, #tpu.memory_space<vmem>>, vector<4x16x8xf32>
    %427 = vector.shape_cast %426 : vector<4x16x8xf32> to vector<64x8xf32>
    %428 = arith.truncf %427 : vector<64x8xf32> to vector<64x8xbf16>
    %c7_414 = arith.constant 7 : index
    %c0_415 = arith.constant 0 : index
    %c0_416 = arith.constant 0 : index
    %429 = vector.load %arg5[%c7_414, %c0_415, %c0_416] : memref<9x8x128xbf16, #tpu.memory_space<vmem>>, vector<1x8x128xbf16>
    %430 = vector.shape_cast %429 : vector<1x8x128xbf16> to vector<8x128xbf16>
    %cst_417 = arith.constant dense<0.000000e+00> : vector<64x128xf32>
    %431 = tpu.matmul %428, %430, %cst_417 {dimension_numbers = #tpu.dot_dimension_numbers<[1], [0], [0], [1], [0, 0, 1, 1], [], []>} : vector<64x8xbf16>, vector<8x128xbf16>, vector<64x128xf32> -> vector<64x128xf32>
    %432 = arith.addf %425, %431 : vector<64x128xf32>
    %c6_418 = arith.constant 6 : index
    %c2_419 = arith.constant 2 : index
    %c0_420 = arith.constant 0 : index
    %433 = vector.load %arg10[%c6_418, %c2_419, %c0_420] : memref<18x24x8xf32, #tpu.memory_space<vmem>>, vector<4x16x8xf32>
    %434 = vector.shape_cast %433 : vector<4x16x8xf32> to vector<64x8xf32>
    %435 = arith.truncf %434 : vector<64x8xf32> to vector<64x8xbf16>
    %c8_421 = arith.constant 8 : index
    %c0_422 = arith.constant 0 : index
    %c0_423 = arith.constant 0 : index
    %436 = vector.load %arg5[%c8_421, %c0_422, %c0_423] : memref<9x8x128xbf16, #tpu.memory_space<vmem>>, vector<1x8x128xbf16>
    %437 = vector.shape_cast %436 : vector<1x8x128xbf16> to vector<8x128xbf16>
    %cst_424 = arith.constant dense<0.000000e+00> : vector<64x128xf32>
    %438 = tpu.matmul %435, %437, %cst_424 {dimension_numbers = #tpu.dot_dimension_numbers<[1], [0], [0], [1], [0, 0, 1, 1], [], []>} : vector<64x8xbf16>, vector<8x128xbf16>, vector<64x128xf32> -> vector<64x128xf32>
    %439 = arith.addf %432, %438 : vector<64x128xf32>
    %440 = vector.broadcast %305 : vector<1x128xf32> to vector<64x128xf32>
    %441 = arith.mulf %439, %440 : vector<64x128xf32>
    %442 = vector.broadcast %306 : vector<1x128xf32> to vector<64x128xf32>
    %443 = arith.addf %441, %442 : vector<64x128xf32>
    %cst_425 = arith.constant 0.000000e+00 : f32
    %444 = vector.broadcast %cst_425 : f32 to vector<64x128xf32>
    %445 = arith.maximumf %443, %444 : vector<64x128xf32>
    %c0_426 = arith.constant 0 : index
    %c64 = arith.constant 64 : index
    %c0_427 = arith.constant 0 : index
    %446 = vector.load %arg8[%c0_426, %c64, %c0_427] : memref<1x256x128xf32, #tpu.memory_space<vmem>>, vector<1x64x128xf32>
    %447 = vector.shape_cast %446 : vector<1x64x128xf32> to vector<64x128xf32>
    %448 = vector.shape_cast %445 : vector<64x128xf32> to vector<1x64x128xf32>
    tpu.vector_store %arg8[%c0_426, %c64, %c0_427], %448 {strides = array<i32>} : memref<1x256x128xf32, #tpu.memory_space<vmem>>, vector<1x64x128xf32>,
    %c8_428 = arith.constant 8 : index
    %c0_429 = arith.constant 0 : index
    %c0_430 = arith.constant 0 : index
    %449 = vector.load %arg10[%c8_428, %c0_429, %c0_430] : memref<18x24x8xf32, #tpu.memory_space<vmem>>, vector<4x16x8xf32>
    %450 = vector.shape_cast %449 : vector<4x16x8xf32> to vector<64x8xf32>
    %451 = arith.truncf %450 : vector<64x8xf32> to vector<64x8xbf16>
    %c0_431 = arith.constant 0 : index
    %c0_432 = arith.constant 0 : index
    %c0_433 = arith.constant 0 : index
    %452 = vector.load %arg5[%c0_431, %c0_432, %c0_433] : memref<9x8x128xbf16, #tpu.memory_space<vmem>>, vector<1x8x128xbf16>
    %453 = vector.shape_cast %452 : vector<1x8x128xbf16> to vector<8x128xbf16>
    %cst_434 = arith.constant dense<0.000000e+00> : vector<64x128xf32>
    %454 = tpu.matmul %451, %453, %cst_434 {dimension_numbers = #tpu.dot_dimension_numbers<[1], [0], [0], [1], [0, 0, 1, 1], [], []>} : vector<64x8xbf16>, vector<8x128xbf16>, vector<64x128xf32> -> vector<64x128xf32>
    %c8_435 = arith.constant 8 : index
    %c1_436 = arith.constant 1 : index
    %c0_437 = arith.constant 0 : index
    %455 = vector.load %arg10[%c8_435, %c1_436, %c0_437] : memref<18x24x8xf32, #tpu.memory_space<vmem>>, vector<4x16x8xf32>
    %456 = vector.shape_cast %455 : vector<4x16x8xf32> to vector<64x8xf32>
    %457 = arith.truncf %456 : vector<64x8xf32> to vector<64x8xbf16>
    %c1_438 = arith.constant 1 : index
    %c0_439 = arith.constant 0 : index
    %c0_440 = arith.constant 0 : index
    %458 = vector.load %arg5[%c1_438, %c0_439, %c0_440] : memref<9x8x128xbf16, #tpu.memory_space<vmem>>, vector<1x8x128xbf16>
    %459 = vector.shape_cast %458 : vector<1x8x128xbf16> to vector<8x128xbf16>
    %cst_441 = arith.constant dense<0.000000e+00> : vector<64x128xf32>
    %460 = tpu.matmul %457, %459, %cst_441 {dimension_numbers = #tpu.dot_dimension_numbers<[1], [0], [0], [1], [0, 0, 1, 1], [], []>} : vector<64x8xbf16>, vector<8x128xbf16>, vector<64x128xf32> -> vector<64x128xf32>
    %461 = arith.addf %454, %460 : vector<64x128xf32>
    %c8_442 = arith.constant 8 : index
    %c2_443 = arith.constant 2 : index
    %c0_444 = arith.constant 0 : index
    %462 = vector.load %arg10[%c8_442, %c2_443, %c0_444] : memref<18x24x8xf32, #tpu.memory_space<vmem>>, vector<4x16x8xf32>
    %463 = vector.shape_cast %462 : vector<4x16x8xf32> to vector<64x8xf32>
    %464 = arith.truncf %463 : vector<64x8xf32> to vector<64x8xbf16>
    %c2_445 = arith.constant 2 : index
    %c0_446 = arith.constant 0 : index
    %c0_447 = arith.constant 0 : index
    %465 = vector.load %arg5[%c2_445, %c0_446, %c0_447] : memref<9x8x128xbf16, #tpu.memory_space<vmem>>, vector<1x8x128xbf16>
    %466 = vector.shape_cast %465 : vector<1x8x128xbf16> to vector<8x128xbf16>
    %cst_448 = arith.constant dense<0.000000e+00> : vector<64x128xf32>
    %467 = tpu.matmul %464, %466, %cst_448 {dimension_numbers = #tpu.dot_dimension_numbers<[1], [0], [0], [1], [0, 0, 1, 1], [], []>} : vector<64x8xbf16>, vector<8x128xbf16>, vector<64x128xf32> -> vector<64x128xf32>
    %468 = arith.addf %461, %467 : vector<64x128xf32>
    %c9_449 = arith.constant 9 : index
    %c0_450 = arith.constant 0 : index
    %c0_451 = arith.constant 0 : index
    %469 = vector.load %arg10[%c9_449, %c0_450, %c0_451] : memref<18x24x8xf32, #tpu.memory_space<vmem>>, vector<4x16x8xf32>
    %470 = vector.shape_cast %469 : vector<4x16x8xf32> to vector<64x8xf32>
    %471 = arith.truncf %470 : vector<64x8xf32> to vector<64x8xbf16>
    %c3_452 = arith.constant 3 : index
    %c0_453 = arith.constant 0 : index
    %c0_454 = arith.constant 0 : index
    %472 = vector.load %arg5[%c3_452, %c0_453, %c0_454] : memref<9x8x128xbf16, #tpu.memory_space<vmem>>, vector<1x8x128xbf16>
    %473 = vector.shape_cast %472 : vector<1x8x128xbf16> to vector<8x128xbf16>
    %cst_455 = arith.constant dense<0.000000e+00> : vector<64x128xf32>
    %474 = tpu.matmul %471, %473, %cst_455 {dimension_numbers = #tpu.dot_dimension_numbers<[1], [0], [0], [1], [0, 0, 1, 1], [], []>} : vector<64x8xbf16>, vector<8x128xbf16>, vector<64x128xf32> -> vector<64x128xf32>
    %475 = arith.addf %468, %474 : vector<64x128xf32>
    %c9_456 = arith.constant 9 : index
    %c1_457 = arith.constant 1 : index
    %c0_458 = arith.constant 0 : index
    %476 = vector.load %arg10[%c9_456, %c1_457, %c0_458] : memref<18x24x8xf32, #tpu.memory_space<vmem>>, vector<4x16x8xf32>
    %477 = vector.shape_cast %476 : vector<4x16x8xf32> to vector<64x8xf32>
    %478 = arith.truncf %477 : vector<64x8xf32> to vector<64x8xbf16>
    %c4_459 = arith.constant 4 : index
    %c0_460 = arith.constant 0 : index
    %c0_461 = arith.constant 0 : index
    %479 = vector.load %arg5[%c4_459, %c0_460, %c0_461] : memref<9x8x128xbf16, #tpu.memory_space<vmem>>, vector<1x8x128xbf16>
    %480 = vector.shape_cast %479 : vector<1x8x128xbf16> to vector<8x128xbf16>
    %cst_462 = arith.constant dense<0.000000e+00> : vector<64x128xf32>
    %481 = tpu.matmul %478, %480, %cst_462 {dimension_numbers = #tpu.dot_dimension_numbers<[1], [0], [0], [1], [0, 0, 1, 1], [], []>} : vector<64x8xbf16>, vector<8x128xbf16>, vector<64x128xf32> -> vector<64x128xf32>
    %482 = arith.addf %475, %481 : vector<64x128xf32>
    %c9_463 = arith.constant 9 : index
    %c2_464 = arith.constant 2 : index
    %c0_465 = arith.constant 0 : index
    %483 = vector.load %arg10[%c9_463, %c2_464, %c0_465] : memref<18x24x8xf32, #tpu.memory_space<vmem>>, vector<4x16x8xf32>
    %484 = vector.shape_cast %483 : vector<4x16x8xf32> to vector<64x8xf32>
    %485 = arith.truncf %484 : vector<64x8xf32> to vector<64x8xbf16>
    %c5_466 = arith.constant 5 : index
    %c0_467 = arith.constant 0 : index
    %c0_468 = arith.constant 0 : index
    %486 = vector.load %arg5[%c5_466, %c0_467, %c0_468] : memref<9x8x128xbf16, #tpu.memory_space<vmem>>, vector<1x8x128xbf16>
    %487 = vector.shape_cast %486 : vector<1x8x128xbf16> to vector<8x128xbf16>
    %cst_469 = arith.constant dense<0.000000e+00> : vector<64x128xf32>
    %488 = tpu.matmul %485, %487, %cst_469 {dimension_numbers = #tpu.dot_dimension_numbers<[1], [0], [0], [1], [0, 0, 1, 1], [], []>} : vector<64x8xbf16>, vector<8x128xbf16>, vector<64x128xf32> -> vector<64x128xf32>
    %489 = arith.addf %482, %488 : vector<64x128xf32>
    %c10_470 = arith.constant 10 : index
    %c0_471 = arith.constant 0 : index
    %c0_472 = arith.constant 0 : index
    %490 = vector.load %arg10[%c10_470, %c0_471, %c0_472] : memref<18x24x8xf32, #tpu.memory_space<vmem>>, vector<4x16x8xf32>
    %491 = vector.shape_cast %490 : vector<4x16x8xf32> to vector<64x8xf32>
    %492 = arith.truncf %491 : vector<64x8xf32> to vector<64x8xbf16>
    %c6_473 = arith.constant 6 : index
    %c0_474 = arith.constant 0 : index
    %c0_475 = arith.constant 0 : index
    %493 = vector.load %arg5[%c6_473, %c0_474, %c0_475] : memref<9x8x128xbf16, #tpu.memory_space<vmem>>, vector<1x8x128xbf16>
    %494 = vector.shape_cast %493 : vector<1x8x128xbf16> to vector<8x128xbf16>
    %cst_476 = arith.constant dense<0.000000e+00> : vector<64x128xf32>
    %495 = tpu.matmul %492, %494, %cst_476 {dimension_numbers = #tpu.dot_dimension_numbers<[1], [0], [0], [1], [0, 0, 1, 1], [], []>} : vector<64x8xbf16>, vector<8x128xbf16>, vector<64x128xf32> -> vector<64x128xf32>
    %496 = arith.addf %489, %495 : vector<64x128xf32>
    %c10_477 = arith.constant 10 : index
    %c1_478 = arith.constant 1 : index
    %c0_479 = arith.constant 0 : index
    %497 = vector.load %arg10[%c10_477, %c1_478, %c0_479] : memref<18x24x8xf32, #tpu.memory_space<vmem>>, vector<4x16x8xf32>
    %498 = vector.shape_cast %497 : vector<4x16x8xf32> to vector<64x8xf32>
    %499 = arith.truncf %498 : vector<64x8xf32> to vector<64x8xbf16>
    %c7_480 = arith.constant 7 : index
    %c0_481 = arith.constant 0 : index
    %c0_482 = arith.constant 0 : index
    %500 = vector.load %arg5[%c7_480, %c0_481, %c0_482] : memref<9x8x128xbf16, #tpu.memory_space<vmem>>, vector<1x8x128xbf16>
    %501 = vector.shape_cast %500 : vector<1x8x128xbf16> to vector<8x128xbf16>
    %cst_483 = arith.constant dense<0.000000e+00> : vector<64x128xf32>
    %502 = tpu.matmul %499, %501, %cst_483 {dimension_numbers = #tpu.dot_dimension_numbers<[1], [0], [0], [1], [0, 0, 1, 1], [], []>} : vector<64x8xbf16>, vector<8x128xbf16>, vector<64x128xf32> -> vector<64x128xf32>
    %503 = arith.addf %496, %502 : vector<64x128xf32>
    %c10_484 = arith.constant 10 : index
    %c2_485 = arith.constant 2 : index
    %c0_486 = arith.constant 0 : index
    %504 = vector.load %arg10[%c10_484, %c2_485, %c0_486] : memref<18x24x8xf32, #tpu.memory_space<vmem>>, vector<4x16x8xf32>
    %505 = vector.shape_cast %504 : vector<4x16x8xf32> to vector<64x8xf32>
    %506 = arith.truncf %505 : vector<64x8xf32> to vector<64x8xbf16>
    %c8_487 = arith.constant 8 : index
    %c0_488 = arith.constant 0 : index
    %c0_489 = arith.constant 0 : index
    %507 = vector.load %arg5[%c8_487, %c0_488, %c0_489] : memref<9x8x128xbf16, #tpu.memory_space<vmem>>, vector<1x8x128xbf16>
    %508 = vector.shape_cast %507 : vector<1x8x128xbf16> to vector<8x128xbf16>
    %cst_490 = arith.constant dense<0.000000e+00> : vector<64x128xf32>
    %509 = tpu.matmul %506, %508, %cst_490 {dimension_numbers = #tpu.dot_dimension_numbers<[1], [0], [0], [1], [0, 0, 1, 1], [], []>} : vector<64x8xbf16>, vector<8x128xbf16>, vector<64x128xf32> -> vector<64x128xf32>
    %510 = arith.addf %503, %509 : vector<64x128xf32>
    %511 = vector.broadcast %305 : vector<1x128xf32> to vector<64x128xf32>
    %512 = arith.mulf %510, %511 : vector<64x128xf32>
    %513 = vector.broadcast %306 : vector<1x128xf32> to vector<64x128xf32>
    %514 = arith.addf %512, %513 : vector<64x128xf32>
    %cst_491 = arith.constant 0.000000e+00 : f32
    %515 = vector.broadcast %cst_491 : f32 to vector<64x128xf32>
    %516 = arith.maximumf %514, %515 : vector<64x128xf32>
    %c0_492 = arith.constant 0 : index
    %c128 = arith.constant 128 : index
    %c0_493 = arith.constant 0 : index
    %517 = vector.load %arg8[%c0_492, %c128, %c0_493] : memref<1x256x128xf32, #tpu.memory_space<vmem>>, vector<1x64x128xf32>
    %518 = vector.shape_cast %517 : vector<1x64x128xf32> to vector<64x128xf32>
    %519 = vector.shape_cast %516 : vector<64x128xf32> to vector<1x64x128xf32>
    tpu.vector_store %arg8[%c0_492, %c128, %c0_493], %519 {strides = array<i32>} : memref<1x256x128xf32, #tpu.memory_space<vmem>>, vector<1x64x128xf32>,
    %c12_494 = arith.constant 12 : index
    %c0_495 = arith.constant 0 : index
    %c0_496 = arith.constant 0 : index
    %520 = vector.load %arg10[%c12_494, %c0_495, %c0_496] : memref<18x24x8xf32, #tpu.memory_space<vmem>>, vector<4x16x8xf32>
    %521 = vector.shape_cast %520 : vector<4x16x8xf32> to vector<64x8xf32>
    %522 = arith.truncf %521 : vector<64x8xf32> to vector<64x8xbf16>
    %c0_497 = arith.constant 0 : index
    %c0_498 = arith.constant 0 : index
    %c0_499 = arith.constant 0 : index
    %523 = vector.load %arg5[%c0_497, %c0_498, %c0_499] : memref<9x8x128xbf16, #tpu.memory_space<vmem>>, vector<1x8x128xbf16>
    %524 = vector.shape_cast %523 : vector<1x8x128xbf16> to vector<8x128xbf16>
    %cst_500 = arith.constant dense<0.000000e+00> : vector<64x128xf32>
    %525 = tpu.matmul %522, %524, %cst_500 {dimension_numbers = #tpu.dot_dimension_numbers<[1], [0], [0], [1], [0, 0, 1, 1], [], []>} : vector<64x8xbf16>, vector<8x128xbf16>, vector<64x128xf32> -> vector<64x128xf32>
    %c12_501 = arith.constant 12 : index
    %c1_502 = arith.constant 1 : index
    %c0_503 = arith.constant 0 : index
    %526 = vector.load %arg10[%c12_501, %c1_502, %c0_503] : memref<18x24x8xf32, #tpu.memory_space<vmem>>, vector<4x16x8xf32>
    %527 = vector.shape_cast %526 : vector<4x16x8xf32> to vector<64x8xf32>
    %528 = arith.truncf %527 : vector<64x8xf32> to vector<64x8xbf16>
    %c1_504 = arith.constant 1 : index
    %c0_505 = arith.constant 0 : index
    %c0_506 = arith.constant 0 : index
    %529 = vector.load %arg5[%c1_504, %c0_505, %c0_506] : memref<9x8x128xbf16, #tpu.memory_space<vmem>>, vector<1x8x128xbf16>
    %530 = vector.shape_cast %529 : vector<1x8x128xbf16> to vector<8x128xbf16>
    %cst_507 = arith.constant dense<0.000000e+00> : vector<64x128xf32>
    %531 = tpu.matmul %528, %530, %cst_507 {dimension_numbers = #tpu.dot_dimension_numbers<[1], [0], [0], [1], [0, 0, 1, 1], [], []>} : vector<64x8xbf16>, vector<8x128xbf16>, vector<64x128xf32> -> vector<64x128xf32>
    %532 = arith.addf %525, %531 : vector<64x128xf32>
    %c12_508 = arith.constant 12 : index
    %c2_509 = arith.constant 2 : index
    %c0_510 = arith.constant 0 : index
    %533 = vector.load %arg10[%c12_508, %c2_509, %c0_510] : memref<18x24x8xf32, #tpu.memory_space<vmem>>, vector<4x16x8xf32>
    %534 = vector.shape_cast %533 : vector<4x16x8xf32> to vector<64x8xf32>
    %535 = arith.truncf %534 : vector<64x8xf32> to vector<64x8xbf16>
    %c2_511 = arith.constant 2 : index
    %c0_512 = arith.constant 0 : index
    %c0_513 = arith.constant 0 : index
    %536 = vector.load %arg5[%c2_511, %c0_512, %c0_513] : memref<9x8x128xbf16, #tpu.memory_space<vmem>>, vector<1x8x128xbf16>
    %537 = vector.shape_cast %536 : vector<1x8x128xbf16> to vector<8x128xbf16>
    %cst_514 = arith.constant dense<0.000000e+00> : vector<64x128xf32>
    %538 = tpu.matmul %535, %537, %cst_514 {dimension_numbers = #tpu.dot_dimension_numbers<[1], [0], [0], [1], [0, 0, 1, 1], [], []>} : vector<64x8xbf16>, vector<8x128xbf16>, vector<64x128xf32> -> vector<64x128xf32>
    %539 = arith.addf %532, %538 : vector<64x128xf32>
    %c13_515 = arith.constant 13 : index
    %c0_516 = arith.constant 0 : index
    %c0_517 = arith.constant 0 : index
    %540 = vector.load %arg10[%c13_515, %c0_516, %c0_517] : memref<18x24x8xf32, #tpu.memory_space<vmem>>, vector<4x16x8xf32>
    %541 = vector.shape_cast %540 : vector<4x16x8xf32> to vector<64x8xf32>
    %542 = arith.truncf %541 : vector<64x8xf32> to vector<64x8xbf16>
    %c3_518 = arith.constant 3 : index
    %c0_519 = arith.constant 0 : index
    %c0_520 = arith.constant 0 : index
    %543 = vector.load %arg5[%c3_518, %c0_519, %c0_520] : memref<9x8x128xbf16, #tpu.memory_space<vmem>>, vector<1x8x128xbf16>
    %544 = vector.shape_cast %543 : vector<1x8x128xbf16> to vector<8x128xbf16>
    %cst_521 = arith.constant dense<0.000000e+00> : vector<64x128xf32>
    %545 = tpu.matmul %542, %544, %cst_521 {dimension_numbers = #tpu.dot_dimension_numbers<[1], [0], [0], [1], [0, 0, 1, 1], [], []>} : vector<64x8xbf16>, vector<8x128xbf16>, vector<64x128xf32> -> vector<64x128xf32>
    %546 = arith.addf %539, %545 : vector<64x128xf32>
    %c13_522 = arith.constant 13 : index
    %c1_523 = arith.constant 1 : index
    %c0_524 = arith.constant 0 : index
    %547 = vector.load %arg10[%c13_522, %c1_523, %c0_524] : memref<18x24x8xf32, #tpu.memory_space<vmem>>, vector<4x16x8xf32>
    %548 = vector.shape_cast %547 : vector<4x16x8xf32> to vector<64x8xf32>
    %549 = arith.truncf %548 : vector<64x8xf32> to vector<64x8xbf16>
    %c4_525 = arith.constant 4 : index
    %c0_526 = arith.constant 0 : index
    %c0_527 = arith.constant 0 : index
    %550 = vector.load %arg5[%c4_525, %c0_526, %c0_527] : memref<9x8x128xbf16, #tpu.memory_space<vmem>>, vector<1x8x128xbf16>
    %551 = vector.shape_cast %550 : vector<1x8x128xbf16> to vector<8x128xbf16>
    %cst_528 = arith.constant dense<0.000000e+00> : vector<64x128xf32>
    %552 = tpu.matmul %549, %551, %cst_528 {dimension_numbers = #tpu.dot_dimension_numbers<[1], [0], [0], [1], [0, 0, 1, 1], [], []>} : vector<64x8xbf16>, vector<8x128xbf16>, vector<64x128xf32> -> vector<64x128xf32>
    %553 = arith.addf %546, %552 : vector<64x128xf32>
    %c13_529 = arith.constant 13 : index
    %c2_530 = arith.constant 2 : index
    %c0_531 = arith.constant 0 : index
    %554 = vector.load %arg10[%c13_529, %c2_530, %c0_531] : memref<18x24x8xf32, #tpu.memory_space<vmem>>, vector<4x16x8xf32>
    %555 = vector.shape_cast %554 : vector<4x16x8xf32> to vector<64x8xf32>
    %556 = arith.truncf %555 : vector<64x8xf32> to vector<64x8xbf16>
    %c5_532 = arith.constant 5 : index
    %c0_533 = arith.constant 0 : index
    %c0_534 = arith.constant 0 : index
    %557 = vector.load %arg5[%c5_532, %c0_533, %c0_534] : memref<9x8x128xbf16, #tpu.memory_space<vmem>>, vector<1x8x128xbf16>
    %558 = vector.shape_cast %557 : vector<1x8x128xbf16> to vector<8x128xbf16>
    %cst_535 = arith.constant dense<0.000000e+00> : vector<64x128xf32>
    %559 = tpu.matmul %556, %558, %cst_535 {dimension_numbers = #tpu.dot_dimension_numbers<[1], [0], [0], [1], [0, 0, 1, 1], [], []>} : vector<64x8xbf16>, vector<8x128xbf16>, vector<64x128xf32> -> vector<64x128xf32>
    %560 = arith.addf %553, %559 : vector<64x128xf32>
    %c14_536 = arith.constant 14 : index
    %c0_537 = arith.constant 0 : index
    %c0_538 = arith.constant 0 : index
    %561 = vector.load %arg10[%c14_536, %c0_537, %c0_538] : memref<18x24x8xf32, #tpu.memory_space<vmem>>, vector<4x16x8xf32>
    %562 = vector.shape_cast %561 : vector<4x16x8xf32> to vector<64x8xf32>
    %563 = arith.truncf %562 : vector<64x8xf32> to vector<64x8xbf16>
    %c6_539 = arith.constant 6 : index
    %c0_540 = arith.constant 0 : index
    %c0_541 = arith.constant 0 : index
    %564 = vector.load %arg5[%c6_539, %c0_540, %c0_541] : memref<9x8x128xbf16, #tpu.memory_space<vmem>>, vector<1x8x128xbf16>
    %565 = vector.shape_cast %564 : vector<1x8x128xbf16> to vector<8x128xbf16>
    %cst_542 = arith.constant dense<0.000000e+00> : vector<64x128xf32>
    %566 = tpu.matmul %563, %565, %cst_542 {dimension_numbers = #tpu.dot_dimension_numbers<[1], [0], [0], [1], [0, 0, 1, 1], [], []>} : vector<64x8xbf16>, vector<8x128xbf16>, vector<64x128xf32> -> vector<64x128xf32>
    %567 = arith.addf %560, %566 : vector<64x128xf32>
    %c14_543 = arith.constant 14 : index
    %c1_544 = arith.constant 1 : index
    %c0_545 = arith.constant 0 : index
    %568 = vector.load %arg10[%c14_543, %c1_544, %c0_545] : memref<18x24x8xf32, #tpu.memory_space<vmem>>, vector<4x16x8xf32>
    %569 = vector.shape_cast %568 : vector<4x16x8xf32> to vector<64x8xf32>
    %570 = arith.truncf %569 : vector<64x8xf32> to vector<64x8xbf16>
    %c7_546 = arith.constant 7 : index
    %c0_547 = arith.constant 0 : index
    %c0_548 = arith.constant 0 : index
    %571 = vector.load %arg5[%c7_546, %c0_547, %c0_548] : memref<9x8x128xbf16, #tpu.memory_space<vmem>>, vector<1x8x128xbf16>
    %572 = vector.shape_cast %571 : vector<1x8x128xbf16> to vector<8x128xbf16>
    %cst_549 = arith.constant dense<0.000000e+00> : vector<64x128xf32>
    %573 = tpu.matmul %570, %572, %cst_549 {dimension_numbers = #tpu.dot_dimension_numbers<[1], [0], [0], [1], [0, 0, 1, 1], [], []>} : vector<64x8xbf16>, vector<8x128xbf16>, vector<64x128xf32> -> vector<64x128xf32>
    %574 = arith.addf %567, %573 : vector<64x128xf32>
    %c14_550 = arith.constant 14 : index
    %c2_551 = arith.constant 2 : index
    %c0_552 = arith.constant 0 : index
    %575 = vector.load %arg10[%c14_550, %c2_551, %c0_552] : memref<18x24x8xf32, #tpu.memory_space<vmem>>, vector<4x16x8xf32>
    %576 = vector.shape_cast %575 : vector<4x16x8xf32> to vector<64x8xf32>
    %577 = arith.truncf %576 : vector<64x8xf32> to vector<64x8xbf16>
    %c8_553 = arith.constant 8 : index
    %c0_554 = arith.constant 0 : index
    %c0_555 = arith.constant 0 : index
    %578 = vector.load %arg5[%c8_553, %c0_554, %c0_555] : memref<9x8x128xbf16, #tpu.memory_space<vmem>>, vector<1x8x128xbf16>
    %579 = vector.shape_cast %578 : vector<1x8x128xbf16> to vector<8x128xbf16>
    %cst_556 = arith.constant dense<0.000000e+00> : vector<64x128xf32>
    %580 = tpu.matmul %577, %579, %cst_556 {dimension_numbers = #tpu.dot_dimension_numbers<[1], [0], [0], [1], [0, 0, 1, 1], [], []>} : vector<64x8xbf16>, vector<8x128xbf16>, vector<64x128xf32> -> vector<64x128xf32>
    %581 = arith.addf %574, %580 : vector<64x128xf32>
    %582 = vector.broadcast %305 : vector<1x128xf32> to vector<64x128xf32>
    %583 = arith.mulf %581, %582 : vector<64x128xf32>
    %584 = vector.broadcast %306 : vector<1x128xf32> to vector<64x128xf32>
    %585 = arith.addf %583, %584 : vector<64x128xf32>
    %cst_557 = arith.constant 0.000000e+00 : f32
    %586 = vector.broadcast %cst_557 : f32 to vector<64x128xf32>
    %587 = arith.maximumf %585, %586 : vector<64x128xf32>
    %c0_558 = arith.constant 0 : index
    %c192 = arith.constant 192 : index
    %c0_559 = arith.constant 0 : index
    %588 = vector.load %arg8[%c0_558, %c192, %c0_559] : memref<1x256x128xf32, #tpu.memory_space<vmem>>, vector<1x64x128xf32>
    %589 = vector.shape_cast %588 : vector<1x64x128xf32> to vector<64x128xf32>
    %590 = vector.shape_cast %587 : vector<64x128xf32> to vector<1x64x128xf32>
    tpu.vector_store %arg8[%c0_558, %c192, %c0_559], %590 {strides = array<i32>} : memref<1x256x128xf32, #tpu.memory_space<vmem>>, vector<1x64x128xf32>,
    return
  }
  func.func @transform_0(%arg0: i32) -> (i32, i32, i32, i32) {
    %c0_i32 = arith.constant 0 : i32
    %c0_i32_0 = arith.constant 0 : i32
    %c0_i32_1 = arith.constant 0 : i32
    %c0_i32_2 = arith.constant 0 : i32
    return %arg0, %c0_i32, %c0_i32_0, %c0_i32_1 : i32, i32, i32, i32
  }
  func.func @transform_1(%arg0: i32) -> (i32, i32, i32) {
    %c0_i32 = arith.constant 0 : i32
    %c0_i32_0 = arith.constant 0 : i32
    %c0_i32_1 = arith.constant 0 : i32
    %c0_i32_2 = arith.constant 0 : i32
    return %c0_i32, %c0_i32_0, %c0_i32_1 : i32, i32, i32
  }
  func.func @transform_2(%arg0: i32) -> (i32, i32) {
    %c0_i32 = arith.constant 0 : i32
    %c0_i32_0 = arith.constant 0 : i32
    %c0_i32_1 = arith.constant 0 : i32
    return %c0_i32, %c0_i32_0 : i32, i32
  }
  func.func @transform_3(%arg0: i32) -> (i32, i32) {
    %c0_i32 = arith.constant 0 : i32
    %c0_i32_0 = arith.constant 0 : i32
    %c0_i32_1 = arith.constant 0 : i32
    return %c0_i32, %c0_i32_0 : i32, i32
  }
  func.func @transform_4(%arg0: i32) -> (i32, i32, i32) {
    %c0_i32 = arith.constant 0 : i32
    %c0_i32_0 = arith.constant 0 : i32
    %c0_i32_1 = arith.constant 0 : i32
    %c0_i32_2 = arith.constant 0 : i32
    return %c0_i32, %c0_i32_0, %c0_i32_1 : i32, i32, i32
  }
  func.func @transform_5(%arg0: i32) -> (i32, i32) {
    %c0_i32 = arith.constant 0 : i32
    %c0_i32_0 = arith.constant 0 : i32
    %c0_i32_1 = arith.constant 0 : i32
    return %c0_i32, %c0_i32_0 : i32, i32
  }
  func.func @transform_6(%arg0: i32) -> (i32, i32) {
    %c0_i32 = arith.constant 0 : i32
    %c0_i32_0 = arith.constant 0 : i32
    %c0_i32_1 = arith.constant 0 : i32
    return %c0_i32, %c0_i32_0 : i32, i32
  }
  func.func @transform_7(%arg0: i32) -> (i32, i32, i32) {
    %c0_i32 = arith.constant 0 : i32
    %c0_i32_0 = arith.constant 0 : i32
    %c0_i32_1 = arith.constant 0 : i32
    return %arg0, %c0_i32, %c0_i32_0 : i32, i32, i32
  }
}

</mosaic_0001>

<bundles_post_ra>
// kernel: double_conv_pallas.1
= control target key start
LH: loop header
LB: loop body
LE: loop exit
PB: predicated region body
PF: predicated region fallthrough
CT: control target
= control target key end

     0   :  { %s10040_s24 = smov 0   ;;  %s11624_s0 = inlined_call_operand.vmem [shape: f32[2,16,16,4], index: 0, kind: input, shape index: {}]   ;;  %s11625_s1 = inlined_call_operand.vmem [shape: bf16[9,4,8], index: 1, kind: input, shape index: {}]   ;;  %s11626_s2 = inlined_call_operand.vmem [shape: f32[1,8], index: 2, kind: input, shape index: {}]   ;;  %s11627_s3 = inlined_call_operand.vmem [shape: f32[1,8], index: 3, kind: input, shape index: {}]   ;;  %s11628_s4 = inlined_call_operand.vmem [shape: bf16[9,8,128], index: 4, kind: input, shape index: {}]   ;;  %s11629_s5 = inlined_call_operand.vmem [shape: f32[1,128], index: 5, kind: input, shape index: {}]   ;;  %s11630_s6 = inlined_call_operand.vmem [shape: f32[1,128], index: 6, kind: input, shape index: {}]   ;;  %s11631_s7 = inlined_call_operand.vmem [shape: f32[2,256,128], index: 7, kind: output, shape index: {}]  }
   0x1 LB: > { %s7949_s25 = sadd.s32 4294967295, %s9997_s24   ;;  %p7953_p0 = scmp.ge.s32.totalorder %s9997_s24, 1  ;;  %s9997_s24 = sphi %s10040_s24, %s17_s24  }
   0x2   : > { %p237_p1 = scmp.lt.s32.totalorder %s9997_s24, 3 }
   0x4   : > { %p238_p2 = pnand %p7953_p0, %p237_p1 }
   0x5   : > { %v7958_v0 = vld [vmem:[%s11625_s1 + $0x2] sm:$0x3] (!%p238_p2)  ;;  %vm469_vm0 = vcmask (!%p238_p2), 1041408   ;;  %vm280_vm1 = vcmask (!%p238_p2), 31744   ;;  %v10061_v4 = vld [vmem:[%s11625_s1] sm:$0x3] (!%p238_p2) }
   0x6   : > { %241 = sbr.rel (%p238_p2) target bundleno = 937 (0x3a9), region = 48  ;;  %v8004_v1 = vld [vmem:[%s11625_s1 + $0x2] sm:$0x3] (!%p238_p2)  ;;  %9910 = vmatprep.subr.msk.bf16.mxu0 (!%p238_p2), %vm469_vm0, %v7958_v0  ;;  %v471_v2 = vsel (!%p238_p2), %vm469_vm0, %v7958_v0, 0  ;;  %p269_p3 = scmp.lt.s32.totalorder (!%p238_p2), %s7949_s25, 1  ;;  %v9999_v5 = vmov (!%p238_p2), 0.0  }
   0x7   : > { %9919 = vmatprep.subr.msk.bf16.mxu1 (!%p238_p2), %vm469_vm0, %v8004_v1  ;;  %v1417_v3 = vsel (!%p238_p2), %vm469_vm0, %v8004_v1, 0  ;;  %8679 = vmatpush3.bf16.msra.mxu0 (!%p238_p2), %v471_v2  ;;  %281 = vst.msk [vmem:[#allocation2] sm:$0xff] (!%p238_p2), %vm280_vm1, %v9999_v5  ;;  %282 = vst.msk [vmem:[#allocation2 + $0x8] sm:$0xff] (!%p238_p2), %vm280_vm1, %v9999_v5  ;;  %v10078_v6 = vld [vmem:[%s11625_s1] sm:$0x3] (!%p238_p2)  ;;  %vm289_vm2 = vcmask (!%p238_p2), 24576  }
   0x8   : > { %8769 = vmatpush3.bf16.msra.mxu1 (!%p238_p2), %v1417_v3  ;;  %283 = vst.msk [vmem:[#allocation2 + $0x10] sm:$0xff] (!%p238_p2), %vm280_vm1, %v9999_v5  ;;  %285 = vst.msk [vmem:[#allocation2 + $0x198] sm:$0xff] (!%p238_p2), %vm280_vm1, %v9999_v5  ;;  %9911 = vmatprep.subr.msk.bf16.mxu0 (!%p238_p2), %vm469_vm0, %v10061_v4  ;;  %v551_v30 = vsel (!%p238_p2), %vm469_vm0, %v10061_v4, 0  ;;  %v7967_v37 = vld [vmem:[%s11625_s1 + $0x4] sm:$0x3] (!%p238_p2)  ;;  %v1497_v40 = vsel (!%p238_p2), %vm469_vm0, %v10078_v6, 0 }
   0x9   : > { %286 = vst.msk [vmem:[#allocation2 + $0x1a0] sm:$0xff] (!%p238_p2), %vm280_vm1, %v9999_v5  ;;  %287 = vst.msk [vmem:[#allocation2 + $0x1a8] sm:$0xff] (!%p238_p2), %vm280_vm1, %v9999_v5  ;;  %9920 = vmatprep.subr.msk.bf16.mxu1 (!%p238_p2), %vm469_vm0, %v10078_v6  ;;  %v8013_v41 = vld [vmem:[%s11625_s1 + $0x4] sm:$0x3] (!%p238_p2)  ;;  %v645_v4 = vsel (!%p238_p2), %vm469_vm0, %v7967_v37, 0  ;;  %vm322_vm3 = vcmask (!%p238_p2), 64512  }
   0xa   : > { %290 = vst.msk [vmem:[#allocation2 + $0x18] sm:$0x1] (!%p238_p2), %vm289_vm2, %v9999_v5  ;;  %291 = vst.msk [vmem:[#allocation2 + $0x30] sm:$0x1] (!%p238_p2), %vm289_vm2, %v9999_v5  ;;  %vm331_vm4 = vcmask (!%p238_p2), 57344   ;;  %vm4205_vm5 = vcmask (!%p238_p2), 1043456  }
   0xb   : > { %292 = vst.msk [vmem:[#allocation2 + $0x48] sm:$0x1] (!%p238_p2), %vm289_vm2, %v9999_v5  ;;  %293 = vst.msk [vmem:[#allocation2 + $0x60] sm:$0x1] (!%p238_p2), %vm289_vm2, %v9999_v5 }
   0xc   : > { %294 = vst.msk [vmem:[#allocation2 + $0x78] sm:$0x1] (!%p238_p2), %vm289_vm2, %v9999_v5  ;;  %295 = vst.msk [vmem:[#allocation2 + $0x90] sm:$0x1] (!%p238_p2), %vm289_vm2, %v9999_v5 }
   0xd   : > { %s11633_s25 = smov (!%p269_p3, %s7949_s25), 1  ;;  %296 = vst.msk [vmem:[#allocation2 + $0xa8] sm:$0x1] %vm289_vm2, %v9999_v5  ;;  %297 = vst.msk [vmem:[#allocation2 + $0xc0] sm:$0x1] %vm289_vm2, %v9999_v5 }
   0xe   : > { %298 = vst.msk [vmem:[#allocation2 + $0xd8] sm:$0x1] %vm289_vm2, %v9999_v5  ;;  %299 = vst.msk [vmem:[#allocation2 + $0xf0] sm:$0x1] %vm289_vm2, %v9999_v5  ;;  %s8316_s11 = sshll.u32 %s11633_s25, 8  ;;  %v443_v13 = vld [vmem:[#allocation2 + $0x1] sm:$0xff] }
   0xf   : > { %300 = vst.msk [vmem:[#allocation2 + $0x108] sm:$0x1] %vm289_vm2, %v9999_v5  ;;  %301 = vst.msk [vmem:[#allocation2 + $0x120] sm:$0x1] %vm289_vm2, %v9999_v5  ;;  %s10156_s14 = scalar_lea.vmem %s11624_s0, %s8316_s11  ;;  %v444_v14 = vld [vmem:[#allocation2 + $0x9] sm:$0xff]  ;;  %v430_v47 = vld [vmem:[#allocation2] sm:$0xff]  ;;  %s11527_s21 = scalar_lea.vmem %s11631_s7, %s8316_s11 }
  0x10   : > { %302 = vst.msk [vmem:[#allocation2 + $0x138] sm:$0x1] %vm289_vm2, %v9999_v5  ;;  %303 = vst.msk [vmem:[#allocation2 + $0x150] sm:$0x1] %vm289_vm2, %v9999_v5  ;;  %v364_v7 = vld [vmem:[%s10156_s14] sm:$0xff]  ;;  %v365_v8 = vld [vmem:[%s10156_s14 + $0x8] sm:$0xff]  ;;  %v451_v16 = vpack.c.bf16 %v444_v14, %v443_v13 }
  0x11   : > { %304 = vst.msk [vmem:[#allocation2 + $0x168] sm:$0x1] %vm289_vm2, %v9999_v5  ;;  %305 = vst.msk [vmem:[#allocation2 + $0x180] sm:$0x1] %vm289_vm2, %v9999_v5  ;;  %v370_v9 = vld [vmem:[%s10156_s14 + $0x30] sm:$0xff]  ;;  %v371_v10 = vld [vmem:[%s10156_s14 + $0x38] sm:$0xff] }
  0x12   : > { %306 = vst.msk [vmem:[#allocation2 + $0x29] sm:$0x1] %vm289_vm2, %v9999_v5  ;;  %307 = vst.msk [vmem:[#allocation2 + $0x41] sm:$0x1] %vm289_vm2, %v9999_v5  ;;  %v372_v11 = vld [vmem:[%s10156_s14 + $0x40] sm:$0xff]  ;;  %v373_v12 = vld [vmem:[%s10156_s14 + $0x48] sm:$0xff]  ;;  %8680 = vmatprep.mubr.msk.bf16.mxu0 %vm280_vm1, %v451_v16 }
  0x13   : > { %308 = vst.msk [vmem:[#allocation2 + $0x59] sm:$0x1] %vm289_vm2, %v9999_v5  ;;  %309 = vst.msk [vmem:[#allocation2 + $0x71] sm:$0x1] %vm289_vm2, %v9999_v5  ;;  %v366_v15 = vld [vmem:[%s10156_s14 + $0x10] sm:$0xff]  ;;  %v367_v17 = vld [vmem:[%s10156_s14 + $0x18] sm:$0xff] }
  0x14   : > { %310 = vst.msk [vmem:[#allocation2 + $0x89] sm:$0x1] %vm289_vm2, %v9999_v5  ;;  %311 = vst.msk [vmem:[#allocation2 + $0xa1] sm:$0x1] %vm289_vm2, %v9999_v5  ;;  %v368_v18 = vld [vmem:[%s10156_s14 + $0x20] sm:$0xff]  ;;  %v369_v19 = vld [vmem:[%s10156_s14 + $0x28] sm:$0xff] }
  0x15   : > { %312 = vst.msk [vmem:[#allocation2 + $0xb9] sm:$0x1] %vm289_vm2, %v9999_v5  ;;  %313 = vst.msk [vmem:[#allocation2 + $0xd1] sm:$0x1] %vm289_vm2, %v9999_v5  ;;  %v374_v20 = vld [vmem:[%s10156_s14 + $0x50] sm:$0xff]  ;;  %v375_v21 = vld [vmem:[%s10156_s14 + $0x58] sm:$0xff] }
  0x16   : > { %314 = vst.msk [vmem:[#allocation2 + $0xe9] sm:$0x1] %vm289_vm2, %v9999_v5  ;;  %315 = vst.msk [vmem:[#allocation2 + $0x101] sm:$0x1] %vm289_vm2, %v9999_v5  ;;  %v376_v22 = vld [vmem:[%s10156_s14 + $0x60] sm:$0xff]  ;;  %v377_v23 = vld [vmem:[%s10156_s14 + $0x68] sm:$0xff] }
  0x17   : > { %316 = vst.msk [vmem:[#allocation2 + $0x119] sm:$0x1] %vm289_vm2, %v9999_v5  ;;  %317 = vst.msk [vmem:[#allocation2 + $0x131] sm:$0x1] %vm289_vm2, %v9999_v5  ;;  %v378_v24 = vld [vmem:[%s10156_s14 + $0x70] sm:$0xff]  ;;  %v379_v25 = vld [vmem:[%s10156_s14 + $0x78] sm:$0xff] }
  0x18   : > { %318 = vst.msk [vmem:[#allocation2 + $0x149] sm:$0x1] %vm289_vm2, %v9999_v5  ;;  %319 = vst.msk [vmem:[#allocation2 + $0x161] sm:$0x1] %vm289_vm2, %v9999_v5  ;;  %v431_v48 = vld [vmem:[#allocation2 + $0x8] sm:$0xff]  ;;  %v380_v3 = vld [vmem:[%s10156_s14 + $0x80] sm:$0xff] }
  0x19   : > { %320 = vst.msk [vmem:[#allocation2 + $0x179] sm:$0x1] %vm289_vm2, %v9999_v5  ;;  %321 = vst.msk [vmem:[#allocation2 + $0x191] sm:$0x1] %vm289_vm2, %v9999_v5  ;;  %v438_v54 = vpack.c.bf16 %v431_v48, %v430_v47  ;;  %v618_v16 = vld [vmem:[#allocation2 + $0x2] sm:$0xff] }
  0x1a   : > { %396 = vst.msk [vmem:[#allocation2 + $0x19] sm:$0xff] %vm280_vm1, %v364_v7  ;;  %397 = vst.msk [vmem:[#allocation2 + $0x21] sm:$0xff] %vm280_vm1, %v365_v8  ;;  %v381_v7 = vld [vmem:[%s10156_s14 + $0x88] sm:$0xff]  ;;  %v386_v8 = vld [vmem:[%s10156_s14 + $0xb0] sm:$0xff] }
  0x1b   : > { %402 = vst.msk [vmem:[#allocation2 + $0x61] sm:$0xff] %vm280_vm1, %v370_v9  ;;  %403 = vst.msk [vmem:[#allocation2 + $0x69] sm:$0xff] %vm280_vm1, %v371_v10  ;;  %v7972_v10 = vld [vmem:[%s11625_s1 + $0x6] sm:$0x3] }
  0x1c   : > { %404 = vst.msk [vmem:[#allocation2 + $0x79] sm:$0xff] %vm280_vm1, %v372_v11  ;;  %405 = vst.msk [vmem:[#allocation2 + $0x81] sm:$0xff] %vm280_vm1, %v373_v12  ;;  %v10255_v11 = vld [vmem:[%s11625_s1 + $0x6] sm:$0x3]  ;;  %v387_v12 = vld [vmem:[%s10156_s14 + $0xb8] sm:$0xff] }
  0x1d   : > { %398 = vst.msk [vmem:[#allocation2 + $0x31] sm:$0xff] %vm280_vm1, %v366_v15  ;;  %399 = vst.msk [vmem:[#allocation2 + $0x39] sm:$0xff] %vm280_vm1, %v367_v17  ;;  %v1590_v15 = vsel %vm469_vm0, %v8013_v41, 0  ;;  %v619_v17 = vld [vmem:[#allocation2 + $0xa] sm:$0xff] }
  0x1e   : > { %400 = vst.msk [vmem:[#allocation2 + $0x49] sm:$0xff] %vm280_vm1, %v368_v18  ;;  %401 = vst.msk [vmem:[#allocation2 + $0x51] sm:$0xff] %vm280_vm1, %v369_v19 }
  0x1f   : > { %406 = vst.msk [vmem:[#allocation2 + $0x91] sm:$0xff] %vm280_vm1, %v374_v20  ;;  %407 = vst.msk [vmem:[#allocation2 + $0x99] sm:$0xff] %vm280_vm1, %v375_v21  ;;  %v388_v20 = vld [vmem:[%s10156_s14 + $0xc0] sm:$0xff]  ;;  %v389_v21 = vld [vmem:[%s10156_s14 + $0xc8] sm:$0xff] }
  0x20   : > { %408 = vst.msk [vmem:[#allocation2 + $0xa9] sm:$0xff] %vm280_vm1, %v376_v22  ;;  %409 = vst.msk [vmem:[#allocation2 + $0xb1] sm:$0xff] %vm280_vm1, %v377_v23  ;;  %v382_v23 = vld [vmem:[%s10156_s14 + $0x90] sm:$0xff] }
  0x21   : > { %410 = vst.msk [vmem:[#allocation2 + $0xc1] sm:$0xff] %vm280_vm1, %v378_v24  ;;  %v445_v26 = vld [vmem:[#allocation2 + $0x19] sm:$0xff]  ;;  %v446_v27 = vld [vmem:[#allocation2 + $0x21] sm:$0xff]  ;;  %411 = vst.msk [vmem:[#allocation2 + $0xc9] sm:$0xff] %vm280_vm1, %v379_v25 }
  0x22   : > { %v1391_v28 = vld [vmem:[#allocation2 + $0x61] sm:$0xff]  ;;  %v10191_v29 = vpack.c.bf16 %v446_v27, %v445_v26  ;;  %v1392_v31 = vld [vmem:[#allocation2 + $0x69] sm:$0xff]  ;;  %v432_v57 = vld [vmem:[#allocation2 + $0x18] sm:$0xff]  ;;  %412 = vst.msk [vmem:[#allocation2 + $0xd9] sm:$0xff] %vm280_vm1, %v380_v3 }
  0x23   : > { %v1393_v32 = vld [vmem:[#allocation2 + $0x79] sm:$0xff]  ;;  %v1394_v33 = vld [vmem:[#allocation2 + $0x81] sm:$0xff]  ;;  %v10195_v34 = vpack.c.bf16 %v1392_v31, %v1391_v28  ;;  %413 = vst.msk [vmem:[#allocation2 + $0xe1] sm:$0xff] %vm280_vm1, %v381_v7  ;;  %418 = vst.msk [vmem:[#allocation2 + $0x121] sm:$0xff] %vm280_vm1, %v386_v8 }
  0x24   : > { %v10197_v35 = vpack.c.bf16 %v1394_v33, %v1393_v32  ;;  %v447_v36 = vld [vmem:[#allocation2 + $0x31] sm:$0xff]  ;;  %8681 = vmatmul.mubr.msk.bf16.vlgmr.msra.gmra.mrb[0].mxu0 %vm280_vm1, %v10191_v29  ;;  %v448_v38 = vld [vmem:[#allocation2 + $0x39] sm:$0xff]  ;;  %v1379_v53 = vld [vmem:[#allocation2 + $0x68] sm:$0xff]  ;;  %419 = vst.msk [vmem:[#allocation2 + $0x129] sm:$0xff] %vm280_vm1, %v387_v12 }
  0x25   : > { %v449_v39 = vld [vmem:[#allocation2 + $0x49] sm:$0xff]  ;;  %8689 = vmatpush3.bf16.msra.mxu0 %v551_v30  ;;  %8770 = vmatprep.mubr.msk.bf16.mxu1 %vm280_vm1, %v10195_v34  ;;  %v10211_v42 = vpack.c.bf16 %v448_v38, %v447_v36  ;;  %v450_v43 = vld [vmem:[#allocation2 + $0x51] sm:$0xff]  ;;  %v1378_v52 = vld [vmem:[#allocation2 + $0x60] sm:$0xff]  ;;  %420 = vst.msk [vmem:[#allocation2 + $0x139] sm:$0xff] %vm280_vm1, %v388_v20  ;;  %v626_v36 = vpack.c.bf16 %v619_v17, %v618_v16 }
  0x26   : > { %v1395_v44 = vld [vmem:[#allocation2 + $0x91] sm:$0xff]  ;;  %v1396_v45 = vld [vmem:[#allocation2 + $0x99] sm:$0xff]  ;;  %8771 = vmatmul.mubr.msk.bf16.vlgmr.msra.gmra.mrb[0].mxu1 %vm280_vm1, %v10197_v35  ;;  %9912 = vmatprep.subr.msk.bf16.mxu0 %vm469_vm0, %v7967_v37  ;;  %v10220_v51 = vpack.c.bf16 %v450_v43, %v449_v39  ;;  %v10227_v56 = vpack.c.bf16 %v1379_v53, %v1378_v52  ;;  %v436_v13 = vld [vmem:[#allocation2 + $0x48] sm:$0xff]  ;;  %421 = vst.msk [vmem:[#allocation2 + $0x141] sm:$0xff] %vm280_vm1, %v389_v21  ;;  %v747_v52 = vsel %vm469_vm0, %v7972_v10, 0 }
  0x27   : > { %v10215_v46 = vpack.c.bf16 %v1396_v45, %v1395_v44  ;;  %8684 = vmatprep.mubr.msk.bf16.mxu0 %vm280_vm1, %v10211_v42  ;;  %v1397_v49 = vld [vmem:[#allocation2 + $0xa9] sm:$0xff]  ;;  %v1398_v50 = vld [vmem:[#allocation2 + $0xb1] sm:$0xff]  ;;  %8779 = vmatpush3.bf16.msra.mxu1 %v1497_v40  ;;  %v433_v58 = vld [vmem:[#allocation2 + $0x20] sm:$0xff]  ;;  %414 = vst.msk [vmem:[#allocation2 + $0xf1] sm:$0xff] %vm280_vm1, %v382_v23 }
  0x28   : > { %9921 = vmatprep.subr.msk.bf16.mxu1 %vm469_vm0, %v8013_v41  ;;  %v10225_v55 = vpack.c.bf16 %v1398_v50, %v1397_v49  ;;  %v434_v59 = vld [vmem:[#allocation2 + $0x30] sm:$0xff]  ;;  %v435_v60 = vld [vmem:[#allocation2 + $0x38] sm:$0xff]  ;;  %v1381_v62 = vld [vmem:[#allocation2 + $0x80] sm:$0xff]  ;;  %v10236_v63 = vpack.c.bf16 %v433_v58, %v432_v57  ;;  %v1692_v58 = vsel %vm469_vm0, %v10255_v11, 0  ;;  %323 = vst.msk [vmem:[#allocation3] sm:$0xff] %vm322_vm3, %v9999_v5 }
  0x29   : > { %8774 = vmatprep.mubr.msk.bf16.mxu1 %vm280_vm1, %v10215_v46  ;;  %v1380_v61 = vld [vmem:[#allocation2 + $0x78] sm:$0xff]  ;;  %v1382_v0 = vld [vmem:[#allocation2 + $0x90] sm:$0xff]  ;;  %v10238_v2 = vpack.c.bf16 %v435_v60, %v434_v59  ;;  %v1384_v18 = vld [vmem:[#allocation2 + $0xa8] sm:$0xff]  ;;  %324 = vst.msk [vmem:[#allocation3 + $0x8] sm:$0xff] %vm322_vm3, %v9999_v5 }
  0x2a   : > { %v1383_v1 = vld [vmem:[#allocation2 + $0x98] sm:$0xff]  ;;  %v10242_v6 = vpack.c.bf16 %v1381_v62, %v1380_v61  ;;  %v437_v14 = vld [vmem:[#allocation2 + $0x50] sm:$0xff]  ;;  %v1564_v22 = vld [vmem:[#allocation2 + $0x62] sm:$0xff]  ;;  %325 = vst.msk [vmem:[#allocation3 + $0x10] sm:$0xff] %vm322_vm3, %v9999_v5 }
  0x2b   : > { %v10247_v9 = vpack.c.bf16 %v1383_v1, %v1382_v0  ;;  %v1385_v19 = vld [vmem:[#allocation2 + $0xb0] sm:$0xff]  ;;  %v383_v24 = vld [vmem:[%s10156_s14 + $0x98] sm:$0xff]  ;;  %v384_v25 = vld [vmem:[%s10156_s14 + $0xa0] sm:$0xff]  ;;  %v10284_v30 = vpack.c.bf16 %v437_v14, %v436_v13  ;;  %327 = vst.msk [vmem:[#allocation3 + $0x198] sm:$0xff] %vm322_vm3, %v9999_v5 }
  0x2c   : > { %8685 = vmatmul.mubr.msk.bf16.gmra.mrb[4].mxu0 %vm280_vm1, %v10220_v51  ;;  %415 = vst.msk [vmem:[#allocation2 + $0xf9] sm:$0xff] %vm280_vm1, %v383_v24  ;;  %v385_v26 = vld [vmem:[%s10156_s14 + $0xa8] sm:$0xff]  ;;  %416 = vst.msk [vmem:[#allocation2 + $0x109] sm:$0xff] %vm280_vm1, %v384_v25  ;;  %v390_v27 = vld [vmem:[%s10156_s14 + $0xd0] sm:$0xff]  ;;  %v10295_v37 = vpack.c.bf16 %v1385_v19, %v1384_v18 }
  0x2d   : > { %8690 = vmatprep.mubr.msk.bf16.mxu0 %vm280_vm1, %v438_v54  ;;  %v391_v28 = vld [vmem:[%s10156_s14 + $0xd8] sm:$0xff]  ;;  %v1565_v31 = vld [vmem:[#allocation2 + $0x6a] sm:$0xff]  ;;  %417 = vst.msk [vmem:[#allocation2 + $0x111] sm:$0xff] %vm280_vm1, %v385_v26  ;;  %422 = vst.msk [vmem:[#allocation2 + $0x151] sm:$0xff] %vm280_vm1, %v390_v27 }
  0x2e   : > { %8775 = vmatmul.mubr.msk.bf16.gmra.mrb[4].mxu1 %vm280_vm1, %v10225_v55  ;;  %423 = vst.msk [vmem:[#allocation2 + $0x159] sm:$0xff] %vm280_vm1, %v391_v28  ;;  %v392_v32 = vld [vmem:[%s10156_s14 + $0xe0] sm:$0xff]  ;;  %v393_v33 = vld [vmem:[%s10156_s14 + $0xe8] sm:$0xff]  ;;  %v10297_v38 = vpack.c.bf16 %v1565_v31, %v1564_v22  ;;  %v622_v41 = vld [vmem:[#allocation2 + $0x32] sm:$0xff] }
  0x2f   : > { %8780 = vmatprep.mubr.msk.bf16.mxu1 %vm280_vm1, %v10227_v56  ;;  %424 = vst.msk [vmem:[#allocation2 + $0x169] sm:$0xff] %vm280_vm1, %v392_v32  ;;  %425 = vst.msk [vmem:[#allocation2 + $0x171] sm:$0xff] %vm280_vm1, %v393_v33  ;;  %v620_v39 = vld [vmem:[#allocation2 + $0x1a] sm:$0xff]  ;;  %v621_v40 = vld [vmem:[#allocation2 + $0x22] sm:$0xff] }
  0x30   : > { %v623_v43 = vld [vmem:[#allocation2 + $0x3a] sm:$0xff]  ;;  %v1567_v45 = vld [vmem:[#allocation2 + $0x82] sm:$0xff]  ;;  %v10306_v47 = vpack.c.bf16 %v621_v40, %v620_v39  ;;  %v1568_v48 = vld [vmem:[#allocation2 + $0x92] sm:$0xff]  ;;  %328 = vst.msk [vmem:[#allocation3 + $0x1a0] sm:$0xff] %vm322_vm3, %v9999_v5 }
  0x31   : > { %v1566_v44 = vld [vmem:[#allocation2 + $0x7a] sm:$0xff]  ;;  %v10308_v50 = vpack.c.bf16 %v623_v43, %v622_v41  ;;  %v7977_v57 = vld [vmem:[%s11625_s1 + $0x8] sm:$0x3]  ;;  %v624_v59 = vld [vmem:[#allocation2 + $0x4a] sm:$0xff]  ;;  %329 = vst.msk [vmem:[#allocation3 + $0x1a8] sm:$0xff] %vm322_vm3, %v9999_v5 }
  0x32   : > { %v1569_v49 = vld [vmem:[#allocation2 + $0x9a] sm:$0xff]  ;;  %v10311_v53 = vpack.c.bf16 %v1567_v45, %v1566_v44  ;;  %v625_v60 = vld [vmem:[#allocation2 + $0x52] sm:$0xff]  ;;  %v8023_v61 = vld [vmem:[%s11625_s1 + $0x8] sm:$0x3]  ;;  %332 = vst.msk [vmem:[#allocation3 + $0x18] sm:$0x1] %vm331_vm4, %v9999_v5 }
  0x33   : > { %v10313_v54 = vpack.c.bf16 %v1569_v49, %v1568_v48  ;;  %v1570_v62 = vld [vmem:[#allocation2 + $0xaa] sm:$0xff]  ;;  %v1571_v0 = vld [vmem:[#allocation2 + $0xb2] sm:$0xff]  ;;  %v10332_v1 = vpack.c.bf16 %v625_v60, %v624_v59  ;;  %v1793_v8 = vsel %vm469_vm0, %v8023_v61, 0  ;;  %v1773_v18 = vld [vmem:[#allocation2 + $0xc1] sm:$0xff]  ;;  %333 = vst.msk [vmem:[#allocation3 + $0x30] sm:$0x1] %vm331_vm4, %v9999_v5 }
  0x34   : > { %8691 = vmatmul.mubr.msk.bf16.vlgmr.msra.gmra.mrb[0].mxu0 %vm280_vm1, %v10236_v63  ;;  %v10335_v3 = vpack.c.bf16 %v1571_v0, %v1570_v62  ;;  %v7982_v7 = vld [vmem:[%s11625_s1 + $0xa] sm:$0x3]  ;;  %v7987_v14 = vld [vmem:[%s11625_s1 + $0xc] sm:$0x3]  ;;  %v395_v16 = vld [vmem:[%s10156_s14 + $0xf8] sm:$0xff] }
  0x35   : > { %8699 = vmatpush3.bf16.msra.mxu0 %v645_v4  ;;  %8694 = vmatprep.mubr.msk.bf16.mxu0 %vm280_vm1, %v10238_v2  ;;  %v849_v4 = vsel %vm469_vm0, %v7977_v57, 0  ;;  %v951_v13 = vsel %vm469_vm0, %v7982_v7, 0  ;;  %427 = vst.msk [vmem:[#allocation2 + $0x189] sm:$0xff] %vm280_vm1, %v395_v16  ;;  %v1774_v19 = vld [vmem:[#allocation2 + $0xc9] sm:$0xff]  ;;  %v1054_v21 = vsel %vm469_vm0, %v7987_v14, 0  ;;  %v2178_v40 = vld [vmem:[#allocation2 + $0xda] sm:$0xff] }
  0x36   : > { %8781 = vmatmul.mubr.msk.bf16.vlgmr.msra.gmra.mrb[0].mxu1 %vm280_vm1, %v10242_v6  ;;  %9913 = vmatprep.subr.msk.bf16.mxu0 %vm469_vm0, %v7972_v10  ;;  %v1672_v10 = vld [vmem:[#allocation2 + $0xc0] sm:$0xff]  ;;  %v10395_v20 = vpack.c.bf16 %v1774_v19, %v1773_v18  ;;  %v7992_v22 = vld [vmem:[%s11625_s1 + $0xe] sm:$0x3]  ;;  %v7997_v31 = vld [vmem:[%s11625_s1 + $0x10] sm:$0x3] }
  0x37   : > { %8784 = vmatprep.mubr.msk.bf16.mxu1 %vm280_vm1, %v10247_v9  ;;  %8789 = vmatpush3.bf16.msra.mxu1 %v1590_v15  ;;  %v394_v15 = vld [vmem:[%s10156_s14 + $0xf0] sm:$0xff]  ;;  %v8038_v24 = vld [vmem:[%s11625_s1 + $0xe] sm:$0x3]  ;;  %v1874_v25 = vld [vmem:[#allocation2 + $0xc2] sm:$0xff]  ;;  %v1156_v28 = vsel %vm469_vm0, %v7992_v22, 0 }
  0x38   : > { %9922 = vmatprep.subr.msk.bf16.mxu1 %vm469_vm0, %v10255_v11  ;;  %v1673_v11 = vld [vmem:[#allocation2 + $0xc8] sm:$0xff]  ;;  %426 = vst.msk [vmem:[#allocation2 + $0x181] sm:$0xff] %vm280_vm1, %v394_v15  ;;  %v2097_v32 = vsel %vm469_vm0, %v8038_v24, 0  ;;  %v3248_v39 = vld [vmem:[%s11625_s1] sm:$0x3]  ;;  %v2327_v0 = vld [vmem:[#allocation2 + $0x111] sm:$0xff] }
  0x39   : > { %v10363_v12 = vpack.c.bf16 %v1673_v11, %v1672_v10  ;;  %v1875_v26 = vld [vmem:[#allocation2 + $0xca] sm:$0xff]  ;;  %v2179_v41 = vld [vmem:[#allocation2 + $0xe2] sm:$0xff]  ;;  %v2325_v48 = vld [vmem:[#allocation2 + $0xf9] sm:$0xff]  ;;  %334 = vst.msk [vmem:[#allocation3 + $0x48] sm:$0x1] %vm331_vm4, %v9999_v5 }
  0x3a   : > { %v10423_v27 = vpack.c.bf16 %v1875_v26, %v1874_v25  ;;  %v3249_v43 = vld [vmem:[#allocation2 + $0x121] sm:$0xff]  ;;  %v3250_v44 = vld [vmem:[#allocation2 + $0x129] sm:$0xff]  ;;  %v3251_v49 = vld [vmem:[#allocation2 + $0x139] sm:$0xff]  ;;  %335 = vst.msk [vmem:[#allocation3 + $0x60] sm:$0x1] %vm331_vm4, %v9999_v5 }
  0x3b   : > { %v10509_v45 = vpack.c.bf16 %v3250_v44, %v3249_v43  ;;  %v8057_v60 = vld [vmem:[%s11625_s1 + $0x4] sm:$0x3]  ;;  %v2326_v62 = vld [vmem:[#allocation2 + $0x109] sm:$0xff]  ;;  %v3238_v15 = vld [vmem:[#allocation2 + $0x138] sm:$0xff]  ;;  %336 = vst.msk [vmem:[#allocation3 + $0x78] sm:$0x1] %vm331_vm4, %v9999_v5 }
  0x3c   : > { %8695 = vmatmul.mubr.msk.bf16.gmra.mrb[4].mxu0 %vm280_vm1, %v10284_v30  ;;  %v3239_v16 = vld [vmem:[#allocation2 + $0x140] sm:$0xff]  ;;  %v2519_v18 = vsel %vm469_vm0, %v8057_v60, 0  ;;  %v3242_v26 = vld [vmem:[#allocation2 + $0x168] sm:$0xff]  ;;  %v2500_v43 = vld [vmem:[#allocation2 + $0x112] sm:$0xff]  ;;  %337 = vst.msk [vmem:[#allocation3 + $0x90] sm:$0x1] %vm331_vm4, %v9999_v5 }
  0x3d   : > { %8700 = vmatprep.mubr.msk.bf16.mxu0 %vm280_vm1, %v626_v36  ;;  %v8048_v36 = vld [vmem:[%s11625_s1 + $0x2] sm:$0x3]  ;;  %v10572_v19 = vpack.c.bf16 %v3239_v16, %v3238_v15  ;;  %v8106_v25 = vld [vmem:[%s11625_s1 + $0x6] sm:$0x3]  ;;  %v8111_v44 = vld [vmem:[%s11625_s1 + $0x8] sm:$0x3] }
  0x3e   : > { %8785 = vmatmul.mubr.msk.bf16.gmra.mrb[4].mxu1 %vm280_vm1, %v10295_v37  ;;  %338 = vst.msk [vmem:[#allocation3 + $0xa8] sm:$0x1] %vm331_vm4, %v9999_v5  ;;  %339 = vst.msk [vmem:[#allocation3 + $0xc0] sm:$0x1] %vm331_vm4, %v9999_v5  ;;  %v8126_v15 = vld [vmem:[%s11625_s1 + $0xe] sm:$0x3] }
  0x3f   : > { %8790 = vmatprep.mubr.msk.bf16.mxu1 %vm280_vm1, %v10297_v38  ;;  %340 = vst.msk [vmem:[#allocation3 + $0xd8] sm:$0x1] %vm331_vm4, %v9999_v5  ;;  %341 = vst.msk [vmem:[#allocation3 + $0xf0] sm:$0x1] %vm331_vm4, %v9999_v5  ;;  %v3733_v16 = vld [vmem:[#allocation2 + $0x18a] sm:$0xff] }
  0x40   : > { %342 = vst.msk [vmem:[#allocation3 + $0x108] sm:$0x1] %vm331_vm4, %v9999_v5  ;;  %343 = vst.msk [vmem:[#allocation3 + $0x120] sm:$0x1] %vm331_vm4, %v9999_v5 }
  0x41   : > { %344 = vst.msk [vmem:[#allocation3 + $0x138] sm:$0x1] %vm331_vm4, %v9999_v5  ;;  %345 = vst.msk [vmem:[#allocation3 + $0x150] sm:$0x1] %vm331_vm4, %v9999_v5 }
  0x42   : > { %346 = vst.msk [vmem:[#allocation3 + $0x168] sm:$0x1] %vm331_vm4, %v9999_v5  ;;  %347 = vst.msk [vmem:[#allocation3 + $0x180] sm:$0x1] %vm331_vm4, %v9999_v5 }
  0x43   : > { %348 = vst.msk [vmem:[#allocation3 + $0x29] sm:$0x1] %vm331_vm4, %v9999_v5  ;;  %349 = vst.msk [vmem:[#allocation3 + $0x41] sm:$0x1] %vm331_vm4, %v9999_v5 }
  0x44   : > { %8701 = vmatmul.mubr.msk.bf16.vlgmr.msra.gmra.mrb[0].mxu0 %vm280_vm1, %v10306_v47  ;;  %350 = vst.msk [vmem:[#allocation3 + $0x59] sm:$0x1] %vm331_vm4, %v9999_v5  ;;  %351 = vst.msk [vmem:[#allocation3 + $0x71] sm:$0x1] %vm331_vm4, %v9999_v5 }
  0x45   : > { %8709 = vmatpush3.bf16.msra.mxu0 %v747_v52  ;;  %8704 = vmatprep.mubr.msk.bf16.mxu0 %vm280_vm1, %v10308_v50  ;;  %v3253_v52 = vld [vmem:[#allocation2 + $0x151] sm:$0xff]  ;;  %352 = vst.msk [vmem:[#allocation3 + $0x89] sm:$0x1] %vm331_vm4, %v9999_v5  ;;  %353 = vst.msk [vmem:[#allocation3 + $0xa1] sm:$0x1] %vm331_vm4, %v9999_v5 }
  0x46   : > { %8791 = vmatmul.mubr.msk.bf16.vlgmr.msra.gmra.mrb[0].mxu1 %vm280_vm1, %v10311_v53  ;;  %9914 = vmatprep.subr.msk.bf16.mxu0 %vm469_vm0, %v7977_v57  ;;  %354 = vst.msk [vmem:[#allocation3 + $0xb9] sm:$0x1] %vm331_vm4, %v9999_v5  ;;  %355 = vst.msk [vmem:[#allocation3 + $0xd1] sm:$0x1] %vm331_vm4, %v9999_v5 }
  0x47   : > { %8794 = vmatprep.mubr.msk.bf16.mxu1 %vm280_vm1, %v10313_v54  ;;  %8799 = vmatpush3.bf16.msra.mxu1 %v1692_v58  ;;  %356 = vst.msk [vmem:[#allocation3 + $0xe9] sm:$0x1] %vm331_vm4, %v9999_v5  ;;  %357 = vst.msk [vmem:[#allocation3 + $0x101] sm:$0x1] %vm331_vm4, %v9999_v5 }
  0x48   : > { %9923 = vmatprep.subr.msk.bf16.mxu1 %vm469_vm0, %v8023_v61  ;;  %v3355_v61 = vsel %vm469_vm0, %v3248_v39, 0  ;;  %358 = vst.msk [vmem:[#allocation3 + $0x119] sm:$0x1] %vm331_vm4, %v9999_v5  ;;  %359 = vst.msk [vmem:[#allocation3 + $0x131] sm:$0x1] %vm331_vm4, %v9999_v5 }
  0x49   : > { %360 = vst.msk [vmem:[#allocation3 + $0x149] sm:$0x1] %vm331_vm4, %v9999_v5  ;;  %361 = vst.msk [vmem:[#allocation3 + $0x161] sm:$0x1] %vm331_vm4, %v9999_v5 }
  0x4a   : > { %362 = vst.msk [vmem:[#allocation3 + $0x179] sm:$0x1] %vm331_vm4, %v9999_v5  ;;  %363 = vst.msk [vmem:[#allocation3 + $0x191] sm:$0x1] %vm331_vm4, %v9999_v5  ;;  %v3732_v5 = vld [vmem:[#allocation2 + $0x182] sm:$0xff] }
  0x4c   : > { %8705 = vmatmul.mubr.msk.bf16.gmra.mrb[4].mxu0 %vm280_vm1, %v10332_v1 }
  0x4d   : > { %8710 = vmatprep.mubr.msk.bf16.mxu0 %vm280_vm1, %v10236_v63  ;;  %v8028_v63 = vld [vmem:[%s11625_s1 + $0xa] sm:$0x3] }
  0x4e   : > { %8795 = vmatmul.mubr.msk.bf16.gmra.mrb[4].mxu1 %vm280_vm1, %v10335_v3  ;;  %v1894_v17 = vsel %vm469_vm0, %v8028_v63, 0 }
  0x4f   : > { %8800 = vmatprep.mubr.msk.bf16.mxu1 %vm280_vm1, %v10242_v6 }
  0x54   : > { %8711 = vmatmul.mubr.msk.bf16.vlgmr.msra.gmra.mrb[0].mxu0 %vm280_vm1, %v10238_v2 }
  0x55   : > { %8719 = vmatpush3.bf16.msra.mxu0 %v849_v4  ;;  %8714 = vmatprep.mubr.msk.bf16.mxu0 %vm280_vm1, %v10284_v30  ;;  %v3256_v4 = vld [vmem:[#allocation2 + $0x171] sm:$0xff] }
  0x56   : > { %8801 = vmatmul.mubr.msk.bf16.vlgmr.msra.gmra.mrb[0].mxu1 %vm280_vm1, %v10247_v9  ;;  %9915 = vmatprep.subr.msk.bf16.mxu0 %vm469_vm0, %v7982_v7  ;;  %v10542_v7 = vpack.c.bf16 %v2327_v0, %v2326_v62 }
  0x57   : > { %8804 = vmatprep.mubr.msk.bf16.mxu1 %vm280_vm1, %v10295_v37  ;;  %8809 = vmatpush3.bf16.msra.mxu1 %v1793_v8  ;;  %v3236_v8 = vld [vmem:[#allocation2 + $0x120] sm:$0xff] }
  0x58   : > { %9924 = vmatprep.subr.msk.bf16.mxu1 %vm469_vm0, %v8028_v63  ;;  %v3237_v63 = vld [vmem:[#allocation2 + $0x128] sm:$0xff] }
  0x59   : > { %v10547_v11 = vpack.c.bf16 %v3237_v63, %v3236_v8  ;;  %v3632_v8 = vld [vmem:[#allocation2 + $0x189] sm:$0xff] }
  0x5c   : > { %8715 = vmatmul.mubr.msk.bf16.gmra.mrb[4].mxu0 %vm280_vm1, %v10227_v56 }
  0x5d   : > { %8720 = vmatprep.mubr.msk.bf16.mxu0 %vm280_vm1, %v10191_v29  ;;  %v8033_v29 = vld [vmem:[%s11625_s1 + $0xc] sm:$0x3] }
  0x5e   : > { %8805 = vmatmul.mubr.msk.bf16.gmra.mrb[4].mxu1 %vm280_vm1, %v10363_v12  ;;  %v1996_v23 = vsel %vm469_vm0, %v8033_v29, 0 }
  0x5f   : > { %8810 = vmatprep.mubr.msk.bf16.mxu1 %vm280_vm1, %v10197_v35 }
  0x64   : > { %8721 = vmatmul.mubr.msk.bf16.vlgmr.msra.gmra.mrb[0].mxu0 %vm280_vm1, %v10211_v42 }
  0x65   : > { %8729 = vmatpush3.bf16.msra.mxu0 %v951_v13  ;;  %8724 = vmatprep.mubr.msk.bf16.mxu0 %vm280_vm1, %v10220_v51  ;;  %v2311_v13 = vld [vmem:[#allocation2 + $0xf0] sm:$0xff] }
  0x66   : > { %8811 = vmatmul.mubr.msk.bf16.vlgmr.msra.gmra.mrb[0].mxu1 %vm280_vm1, %v10215_v46  ;;  %9916 = vmatprep.subr.msk.bf16.mxu0 %vm469_vm0, %v7987_v14  ;;  %v2312_v14 = vld [vmem:[#allocation2 + $0xf8] sm:$0xff] }
  0x67   : > { %8814 = vmatprep.mubr.msk.bf16.mxu1 %vm280_vm1, %v10225_v55  ;;  %8819 = vmatpush3.bf16.msra.mxu1 %v1894_v17  ;;  %v3241_v17 = vld [vmem:[#allocation2 + $0x158] sm:$0xff] }
  0x68   : > { %9925 = vmatprep.subr.msk.bf16.mxu1 %vm469_vm0, %v8033_v29  ;;  %v10569_v29 = vpack.c.bf16 %v2312_v14, %v2311_v13  ;;  %v8082_v13 = vld [vmem:[%s11625_s1 + $0xe] sm:$0x3] }
  0x6c   : > { %8725 = vmatmul.mubr.msk.bf16.gmra.mrb[4].mxu0 %vm280_vm1, %v10195_v34 }
  0x6d   : > { %8730 = vmatprep.mubr.msk.bf16.mxu0 %vm280_vm1, %v10306_v47  ;;  %v2324_v47 = vld [vmem:[#allocation2 + $0xf1] sm:$0xff] }
  0x6e   : > { %8815 = vmatmul.mubr.msk.bf16.gmra.mrb[4].mxu1 %vm280_vm1, %v10395_v20  ;;  %v10519_v57 = vpack.c.bf16 %v2325_v48, %v2324_v47  ;;  %v3428_v47 = vld [vmem:[#allocation2 + $0x16a] sm:$0xff]  ;;  %v3429_v48 = vld [vmem:[#allocation2 + $0x172] sm:$0xff] }
  0x6f   : > { %8820 = vmatprep.mubr.msk.bf16.mxu1 %vm280_vm1, %v10311_v53 }
  0x74   : > { %8731 = vmatmul.mubr.msk.bf16.vlgmr.msra.gmra.mrb[0].mxu0 %vm280_vm1, %v10308_v50 }
  0x75   : > { %8739 = vmatpush3.bf16.msra.mxu0 %v1054_v21  ;;  %8734 = vmatprep.mubr.msk.bf16.mxu0 %vm280_vm1, %v10332_v1  ;;  %v8062_v21 = vld [vmem:[%s11625_s1 + $0x6] sm:$0x3] }
  0x76   : > { %8821 = vmatmul.mubr.msk.bf16.vlgmr.msra.gmra.mrb[0].mxu1 %vm280_vm1, %v10313_v54  ;;  %9917 = vmatprep.subr.msk.bf16.mxu0 %vm469_vm0, %v7992_v22 }
  0x77   : > { %8824 = vmatprep.mubr.msk.bf16.mxu1 %vm280_vm1, %v10335_v3  ;;  %8829 = vmatpush3.bf16.msra.mxu1 %v1996_v23  ;;  %v2313_v23 = vld [vmem:[#allocation2 + $0x108] sm:$0xff] }
  0x78   : > { %9926 = vmatprep.subr.msk.bf16.mxu1 %vm469_vm0, %v8038_v24  ;;  %v2314_v24 = vld [vmem:[#allocation2 + $0x110] sm:$0xff] }
  0x7c   : > { %8735 = vmatmul.mubr.msk.bf16.gmra.mrb[4].mxu0 %vm280_vm1, %v10297_v38 }
  0x7d   : > { %8740 = vmatprep.mubr.msk.bf16.mxu0 %vm280_vm1, %v10238_v2  ;;  %v8043_v2 = vld [vmem:[%s11625_s1 + $0x10] sm:$0x3] }
  0x7e   : > { %8825 = vmatmul.mubr.msk.bf16.gmra.mrb[4].mxu1 %vm280_vm1, %v10423_v27 }
  0x7f   : > { %8830 = vmatprep.mubr.msk.bf16.mxu1 %vm280_vm1, %v10247_v9  ;;  %v1976_v9 = vld [vmem:[#allocation2 + $0xd8] sm:$0xff] }
  0x84   : > { %8741 = vmatmul.mubr.msk.bf16.vlgmr.msra.gmra.mrb[0].mxu0 %vm280_vm1, %v10284_v30  ;;  %v1977_v30 = vld [vmem:[#allocation2 + $0xe0] sm:$0xff] }
  0x85   : > { %8749 = vmatpush3.bf16.msra.mxu0 %v1156_v28  ;;  %8744 = vmatprep.mubr.msk.bf16.mxu0 %vm280_vm1, %v10227_v56  ;;  %v10451_v33 = vpack.c.bf16 %v1977_v30, %v1976_v9  ;;  %v1258_v56 = vsel %vm469_vm0, %v7997_v31, 0  ;;  %v3243_v28 = vld [vmem:[#allocation2 + $0x170] sm:$0xff] }
  0x86   : > { %8831 = vmatmul.mubr.msk.bf16.vlgmr.msra.gmra.mrb[0].mxu1 %vm280_vm1, %v10295_v37  ;;  %9918 = vmatprep.subr.msk.bf16.mxu0 %vm469_vm0, %v7997_v31  ;;  %v10592_v31 = vpack.c.bf16 %v2314_v24, %v2313_v23  ;;  %v10595_v9 = vpack.c.bf16 %v3243_v28, %v3242_v26  ;;  %v8136_v24 = vld [vmem:[%s11628_s4 + $0x4] sm:$0xf]  ;;  %v10852_v26 = vld [vmem:[%s11628_s4] sm:$0xf]  ;;  %v4179_v28 = vld [vmem:[#allocation3 + $0x1] sm:$0xff] }
  0x87   : > { %8834 = vmatprep.mubr.msk.bf16.mxu1 %vm280_vm1, %v10363_v12  ;;  %8839 = vmatpush3.bf16.msra.mxu1 %v2097_v32  ;;  %v3422_v32 = vld [vmem:[#allocation2 + $0x122] sm:$0xff] }
  0x88   : > { %9927 = vmatprep.subr.msk.bf16.mxu1 %vm469_vm0, %v8043_v2 }
  0x8c   : > { %8745 = vmatmul.mubr.msk.bf16.gmra.mrb[4].mxu0 %vm280_vm1, %v10242_v6  ;;  %v2198_v6 = vsel %vm469_vm0, %v8043_v2, 0  ;;  %v3423_v2 = vld [vmem:[#allocation2 + $0x12a] sm:$0xff] }
  0x8d   : > { %8750 = vmatprep.mubr.msk.bf16.mxu0 %vm280_vm1, %v10211_v42  ;;  %v8092_v42 = vld [vmem:[%s11625_s1 + $0x2] sm:$0x3]  ;;  %v10597_v30 = vpack.c.bf16 %v3423_v2, %v3422_v32  ;;  %v4036_v32 = vld [vmem:[#allocation2 + $0x19a] sm:$0xff] }
  0x8e   : > { %8835 = vmatmul.mubr.msk.bf16.gmra.mrb[4].mxu1 %vm280_vm1, %v10451_v33  ;;  %v4037_v2 = vld [vmem:[#allocation2 + $0x1a2] sm:$0xff] }
  0x8f   : > { %8840 = vmatprep.mubr.msk.bf16.mxu1 %vm280_vm1, %v10215_v46  ;;  %v2077_v46 = vld [vmem:[#allocation2 + $0xd9] sm:$0xff] }
  0x94   : > { %8751 = vmatmul.mubr.msk.bf16.vlgmr.msra.gmra.mrb[0].mxu0 %vm280_vm1, %v10220_v51  ;;  %v2078_v51 = vld [vmem:[#allocation2 + $0xe1] sm:$0xff] }
  0x95   : > { %8759 = vmatpush3.bf16.msra.mxu0 %v1258_v56  ;;  %8754 = vmatprep.mubr.msk.bf16.mxu0 %vm280_vm1, %v10195_v34  ;;  %v10479_v37 = vpack.c.bf16 %v2078_v51, %v2077_v46  ;;  %v2346_v34 = vsel %vm469_vm0, %v8048_v36, 0  ;;  %v2497_v56 = vld [vmem:[#allocation2 + $0xf2] sm:$0xff]  ;;  %v3427_v51 = vld [vmem:[#allocation2 + $0x15a] sm:$0xff] }
  0x96   : > { %8841 = vmatmul.mubr.msk.bf16.vlgmr.msra.gmra.mrb[0].mxu1 %vm280_vm1, %v10225_v55  ;;  %9928 = vmatprep.subr.msk.bf16.mxu0 %vm469_vm0, %v8048_v36  ;;  %v2319_v55 = vld [vmem:[%s11625_s1] sm:$0x3]  ;;  %v3426_v46 = vld [vmem:[#allocation2 + $0x152] sm:$0xff] }
  0x97   : > { %8844 = vmatprep.mubr.msk.bf16.mxu1 %vm280_vm1, %v10395_v20  ;;  %8849 = vmatpush3.bf16.msra.mxu1 %v2198_v6  ;;  %v2426_v58 = vsel %vm469_vm0, %v2319_v55, 0  ;;  %v2498_v36 = vld [vmem:[#allocation2 + $0xfa] sm:$0xff] }
  0x98   : > { %9937 = vmatprep.subr.msk.bf16.mxu1 %vm469_vm0, %v8092_v42  ;;  %v3424_v6 = vld [vmem:[#allocation2 + $0x13a] sm:$0xff] }
  0x9c   : > { %8755 = vmatmul.mubr.msk.bf16.gmra.mrb[4].mxu0 %vm280_vm1, %v10197_v35  ;;  %v3275_v35 = vsel %vm469_vm0, %v8092_v42, 0  ;;  %v3425_v42 = vld [vmem:[#allocation2 + $0x142] sm:$0xff] }
  0x9d   : > { %8760 = vmatprep.mubr.msk.bf16.mxu0 %vm280_vm1, %v10308_v50  ;;  %v3252_v50 = vld [vmem:[#allocation2 + $0x141] sm:$0xff] }
  0x9e   : > { %8845 = vmatmul.mubr.msk.bf16.gmra.mrb[4].mxu1 %vm280_vm1, %v10479_v37 }
  0x9f   : > { %8850 = vmatprep.mubr.msk.bf16.mxu1 %vm280_vm1, %v10313_v54  ;;  %v3254_v54 = vld [vmem:[#allocation2 + $0x159] sm:$0xff] }
  0xa0   : > { %v10524_v59 = vpack.c.bf16 %v3254_v54, %v3253_v52  ;;  %v8072_v54 = vld [vmem:[%s11625_s1 + $0xa] sm:$0x3] }
  0xa1   : > { %v2823_v0 = vsel %vm469_vm0, %v8072_v54, 0 }
  0xa4   : > { %8761 = vmatmul.mubr.msk.bf16.vlgmr.msra.gmra.mrb[0].mxu0 %vm280_vm1, %v10332_v1  ;;  %v8101_v1 = vld [vmem:[%s11625_s1 + $0x4] sm:$0x3] }
  0xa5   : > { %8859 = vmatpush3.bf16.msra.mxu0 %v2346_v34  ;;  %8764 = vmatprep.mubr.msk.bf16.mxu0 %vm280_vm1, %v10297_v38  ;;  %v10507_v38 = vpack.c.bf16 %v2179_v41, %v2178_v40  ;;  %v3448_v22 = vsel %vm469_vm0, %v8101_v1, 0  ;;  %v10607_v34 = vpack.c.bf16 %v2498_v36, %v2497_v56  ;;  %v3550_v40 = vsel %vm469_vm0, %v8106_v25, 0  ;;  %v2499_v41 = vld [vmem:[#allocation2 + $0x10a] sm:$0xff]  ;;  %v10868_v56 = vld [vmem:[%s11626_s2] ss:$0 sm:$0xff] }
  0xa6   : > { %8851 = vmatmul.mubr.msk.bf16.vlgmr.msra.gmra.mrb[0].mxu1 %vm280_vm1, %v10335_v3  ;;  %9929 = vmatprep.subr.msk.bf16.mxu0 %vm469_vm0, %v2319_v55  ;;  %v3255_v3 = vld [vmem:[#allocation2 + $0x169] sm:$0xff]  ;;  %v2621_v55 = vsel %vm469_vm0, %v8062_v21, 0  ;;  %v10873_v36 = vld [vmem:[%s11627_s3] ss:$0 sm:$0xff] }
  0xa7   : > { %8854 = vmatprep.mubr.msk.bf16.mxu1 %vm280_vm1, %v10423_v27  ;;  %8949 = vmatpush3.bf16.msra.mxu1 %v3275_v35  ;;  %v10545_v10 = vpack.c.bf16 %v3256_v4, %v3255_v3  ;;  %v10610_v35 = vpack.c.bf16 %v3425_v42, %v3424_v6  ;;  %v3631_v4 = vld [vmem:[#allocation2 + $0x181] sm:$0xff] }
  0xa8   : > { %9938 = vmatprep.subr.msk.bf16.mxu1 %vm469_vm0, %v3248_v39  ;;  %v10612_v39 = vpack.c.bf16 %v3427_v51, %v3426_v46  ;;  %v10689_v63 = vpack.c.bf16 %v3632_v8, %v3631_v4 }
  0xac   : > { %8765 = vmatmul.mubr.msk.bf16.gmra.mrb[4].mxu0 %vm280_vm1, %v10311_v53  ;;  %v10522_v53 = vpack.c.bf16 %v3252_v50, %v3251_v49  ;;  %v10630_v49 = vpack.c.bf16 %v2500_v43, %v2499_v41  ;;  %v10633_v50 = vpack.c.bf16 %v3429_v48, %v3428_v47 }
  0xad   : > { %8860 = vmatprep.mubr.msk.bf16.mxu0 %vm280_vm1, %v10395_v20 }
  0xae   : > { %8855 = vmatmul.mubr.msk.bf16.gmra.mrb[4].mxu1 %vm280_vm1, %v10507_v38 }
  0xaf   : > { %8950 = vmatprep.mubr.msk.bf16.mxu1 %vm280_vm1, %v10509_v45 }
  0xb4   : > { %8861 = vmatmul.mubr.msk.bf16.vlgmr.msra.gmra.mrb[8].mxu0 %vm280_vm1, %v10479_v37 }
  0xb5   : > { %8869 = vmatpush3.bf16.msra.mxu0 %v2426_v58  ;;  %8864 = vmatprep.mubr.msk.bf16.mxu0 %vm280_vm1, %v10519_v57  ;;  %v3651_v58 = vsel %vm469_vm0, %v8111_v44, 0 }
  0xb6   : > { %8951 = vmatmul.mubr.msk.bf16.vlgmr.msra.gmra.mrb[8].mxu1 %vm280_vm1, %v10522_v53  ;;  %9930 = vmatprep.subr.msk.bf16.mxu0 %vm469_vm0, %v8057_v60  ;;  %v3530_v60 = vld [vmem:[#allocation2 + $0x180] sm:$0xff] }
  0xb7   : > { %8954 = vmatprep.mubr.msk.bf16.mxu1 %vm280_vm1, %v10524_v59  ;;  %8959 = vmatpush3.bf16.msra.mxu1 %v3355_v61  ;;  %v3531_v61 = vld [vmem:[#allocation2 + $0x188] sm:$0xff] }
  0xb8   : > { %9939 = vmatprep.subr.msk.bf16.mxu1 %vm469_vm0, %v8101_v1  ;;  %v10661_v62 = vpack.c.bf16 %v3531_v61, %v3530_v60  ;;  %v8077_v1 = vld [vmem:[%s11625_s1 + $0xc] sm:$0x3] }
  0xbc   : > { %8865 = vmatmul.mubr.msk.bf16.gmra.mrb[12].mxu0 %vm280_vm1, %v10542_v7 }
  0xbd   : > { %8870 = vmatprep.mubr.msk.bf16.mxu0 %vm280_vm1, %v10363_v12  ;;  %v3240_v12 = vld [vmem:[#allocation2 + $0x150] sm:$0xff] }
  0xbe   : > { %8955 = vmatmul.mubr.msk.bf16.gmra.mrb[12].mxu1 %vm280_vm1, %v10545_v10  ;;  %v10574_v20 = vpack.c.bf16 %v3241_v17, %v3240_v12  ;;  %v3737_v12 = vpack.c.bf16 %v3733_v16, %v3732_v5  ;;  %v3026_v17 = vsel %vm469_vm0, %v8082_v13, 0 }
  0xbf   : > { %8960 = vmatprep.mubr.msk.bf16.mxu1 %vm280_vm1, %v10547_v11 }
  0xc4   : > { %8871 = vmatmul.mubr.msk.bf16.vlgmr.msra.gmra.mrb[8].mxu0 %vm280_vm1, %v10451_v33 }
  0xc5   : > { %8879 = vmatpush3.bf16.msra.mxu0 %v2519_v18  ;;  %8874 = vmatprep.mubr.msk.bf16.mxu0 %vm280_vm1, %v10569_v29  ;;  %v8087_v18 = vld [vmem:[%s11625_s1 + $0x10] sm:$0x3] }
  0xc6   : > { %8961 = vmatmul.mubr.msk.bf16.vlgmr.msra.gmra.mrb[8].mxu1 %vm280_vm1, %v10572_v19  ;;  %9931 = vmatprep.subr.msk.bf16.mxu0 %vm469_vm0, %v8062_v21  ;;  %v3955_v21 = vsel %vm469_vm0, %v8126_v15, 0 }
  0xc7   : > { %8964 = vmatprep.mubr.msk.bf16.mxu1 %vm280_vm1, %v10574_v20  ;;  %8969 = vmatpush3.bf16.msra.mxu1 %v3448_v22  ;;  %v3835_v22 = vld [vmem:[#allocation2 + $0x1a0] sm:$0xff] }
  0xc8   : > { %9940 = vmatprep.subr.msk.bf16.mxu1 %vm469_vm0, %v8106_v25 }
  0xcc   : > { %8875 = vmatmul.mubr.msk.bf16.gmra.mrb[12].mxu0 %vm280_vm1, %v10592_v31 }
  0xcd   : > { %8880 = vmatprep.mubr.msk.bf16.mxu0 %vm280_vm1, %v10423_v27  ;;  %v8067_v27 = vld [vmem:[%s11625_s1 + $0x8] sm:$0x3] }
  0xce   : > { %8965 = vmatmul.mubr.msk.bf16.gmra.mrb[12].mxu1 %vm280_vm1, %v10595_v9  ;;  %v2722_v52 = vsel %vm469_vm0, %v8067_v27, 0 }
  0xcf   : > { %8970 = vmatprep.mubr.msk.bf16.mxu1 %vm280_vm1, %v10597_v30 }
  0xd4   : > { %8881 = vmatmul.mubr.msk.bf16.vlgmr.msra.gmra.mrb[8].mxu0 %vm280_vm1, %v10507_v38 }
  0xd5   : > { %8889 = vmatpush3.bf16.msra.mxu0 %v2621_v55  ;;  %8884 = vmatprep.mubr.msk.bf16.mxu0 %vm280_vm1, %v10607_v34 }
  0xd6   : > { %8971 = vmatmul.mubr.msk.bf16.vlgmr.msra.gmra.mrb[8].mxu1 %vm280_vm1, %v10610_v35  ;;  %9932 = vmatprep.subr.msk.bf16.mxu0 %vm469_vm0, %v8067_v27 }
  0xd7   : > { %8974 = vmatprep.mubr.msk.bf16.mxu1 %vm280_vm1, %v10612_v39  ;;  %8979 = vmatpush3.bf16.msra.mxu1 %v3550_v40 }
  0xd8   : > { %9941 = vmatprep.subr.msk.bf16.mxu1 %vm469_vm0, %v8111_v44 }
  0xdc   : > { %8885 = vmatmul.mubr.msk.bf16.gmra.mrb[12].mxu0 %vm280_vm1, %v10630_v49 }
  0xdd   : > { %8890 = vmatprep.mubr.msk.bf16.mxu0 %vm280_vm1, %v10451_v33  ;;  %v8116_v33 = vld [vmem:[%s11625_s1 + $0xa] sm:$0x3] }
  0xde   : > { %8975 = vmatmul.mubr.msk.bf16.gmra.mrb[12].mxu1 %vm280_vm1, %v10633_v50  ;;  %v3752_v3 = vsel %vm469_vm0, %v8116_v33, 0 }
  0xdf   : > { %8980 = vmatprep.mubr.msk.bf16.mxu1 %vm280_vm1, %v10572_v19 }
  0xe4   : > { %8891 = vmatmul.mubr.msk.bf16.vlgmr.msra.gmra.mrb[8].mxu0 %vm280_vm1, %v10569_v29 }
  0xe5   : > { %8899 = vmatpush3.bf16.msra.mxu0 %v2722_v52  ;;  %8894 = vmatprep.mubr.msk.bf16.mxu0 %vm280_vm1, %v10592_v31 }
  0xe6   : > { %8981 = vmatmul.mubr.msk.bf16.vlgmr.msra.gmra.mrb[8].mxu1 %vm280_vm1, %v10574_v20  ;;  %9933 = vmatprep.subr.msk.bf16.mxu0 %vm469_vm0, %v8072_v54 }
  0xe7   : > { %8984 = vmatprep.mubr.msk.bf16.mxu1 %vm280_vm1, %v10595_v9  ;;  %8989 = vmatpush3.bf16.msra.mxu1 %v3651_v58 }
  0xe8   : > { %9942 = vmatprep.subr.msk.bf16.mxu1 %vm469_vm0, %v8116_v33 }
  0xec   : > { %8895 = vmatmul.mubr.msk.bf16.gmra.mrb[12].mxu0 %vm280_vm1, %v10547_v11 }
  0xed   : > { %8900 = vmatprep.mubr.msk.bf16.mxu0 %vm280_vm1, %v10479_v37  ;;  %v8121_v37 = vld [vmem:[%s11625_s1 + $0xc] sm:$0x3] }
  0xee   : > { %8985 = vmatmul.mubr.msk.bf16.gmra.mrb[12].mxu1 %vm280_vm1, %v10661_v62  ;;  %v3854_v14 = vsel %vm469_vm0, %v8121_v37, 0 }
  0xef   : > { %8990 = vmatprep.mubr.msk.bf16.mxu1 %vm280_vm1, %v10522_v53 }
  0xf4   : > { %8901 = vmatmul.mubr.msk.bf16.vlgmr.msra.gmra.mrb[8].mxu0 %vm280_vm1, %v10519_v57 }
  0xf5   : > { %8909 = vmatpush3.bf16.msra.mxu0 %v2823_v0  ;;  %8904 = vmatprep.mubr.msk.bf16.mxu0 %vm280_vm1, %v10542_v7 }
  0xf6   : > { %8991 = vmatmul.mubr.msk.bf16.vlgmr.msra.gmra.mrb[8].mxu1 %vm280_vm1, %v10524_v59  ;;  %9934 = vmatprep.subr.msk.bf16.mxu0 %vm469_vm0, %v8077_v1 }
  0xf7   : > { %8994 = vmatprep.mubr.msk.bf16.mxu1 %vm280_vm1, %v10545_v10  ;;  %8999 = vmatpush3.bf16.msra.mxu1 %v3752_v3 }
  0xf8   : > { %9943 = vmatprep.subr.msk.bf16.mxu1 %vm469_vm0, %v8121_v37 }
  0xfc   : > { %8905 = vmatmul.mubr.msk.bf16.gmra.mrb[12].mxu0 %vm280_vm1, %v10509_v45 }
  0xfd   : > { %8910 = vmatprep.mubr.msk.bf16.mxu0 %vm280_vm1, %v10507_v38  ;;  %v2925_v38 = vsel %vm469_vm0, %v8077_v1, 0 }
  0xfe   : > { %8995 = vmatmul.mubr.msk.bf16.gmra.mrb[12].mxu1 %vm280_vm1, %v10689_v63 }
  0xff   : > { %9000 = vmatprep.mubr.msk.bf16.mxu1 %vm280_vm1, %v10610_v35 }
 0x104   : > { %8911 = vmatmul.mubr.msk.bf16.vlgmr.msra.gmra.mrb[8].mxu0 %vm280_vm1, %v10607_v34 }
 0x105   : > { %8919 = vmatpush3.bf16.msra.mxu0 %v2925_v38  ;;  %8914 = vmatprep.mubr.msk.bf16.mxu0 %vm280_vm1, %v10630_v49 }
 0x106   : > { %9001 = vmatmul.mubr.msk.bf16.vlgmr.msra.gmra.mrb[8].mxu1 %vm280_vm1, %v10612_v39  ;;  %9935 = vmatprep.subr.msk.bf16.mxu0 %vm469_vm0, %v8082_v13 }
 0x107   : > { %9004 = vmatprep.mubr.msk.bf16.mxu1 %vm280_vm1, %v10633_v50  ;;  %9009 = vmatpush3.bf16.msra.mxu1 %v3854_v14 }
 0x108   : > { %9944 = vmatprep.subr.msk.bf16.mxu1 %vm469_vm0, %v8126_v15 }
 0x10c   : > { %8915 = vmatmul.mubr.msk.bf16.gmra.mrb[12].mxu0 %vm280_vm1, %v10597_v30 }
 0x10d   : > { %8920 = vmatprep.mubr.msk.bf16.mxu0 %vm280_vm1, %v10569_v29  ;;  %v8131_v29 = vld [vmem:[%s11625_s1 + $0x10] sm:$0x3] }
 0x10e   : > { %9005 = vmatmul.mubr.msk.bf16.gmra.mrb[12].mxu1 %vm280_vm1, %v3737_v12 }
 0x10f   : > { %9010 = vmatprep.mubr.msk.bf16.mxu1 %vm280_vm1, %v10574_v20  ;;  %v3834_v20 = vld [vmem:[#allocation2 + $0x198] sm:$0xff] }
 0x110   : > { %v3839_v23 = vpack.c.bf16 %v3835_v22, %v3834_v20 }
 0x114   : > { %8921 = vmatmul.mubr.msk.bf16.vlgmr.msra.gmra.mrb[8].mxu0 %vm280_vm1, %v10592_v31  ;;  %v4180_v31 = vld [vmem:[#allocation3 + $0x9] sm:$0xff] }
 0x115   : > { %8929 = vmatpush3.bf16.msra.mxu0 %v3026_v17  ;;  %8924 = vmatprep.mubr.msk.bf16.mxu0 %vm280_vm1, %v10547_v11  ;;  %v3127_v11 = vsel %vm469_vm0, %v8087_v18, 0 }
 0x116   : > { %9011 = vmatmul.mubr.msk.bf16.vlgmr.msra.gmra.mrb[8].mxu1 %vm280_vm1, %v10595_v9  ;;  %9936 = vmatprep.subr.msk.bf16.mxu0 %vm469_vm0, %v8087_v18  ;;  %v4187_v9 = vpack.c.bf16 %v4180_v31, %v4179_v28 }
 0x117   : > { %9014 = vmatprep.mubr.msk.bf16.mxu1 %vm280_vm1, %v10661_v62  ;;  %9019 = vmatpush3.bf16.msra.mxu1 %v3955_v21 }
 0x118   : > { %9945 = vmatprep.subr.msk.bf16.mxu1 %vm469_vm0, %v8131_v29 }
 0x11c   : > { %8925 = vmatmul.mubr.msk.bf16.gmra.mrb[12].mxu0 %vm280_vm1, %v10572_v19  ;;  %v4056_v19 = vsel %vm469_vm0, %v8131_v29, 0 }
 0x11d   : > { %8930 = vmatprep.mubr.msk.bf16.mxu0 %vm280_vm1, %v10519_v57  ;;  %v8182_v57 = vld [vmem:[%s11628_s4 + $0x4] sm:$0xf] }
 0x11e   : > { %9015 = vmatmul.mubr.msk.bf16.gmra.mrb[12].mxu1 %vm280_vm1, %v3839_v23 }
 0x11f   : > { %9020 = vmatprep.mubr.msk.bf16.mxu1 %vm280_vm1, %v10524_v59  ;;  %v3935_v59 = vld [vmem:[#allocation2 + $0x199] sm:$0xff] }
 0x124   : > { %8931 = vmatmul.mubr.msk.bf16.vlgmr.msra.gmra.mrb[8].mxu0 %vm280_vm1, %v10542_v7  ;;  %v3936_v7 = vld [vmem:[#allocation2 + $0x1a1] sm:$0xff] }
 0x125   : > { %8939 = vmatpush3.bf16.msra.mxu0 %v3127_v11  ;;  %8934 = vmatprep.mubr.msk.bf16.mxu0 %vm280_vm1, %v10509_v45  ;;  %v3940_v25 = vpack.c.bf16 %v3936_v7, %v3935_v59  ;;  %v4207_v45 = vsel %vm4205_vm5, %v8136_v24, 0 }
 0x126   : > { %9021 = vmatmul.mubr.msk.bf16.vlgmr.msra.gmra.mrb[8].mxu1 %vm280_vm1, %v10545_v10  ;;  %9946 = vmatprep.subr.msk.bf16.mxu0 %vm4205_vm5, %v8136_v24  ;;  %v10842_v10 = vld [vmem:[%s11628_s4] sm:$0xf] }
 0x127   : > { %9024 = vmatprep.mubr.msk.bf16.mxu1 %vm280_vm1, %v10689_v63  ;;  %9029 = vmatpush3.bf16.msra.mxu1 %v4056_v19 }
 0x128   : > { %9955 = vmatprep.subr.msk.bf16.mxu1 %vm4205_vm5, %v8182_v57 }
 0x12c   : > { %8935 = vmatmul.mubr.msk.bf16.gmra.mrb[12].mxu0 %vm280_vm1, %v10522_v53  ;;  %v5153_v53 = vsel %vm4205_vm5, %v8182_v57, 0 }
 0x12d   : > { %8940 = vmatprep.mubr.msk.bf16.mxu0 %vm280_vm1, %v10607_v34 }
 0x12e   : > { %9025 = vmatmul.mubr.msk.bf16.gmra.mrb[12].mxu1 %vm280_vm1, %v3940_v25 }
 0x12f   : > { %9030 = vmatprep.mubr.msk.bf16.mxu1 %vm280_vm1, %v10612_v39 }
 0x134   : > { %8941 = vmatmul.mubr.msk.bf16.vlgmr.msra.gmra.mrb[8].mxu0 %vm280_vm1, %v10630_v49 }
 0x135   : > { %8944 = vmatprep.mubr.msk.bf16.mxu0 %vm280_vm1, %v10597_v30  ;;  %9039 = vmatpush3.bf16.msra.mxu0 %v4207_v45  ;;  %v4041_v30 = vpack.c.bf16 %v4037_v2, %v4036_v32 }
 0x136   : > { %9031 = vmatmul.mubr.msk.bf16.vlgmr.msra.gmra.mrb[8].mxu1 %vm280_vm1, %v10633_v50  ;;  %9947 = vmatprep.subr.msk.bf16.mxu0 %vm4205_vm5, %v10842_v10 }
 0x137   : > { %9034 = vmatprep.mubr.msk.bf16.mxu1 %vm280_vm1, %v3737_v12  ;;  %9129 = vmatpush3.bf16.msra.mxu1 %v5153_v53 }
 0x138   : > { %9956 = vmatprep.subr.msk.bf16.mxu1 %vm4205_vm5, %v10852_v26 }
 0x13c   : > { %8945 = vmatmul.mubr.msk.bf16.gmra.mrb[12].mxu0 %vm280_vm1, %v10610_v35 }
 0x13d   : > { %9040 = vmatprep.mubr.msk.bf16.mxu0 %vm322_vm3, %v4187_v9 }
 0x13e   : > { %9035 = vmatmul.mubr.msk.bf16.gmra.mrb[12].mxu1 %vm280_vm1, %v4041_v30 }
 0x177   : > { %v8762_v6 = vpop.f32.mrb[0].mxu0 }
 0x178   : > { %v1341_v42 = vmul.f32 %v8762_v6, %v10868_v56  ;;  %v1294_v46 = vpop.f32.mrb[1].mxu0 }
 0x179   : > { %v1339_v51 = vmul.f32 %v10868_v56, %v1294_v46  ;;  %v8852_v34 = vpop.f32.mrb[0].mxu1  ;;  %v8763_v55 = vpop.f32.mrb[2].mxu0 }
 0x17a   : > { %v1355_v35 = vadd.f32 %v10873_v36, %v1341_v42  ;;  %v2275_v39 = vmul.f32 %v8852_v34, %v10868_v56  ;;  %v1342_v27 = vmul.f32 %v8763_v55, %v10868_v56  ;;  %v2234_v40 = vpop.f32.mrb[1].mxu1  ;;  %v1297_v41 = vpop.f32.mrb[3].mxu0 }
 0x17b   : > { %v1353_v43 = vadd.f32 %v10873_v36, %v1339_v51  ;;  %v2273_v44 = vmul.f32 %v10868_v56, %v2234_v40  ;;  %v1340_v47 = vmul.f32 %v10868_v56, %v1297_v41  ;;  %v8853_v48 = vpop.f32.mrb[2].mxu1  ;;  %v4287_v40 = vsel %vm4205_vm5, %v10842_v10, 0 }
 0x17c   : > { %v1363_v49 = vmax.f32 %v1355_v35, 0.0  ;;  %v2283_v50 = vadd.f32 %v10873_v36, %v2275_v39  ;;  %v1356_v52 = vadd.f32 %v10873_v36, %v1342_v27  ;;  %v2276_v54 = vmul.f32 %v8853_v48, %v10868_v56  ;;  %v2237_v58 = vpop.f32.mrb[3].mxu1 }
 0x17d   : > { %v1361_v33 = vmax.f32 %v1353_v43, 0.0  ;;  %v2281_v60 = vadd.f32 %v10873_v36, %v2273_v44  ;;  %v1354_v61 = vadd.f32 %v10873_v36, %v1340_v47  ;;  %v2274_v62 = vmul.f32 %v10868_v56, %v2237_v58  ;;  %v8145_v43 = vld [vmem:[%s11628_s4 + $0x8] sm:$0xf]  ;;  %v4166_v44 = vld [vmem:[#allocation3] sm:$0xff]  ;;  %v4167_v47 = vld [vmem:[#allocation3 + $0x8] sm:$0xff] }
 0x17e   : > { %1371 = vst.msk [vmem:[#allocation3 + $0x31] sm:$0xff] %vm322_vm3, %v1363_v49  ;;  %v2291_v0 = vmax.f32 %v2283_v50, 0.0  ;;  %v1364_v1 = vmax.f32 %v1356_v52, 0.0  ;;  %v2284_v3 = vadd.f32 %v10873_v36, %v2276_v54 }
 0x17f   : > { %1369 = vst.msk [vmem:[#allocation3 + $0x19] sm:$0xff] %vm322_vm3, %v1361_v33  ;;  %v2289_v37 = vmax.f32 %v2281_v60, 0.0  ;;  %v1362_v4 = vmax.f32 %v1354_v61, 0.0  ;;  %v2282_v8 = vadd.f32 %v10873_v36, %v2274_v62  ;;  %v8766_v63 = vpop.f32.mrb[4].mxu0  ;;  %v4174_v60 = vpack.c.bf16 %v4167_v47, %v4166_v44 }
 0x180   : > { %2300 = vst.msk [vmem:[#allocation3 + $0x91] sm:$0xff] %vm322_vm3, %v2291_v0  ;;  %1372 = vst.msk [vmem:[#allocation3 + $0x39] sm:$0xff] %vm322_vm3, %v1364_v1  ;;  %v2292_v38 = vmax.f32 %v2284_v3, 0.0  ;;  %v1345_v13 = vmul.f32 %v8766_v63, %v10868_v56  ;;  %v1310_v14 = vpop.f32.mrb[5].mxu0  ;;  %v5233_v3 = vsel %vm4205_vm5, %v10852_v26, 0 }
 0x181   : > { %2298 = vst.msk [vmem:[#allocation3 + $0x79] sm:$0xff] %vm322_vm3, %v2289_v37  ;;  %1370 = vst.msk [vmem:[#allocation3 + $0x21] sm:$0xff] %vm322_vm3, %v1362_v4  ;;  %v2290_v15 = vmax.f32 %v2282_v8, 0.0  ;;  %v1343_v5 = vmul.f32 %v10868_v56, %v1310_v14  ;;  %v8856_v16 = vpop.f32.mrb[4].mxu1  ;;  %v8767_v12 = vpop.f32.mrb[6].mxu0 }
 0x182   : > { %2301 = vst.msk [vmem:[#allocation3 + $0x99] sm:$0xff] %vm322_vm3, %v2292_v38  ;;  %v1359_v17 = vadd.f32 %v10873_v36, %v1345_v13  ;;  %v2279_v18 = vmul.f32 %v8856_v16, %v10868_v56  ;;  %v1346_v21 = vmul.f32 %v8767_v12, %v10868_v56  ;;  %v2250_v29 = vpop.f32.mrb[5].mxu1  ;;  %v1313_v20 = vpop.f32.mrb[7].mxu0  ;;  %v8191_v37 = vld [vmem:[%s11628_s4 + $0x8] sm:$0xf] }
 0x183   : > { %2299 = vst.msk [vmem:[#allocation3 + $0x81] sm:$0xff] %vm322_vm3, %v2290_v15  ;;  %v1357_v22 = vadd.f32 %v10873_v36, %v1343_v5  ;;  %v2277_v23 = vmul.f32 %v10868_v56, %v2250_v29  ;;  %v1344_v11 = vmul.f32 %v10868_v56, %v1313_v20  ;;  %v8857_v24 = vpop.f32.mrb[6].mxu1  ;;  %v4354_v29 = vld [vmem:[#allocation3 + $0x2] sm:$0xff]  ;;  %v4355_v20 = vld [vmem:[#allocation3 + $0xa] sm:$0xff] }
 0x184   : > { %v1367_v19 = vmax.f32 %v1359_v17, 0.0  ;;  %v2287_v57 = vadd.f32 %v10873_v36, %v2279_v18  ;;  %v1360_v59 = vadd.f32 %v10873_v36, %v1346_v21  ;;  %v2280_v7 = vmul.f32 %v8857_v24, %v10868_v56  ;;  %v2253_v25 = vpop.f32.mrb[7].mxu1  ;;  %v8150_v21 = vld [vmem:[%s11628_s4 + $0xc] sm:$0xf] }
 0x185   : > { %v1365_v45 = vmax.f32 %v1357_v22, 0.0  ;;  %v2285_v53 = vadd.f32 %v10873_v36, %v2277_v23  ;;  %v1358_v28 = vadd.f32 %v10873_v36, %v1344_v11  ;;  %v2278_v31 = vmul.f32 %v10868_v56, %v2253_v25  ;;  %v4183_v27 = vld [vmem:[#allocation3 + $0x31] sm:$0xff] }
 0x186   : > { %1375 = vst.msk [vmem:[#allocation3 + $0x61] sm:$0xff] %vm322_vm3, %v1367_v19  ;;  %v2295_v32 = vmax.f32 %v2287_v57, 0.0  ;;  %v1368_v2 = vmax.f32 %v1360_v59, 0.0  ;;  %v2288_v9 = vadd.f32 %v10873_v36, %v2280_v7  ;;  %v4181_v34 = vld [vmem:[#allocation3 + $0x19] sm:$0xff]  ;;  %v4170_v5 = vld [vmem:[#allocation3 + $0x30] sm:$0xff]  ;;  %v4381_v18 = vsel %vm4205_vm5, %v8145_v43, 0 }
 0x187   : > { %1373 = vst.msk [vmem:[#allocation3 + $0x49] sm:$0xff] %vm322_vm3, %v1365_v45  ;;  %v2293_v30 = vmax.f32 %v2285_v53, 0.0  ;;  %v1366_v6 = vmax.f32 %v1358_v28, 0.0  ;;  %v2286_v42 = vadd.f32 %v10873_v36, %v2278_v31  ;;  %v4184_v46 = vld [vmem:[#allocation3 + $0x39] sm:$0xff]  ;;  %v5131_v0 = vld [vmem:[#allocation3 + $0x91] sm:$0xff]  ;;  %v4362_v57 = vpack.c.bf16 %v4355_v20, %v4354_v29 }
 0x188   : > { %2304 = vst.msk [vmem:[#allocation3 + $0xc1] sm:$0xff] %vm322_vm3, %v2295_v32  ;;  %1376 = vst.msk [vmem:[#allocation3 + $0x69] sm:$0xff] %vm322_vm3, %v1368_v2  ;;  %v2296_v51 = vmax.f32 %v2288_v9, 0.0  ;;  %v4182_v55 = vld [vmem:[#allocation3 + $0x21] sm:$0xff]  ;;  %v10926_v41 = vpack.c.bf16 %v4184_v46, %v4183_v27  ;;  %v5129_v33 = vld [vmem:[#allocation3 + $0x79] sm:$0xff]  ;;  %v5326_v53 = vsel %vm4205_vm5, %v8191_v37, 0 }
 0x189   : > { %2302 = vst.msk [vmem:[#allocation3 + $0xa9] sm:$0xff] %vm322_vm3, %v2293_v30  ;;  %1374 = vst.msk [vmem:[#allocation3 + $0x51] sm:$0xff] %vm322_vm3, %v1366_v6  ;;  %v2294_v35 = vmax.f32 %v2286_v42, 0.0  ;;  %v10921_v39 = vpack.c.bf16 %v4182_v55, %v4181_v34  ;;  %v5132_v50 = vld [vmem:[#allocation3 + $0x99] sm:$0xff]  ;;  %v5118_v25 = vld [vmem:[#allocation3 + $0x90] sm:$0xff]  ;;  %v4483_v27 = vsel %vm4205_vm5, %v8150_v21, 0 }
 0x18a   : > { %2305 = vst.msk [vmem:[#allocation3 + $0xc9] sm:$0xff] %vm322_vm3, %v2296_v51  ;;  %v5130_v10 = vld [vmem:[#allocation3 + $0x81] sm:$0xff]  ;;  %v10945_v1 = vpack.c.bf16 %v5132_v50, %v5131_v0  ;;  %v4171_v26 = vld [vmem:[#allocation3 + $0x38] sm:$0xff] }
 0x18b   : > { %2303 = vst.msk [vmem:[#allocation3 + $0xb1] sm:$0xff] %vm322_vm3, %v2294_v35  ;;  %9041 = vmatmul.mubr.msk.bf16.vlgmr.msra.gmra.mrb[16].mxu0 %vm322_vm3, %v10921_v39  ;;  %v10941_v62 = vpack.c.bf16 %v5130_v10, %v5129_v33  ;;  %v4169_v4 = vld [vmem:[#allocation3 + $0x20] sm:$0xff]  ;;  %v4168_v38 = vld [vmem:[#allocation3 + $0x18] sm:$0xff]  ;;  %v10964_v12 = vpack.c.bf16 %v4171_v26, %v4170_v5 }
 0x18c   : > { %9044 = vmatprep.mubr.msk.bf16.mxu0 %vm322_vm3, %v10926_v41  ;;  %9049 = vmatpush3.bf16.msra.mxu0 %v4287_v40  ;;  %v10960_v14 = vpack.c.bf16 %v4169_v4, %v4168_v38  ;;  %v5117_v23 = vld [vmem:[#allocation3 + $0x80] sm:$0xff]  ;;  %v5119_v11 = vld [vmem:[#allocation3 + $0x98] sm:$0xff] }
 0x18d   : > { %9948 = vmatprep.subr.msk.bf16.mxu0 %vm4205_vm5, %v8145_v43  ;;  %v5127_v48 = vld [vmem:[#allocation3 + $0x61] sm:$0xff]  ;;  %v5116_v19 = vld [vmem:[#allocation3 + $0x78] sm:$0xff]  ;;  %v10985_v45 = vpack.c.bf16 %v5119_v11, %v5118_v25 }
 0x18e   : > { %v4185_v54 = vld [vmem:[#allocation3 + $0x49] sm:$0xff]  ;;  %v5114_v16 = vld [vmem:[#allocation3 + $0x60] sm:$0xff]  ;;  %v10983_v7 = vpack.c.bf16 %v5117_v23, %v5116_v19  ;;  %v8196_v28 = vld [vmem:[%s11628_s4 + $0xc] sm:$0xf] }
 0x18f   : > { %v5128_v49 = vld [vmem:[#allocation3 + $0x69] sm:$0xff]  ;;  %v4356_v31 = vld [vmem:[#allocation3 + $0x1a] sm:$0xff]  ;;  %v4358_v9 = vld [vmem:[#allocation3 + $0x32] sm:$0xff]  ;;  %v5427_v33 = vsel %vm4205_vm5, %v8196_v28, 0 }
 0x190   : > { %v10937_v52 = vpack.c.bf16 %v5128_v49, %v5127_v48  ;;  %v4186_v58 = vld [vmem:[#allocation3 + $0x51] sm:$0xff]  ;;  %v5115_v63 = vld [vmem:[#allocation3 + $0x68] sm:$0xff]  ;;  %v4359_v30 = vld [vmem:[#allocation3 + $0x3a] sm:$0xff] }
 0x191   : > { %v10939_v61 = vpack.c.bf16 %v4186_v58, %v4185_v54  ;;  %v5133_v13 = vld [vmem:[#allocation3 + $0xa9] sm:$0xff]  ;;  %v10966_v17 = vpack.c.bf16 %v5115_v63, %v5114_v16  ;;  %v11003_v55 = vpack.c.bf16 %v4359_v30, %v4358_v9  ;;  %v8155_v40 = vld [vmem:[%s11628_s4 + $0x10] sm:$0xf]  ;;  %v4361_v47 = vld [vmem:[#allocation3 + $0x52] sm:$0xff] }
 0x192   : > { %9130 = vmatprep.mubr.msk.bf16.mxu1 %vm322_vm3, %v10937_v52  ;;  %v5134_v8 = vld [vmem:[#allocation3 + $0xb1] sm:$0xff]  ;;  %v4172_v24 = vld [vmem:[#allocation3 + $0x48] sm:$0xff]  ;;  %v5302_v43 = vld [vmem:[#allocation3 + $0x7a] sm:$0xff]  ;;  %v4585_v4 = vsel %vm4205_vm5, %v8155_v40, 0 }
 0x193   : > { %9045 = vmatmul.mubr.msk.bf16.gmra.mrb[20].mxu0 %vm322_vm3, %v10939_v61  ;;  %9131 = vmatmul.mubr.msk.bf16.vlgmr.msra.gmra.mrb[16].mxu1 %vm322_vm3, %v10941_v62  ;;  %v10962_v15 = vpack.c.bf16 %v5134_v8, %v5133_v13  ;;  %v4173_v22 = vld [vmem:[#allocation3 + $0x50] sm:$0xff]  ;;  %v4357_v32 = vld [vmem:[#allocation3 + $0x22] sm:$0xff]  ;;  %v5305_v49 = vld [vmem:[#allocation3 + $0x9a] sm:$0xff] }
 0x194   : > { %9134 = vmatprep.mubr.msk.bf16.mxu1 %vm322_vm3, %v10945_v1  ;;  %9050 = vmatprep.mubr.msk.bf16.mxu0 %vm322_vm3, %v4174_v60  ;;  %v10981_v59 = vpack.c.bf16 %v4173_v22, %v4172_v24  ;;  %v5121_v2 = vld [vmem:[#allocation3 + $0xb0] sm:$0xff]  ;;  %v5300_v6 = vld [vmem:[#allocation3 + $0x62] sm:$0xff]  ;;  %v10999_v51 = vpack.c.bf16 %v4357_v32, %v4356_v31  ;;  %v8170_v23 = vld [vmem:[%s11628_s4 + $0x1c] sm:$0xf] }
 0x195   : > { %9139 = vmatpush3.bf16.msra.mxu1 %v5233_v3  ;;  %v5301_v42 = vld [vmem:[#allocation3 + $0x6a] sm:$0xff]  ;;  %v5303_v10 = vld [vmem:[#allocation3 + $0x82] sm:$0xff]  ;;  %v5304_v48 = vld [vmem:[#allocation3 + $0x92] sm:$0xff] }
 0x196   : > { %9957 = vmatprep.subr.msk.bf16.mxu1 %vm4205_vm5, %v8191_v37  ;;  %v5120_v46 = vld [vmem:[#allocation3 + $0xa8] sm:$0xff]  ;;  %v11005_v35 = vpack.c.bf16 %v5301_v42, %v5300_v6  ;;  %v11022_v54 = vpack.c.bf16 %v5303_v10, %v5302_v43  ;;  %v11024_v58 = vpack.c.bf16 %v5305_v49, %v5304_v48  ;;  %v8201_v60 = vld [vmem:[%s11628_s4 + $0x10] sm:$0xf]  ;;  %v5307_v3 = vld [vmem:[#allocation3 + $0xb2] sm:$0xff] }
 0x197   : > { %v11001_v34 = vpack.c.bf16 %v5121_v2, %v5120_v46  ;;  %v4360_v44 = vld [vmem:[#allocation3 + $0x4a] sm:$0xff]  ;;  %v8160_v8 = vld [vmem:[%s11628_s4 + $0x14] sm:$0xf]  ;;  %v5528_v26 = vsel %vm4205_vm5, %v8201_v60, 0 }
 0x198   : > { %v11020_v50 = vpack.c.bf16 %v4361_v47, %v4360_v44  ;;  %v5306_v0 = vld [vmem:[#allocation3 + $0xaa] sm:$0xff]  ;;  %v8206_v63 = vld [vmem:[%s11628_s4 + $0x14] sm:$0xf]  ;;  %v4687_v5 = vsel %vm4205_vm5, %v8160_v8, 0 }
 0x199   : > { %v11039_v37 = vpack.c.bf16 %v5307_v3, %v5306_v0  ;;  %v5408_v38 = vld [vmem:[#allocation3 + $0xc8] sm:$0xff]  ;;  %v5407_v13 = vld [vmem:[#allocation3 + $0xc0] sm:$0xff]  ;;  %v5629_v16 = vsel %vm4205_vm5, %v8206_v63, 0  ;;  %v11176_v46 = vld [vmem:[%s11628_s4] sm:$0xf] }
 0x19a   : > { %v5508_v29 = vld [vmem:[#allocation3 + $0xc1] sm:$0xff]  ;;  %v8216_v24 = vld [vmem:[%s11628_s4 + $0x1c] sm:$0xf] }
 0x19b   : > { %9051 = vmatmul.mubr.msk.bf16.vlgmr.msra.gmra.mrb[16].mxu0 %vm322_vm3, %v10960_v14  ;;  %9135 = vmatmul.mubr.msk.bf16.gmra.mrb[20].mxu1 %vm322_vm3, %v10962_v15  ;;  %v5609_v19 = vld [vmem:[#allocation3 + $0xc2] sm:$0xff] }
 0x19c   : > { %9054 = vmatprep.mubr.msk.bf16.mxu0 %vm322_vm3, %v10964_v12  ;;  %9140 = vmatprep.mubr.msk.bf16.mxu1 %vm322_vm3, %v10966_v17 }
 0x19d   : > { %9059 = vmatpush3.bf16.msra.mxu0 %v4381_v18  ;;  %v8211_v18 = vld [vmem:[%s11628_s4 + $0x18] sm:$0xf] }
 0x19e   : > { %9949 = vmatprep.subr.msk.bf16.mxu0 %vm4205_vm5, %v8150_v21  ;;  %v5509_v21 = vld [vmem:[#allocation3 + $0xc9] sm:$0xff]  ;;  %v5731_v11 = vsel %vm4205_vm5, %v8211_v18, 0 }
 0x19f   : > { %v11095_v20 = vpack.c.bf16 %v5509_v21, %v5508_v29 }
 0x1a3   : > { %9055 = vmatmul.mubr.msk.bf16.gmra.mrb[20].mxu0 %vm322_vm3, %v10981_v59  ;;  %9141 = vmatmul.mubr.msk.bf16.vlgmr.msra.gmra.mrb[16].mxu1 %vm322_vm3, %v10983_v7 }
 0x1a4   : > { %9144 = vmatprep.mubr.msk.bf16.mxu1 %vm322_vm3, %v10985_v45  ;;  %9060 = vmatprep.mubr.msk.bf16.mxu0 %vm322_vm3, %v4362_v57  ;;  %v5610_v57 = vld [vmem:[#allocation3 + $0xca] sm:$0xff] }
 0x1a5   : > { %9149 = vmatpush3.bf16.msra.mxu1 %v5326_v53  ;;  %v11123_v25 = vpack.c.bf16 %v5610_v57, %v5609_v19  ;;  %v4892_v53 = vsel %vm4205_vm5, %v8170_v23, 0 }
 0x1a6   : > { %9958 = vmatprep.subr.msk.bf16.mxu1 %vm4205_vm5, %v8196_v28  ;;  %v5832_v28 = vsel %vm4205_vm5, %v8216_v24, 0 }
 0x1ab   : > { %9061 = vmatmul.mubr.msk.bf16.vlgmr.msra.gmra.mrb[16].mxu0 %vm322_vm3, %v10999_v51  ;;  %9145 = vmatmul.mubr.msk.bf16.gmra.mrb[20].mxu1 %vm322_vm3, %v11001_v34 }
 0x1ac   : > { %9064 = vmatprep.mubr.msk.bf16.mxu0 %vm322_vm3, %v11003_v55  ;;  %9150 = vmatprep.mubr.msk.bf16.mxu1 %vm322_vm3, %v11005_v35 }
 0x1ad   : > { %9069 = vmatpush3.bf16.msra.mxu0 %v4483_v27 }
 0x1ae   : > { %9950 = vmatprep.subr.msk.bf16.mxu0 %vm4205_vm5, %v8155_v40 }
 0x1b3   : > { %9065 = vmatmul.mubr.msk.bf16.gmra.mrb[20].mxu0 %vm322_vm3, %v11020_v50  ;;  %9151 = vmatmul.mubr.msk.bf16.vlgmr.msra.gmra.mrb[16].mxu1 %vm322_vm3, %v11022_v54 }
 0x1b4   : > { %9070 = vmatprep.mubr.msk.bf16.mxu0 %vm322_vm3, %v10960_v14  ;;  %9154 = vmatprep.mubr.msk.bf16.mxu1 %vm322_vm3, %v11024_v58  ;;  %v11067_v14 = vpack.c.bf16 %v5408_v38, %v5407_v13 }
 0x1b5   : > { %9159 = vmatpush3.bf16.msra.mxu1 %v5427_v33 }
 0x1b6   : > { %9959 = vmatprep.subr.msk.bf16.mxu1 %vm4205_vm5, %v8201_v60 }
 0x1bb   : > { %9071 = vmatmul.mubr.msk.bf16.vlgmr.msra.gmra.mrb[16].mxu0 %vm322_vm3, %v10964_v12  ;;  %9155 = vmatmul.mubr.msk.bf16.gmra.mrb[20].mxu1 %vm322_vm3, %v11039_v37 }
 0x1bc   : > { %9074 = vmatprep.mubr.msk.bf16.mxu0 %vm322_vm3, %v10981_v59  ;;  %9160 = vmatprep.mubr.msk.bf16.mxu1 %vm322_vm3, %v10983_v7 }
 0x1bd   : > { %9079 = vmatpush3.bf16.msra.mxu0 %v4585_v4 }
 0x1be   : > { %9951 = vmatprep.subr.msk.bf16.mxu0 %vm4205_vm5, %v8160_v8 }
 0x1c3   : > { %9075 = vmatmul.mubr.msk.bf16.gmra.mrb[20].mxu0 %vm322_vm3, %v10966_v17  ;;  %9161 = vmatmul.mubr.msk.bf16.vlgmr.msra.gmra.mrb[16].mxu1 %vm322_vm3, %v10985_v45 }
 0x1c4   : > { %9080 = vmatprep.mubr.msk.bf16.mxu0 %vm322_vm3, %v10921_v39  ;;  %9164 = vmatprep.mubr.msk.bf16.mxu1 %vm322_vm3, %v11001_v34  ;;  %v8165_v39 = vld [vmem:[%s11628_s4 + $0x18] sm:$0xf] }
 0x1c5   : > { %9169 = vmatpush3.bf16.msra.mxu1 %v5528_v26  ;;  %v4790_v22 = vsel %vm4205_vm5, %v8165_v39, 0 }
 0x1c6   : > { %9960 = vmatprep.subr.msk.bf16.mxu1 %vm4205_vm5, %v8206_v63 }
 0x1cb   : > { %9081 = vmatmul.mubr.msk.bf16.vlgmr.msra.gmra.mrb[16].mxu0 %vm322_vm3, %v10926_v41  ;;  %9165 = vmatmul.mubr.msk.bf16.gmra.mrb[20].mxu1 %vm322_vm3, %v11067_v14 }
 0x1cc   : > { %9084 = vmatprep.mubr.msk.bf16.mxu0 %vm322_vm3, %v10939_v61  ;;  %9170 = vmatprep.mubr.msk.bf16.mxu1 %vm322_vm3, %v10941_v62 }
 0x1cd   : > { %9089 = vmatpush3.bf16.msra.mxu0 %v4687_v5 }
 0x1ce   : > { %9952 = vmatprep.subr.msk.bf16.mxu0 %vm4205_vm5, %v8165_v39 }
 0x1d3   : > { %9085 = vmatmul.mubr.msk.bf16.gmra.mrb[20].mxu0 %vm322_vm3, %v10937_v52  ;;  %9171 = vmatmul.mubr.msk.bf16.vlgmr.msra.gmra.mrb[16].mxu1 %vm322_vm3, %v10945_v1 }
 0x1d4   : > { %9090 = vmatprep.mubr.msk.bf16.mxu0 %vm322_vm3, %v10999_v51  ;;  %9174 = vmatprep.mubr.msk.bf16.mxu1 %vm322_vm3, %v10962_v15 }
 0x1d5   : > { %9179 = vmatpush3.bf16.msra.mxu1 %v5629_v16 }
 0x1d6   : > { %9961 = vmatprep.subr.msk.bf16.mxu1 %vm4205_vm5, %v8211_v18 }
 0x1db   : > { %9091 = vmatmul.mubr.msk.bf16.vlgmr.msra.gmra.mrb[16].mxu0 %vm322_vm3, %v11003_v55  ;;  %9175 = vmatmul.mubr.msk.bf16.gmra.mrb[20].mxu1 %vm322_vm3, %v11095_v20 }
 0x1dc   : > { %9094 = vmatprep.mubr.msk.bf16.mxu0 %vm322_vm3, %v11020_v50  ;;  %9180 = vmatprep.mubr.msk.bf16.mxu1 %vm322_vm3, %v11022_v54 }
 0x1dd   : > { %9099 = vmatpush3.bf16.msra.mxu0 %v4790_v22 }
 0x1de   : > { %9953 = vmatprep.subr.msk.bf16.mxu0 %vm4205_vm5, %v8170_v23 }
 0x1e3   : > { %9095 = vmatmul.mubr.msk.bf16.gmra.mrb[20].mxu0 %vm322_vm3, %v11005_v35  ;;  %9181 = vmatmul.mubr.msk.bf16.vlgmr.msra.gmra.mrb[16].mxu1 %vm322_vm3, %v11024_v58 }
 0x1e4   : > { %9100 = vmatprep.mubr.msk.bf16.mxu0 %vm322_vm3, %v10964_v12  ;;  %9184 = vmatprep.mubr.msk.bf16.mxu1 %vm322_vm3, %v11039_v37  ;;  %v8175_v12 = vld [vmem:[%s11628_s4 + $0x20] sm:$0xf] }
 0x1e5   : > { %9189 = vmatpush3.bf16.msra.mxu1 %v5731_v11 }
 0x1e6   : > { %9962 = vmatprep.subr.msk.bf16.mxu1 %vm4205_vm5, %v8216_v24 }
 0x1eb   : > { %9101 = vmatmul.mubr.msk.bf16.vlgmr.msra.gmra.mrb[16].mxu0 %vm322_vm3, %v10981_v59  ;;  %9185 = vmatmul.mubr.msk.bf16.gmra.mrb[20].mxu1 %vm322_vm3, %v11123_v25  ;;  %v11146_v59 = vld [vmem:[%s11628_s4 + $0x20] sm:$0xf] }
 0x1ec   : > { %9104 = vmatprep.mubr.msk.bf16.mxu0 %vm322_vm3, %v10966_v17  ;;  %9190 = vmatprep.mubr.msk.bf16.mxu1 %vm322_vm3, %v10985_v45  ;;  %v4994_v17 = vsel %vm4205_vm5, %v8175_v12, 0 }
 0x1ed   : > { %9109 = vmatpush3.bf16.msra.mxu0 %v4892_v53 }
 0x1ee   : > { %9954 = vmatprep.subr.msk.bf16.mxu0 %vm4205_vm5, %v8175_v12 }
 0x1f3   : > { %9105 = vmatmul.mubr.msk.bf16.gmra.mrb[20].mxu0 %vm322_vm3, %v10983_v7  ;;  %9191 = vmatmul.mubr.msk.bf16.vlgmr.msra.gmra.mrb[16].mxu1 %vm322_vm3, %v11001_v34  ;;  %v8226_v7 = vld [vmem:[%s11628_s4 + $0x4] sm:$0xf] }
 0x1f4   : > { %9110 = vmatprep.mubr.msk.bf16.mxu0 %vm322_vm3, %v10926_v41  ;;  %9194 = vmatprep.mubr.msk.bf16.mxu1 %vm322_vm3, %v11067_v14  ;;  %v6080_v9 = vsel %vm4205_vm5, %v8226_v7, 0 }
 0x1f5   : > { %9199 = vmatpush3.bf16.msra.mxu1 %v5832_v28 }
 0x1f6   : > { %9963 = vmatprep.subr.msk.bf16.mxu1 %vm4205_vm5, %v11146_v59 }
 0x1fb   : > { %9111 = vmatmul.mubr.msk.bf16.vlgmr.msra.gmra.mrb[16].mxu0 %vm322_vm3, %v10939_v61 }
 0x1fc   : > { %9114 = vmatprep.mubr.msk.bf16.mxu0 %vm322_vm3, %v10937_v52  ;;  %9119 = vmatpush3.bf16.msra.mxu0 %v4994_v17 }
 0x1fd   : > { %9964 = vmatprep.subr.msk.bf16.mxu0 %vm4205_vm5, %v8226_v7 }
 0x203   : > { %9115 = vmatmul.mubr.msk.bf16.gmra.mrb[20].mxu0 %vm322_vm3, %v10941_v62 }
 0x204   : > { %9120 = vmatprep.mubr.msk.bf16.mxu0 %vm322_vm3, %v11003_v55 }
 0x207   : > { %v8942_v41 = vpop.f32.mrb[8].mxu0 }
 0x208   : > { %v3204_v45 = vmul.f32 %v8942_v41, %v10868_v56  ;;  %v3163_v31 = vpop.f32.mrb[9].mxu0 }
 0x209   : > { %v3202_v32 = vmul.f32 %v10868_v56, %v3163_v31  ;;  %v9032_v2 = vpop.f32.mrb[8].mxu1  ;;  %v8943_v61 = vpop.f32.mrb[10].mxu0 }
 0x20a   : > { %v3212_v52 = vadd.f32 %v10873_v36, %v3204_v45  ;;  %v4133_v30 = vmul.f32 %v9032_v2, %v10868_v56  ;;  %v3205_v6 = vmul.f32 %v8943_v61, %v10868_v56  ;;  %v4092_v62 = vpop.f32.mrb[9].mxu1  ;;  %v3166_v42 = vpop.f32.mrb[11].mxu0 }
 0x20b   : > { %v3210_v51 = vadd.f32 %v10873_v36, %v3202_v32  ;;  %v4131_v34 = vmul.f32 %v10868_v56, %v4092_v62  ;;  %v3203_v55 = vmul.f32 %v10868_v56, %v3166_v42  ;;  %v9033_v27 = vpop.f32.mrb[10].mxu1  ;;  %9121 = vmatmul.mubr.msk.bf16.vlgmr.msra.gmra.mrb[16].mxu0 %vm322_vm3, %v11020_v50 }
 0x20c   : > { %v3220_v40 = vmax.f32 %v3212_v52, 0.0  ;;  %v4141_v43 = vadd.f32 %v10873_v36, %v4133_v30  ;;  %v3213_v44 = vadd.f32 %v10873_v36, %v3205_v6  ;;  %v4134_v47 = vmul.f32 %v9033_v27, %v10868_v56  ;;  %v4095_v10 = vpop.f32.mrb[11].mxu1  ;;  %9124 = vmatprep.mubr.msk.bf16.mxu0 %vm322_vm3, %v11005_v35  ;;  %9219 = vmatpush3.bf16.msra.mxu0 %v6080_v9 }
 0x20d   : > { %v3218_v48 = vmax.f32 %v3210_v51, 0.0  ;;  %v4139_v49 = vadd.f32 %v10873_v36, %v4131_v34  ;;  %v3211_v33 = vadd.f32 %v10873_v36, %v3203_v55  ;;  %v4132_v60 = vmul.f32 %v10868_v56, %v4095_v10  ;;  %9965 = vmatprep.subr.msk.bf16.mxu0 %vm4205_vm5, %v11176_v46  ;;  %v8235_v10 = vld [vmem:[%s11628_s4 + $0x8] sm:$0xf] }
 0x20e   : > { %3229 = vst.msk [vmem:[#allocation3 + $0xf1] sm:$0xff] %vm322_vm3, %v3220_v40  ;;  %v4149_v50 = vmax.f32 %v4141_v43, 0.0  ;;  %v3221_v0 = vmax.f32 %v3213_v44, 0.0  ;;  %v4142_v3 = vadd.f32 %v10873_v36, %v4134_v47  ;;  %v6160_v47 = vsel %vm4205_vm5, %v11176_v46, 0 }
 0x20f   : > { %3227 = vst.msk [vmem:[#allocation3 + $0xd9] sm:$0xff] %vm322_vm3, %v3218_v48  ;;  %v4147_v35 = vmax.f32 %v4139_v49, 0.0  ;;  %v3219_v4 = vmax.f32 %v3211_v33, 0.0  ;;  %v4140_v8 = vadd.f32 %v10873_v36, %v4132_v60  ;;  %v8946_v26 = vpop.f32.mrb[12].mxu0  ;;  %v5933_v49 = vsel %vm4205_vm5, %v11146_v59, 0 }
 0x210   : > { %4158 = vst.msk [vmem:[#allocation3 + $0x151] sm:$0xff] %vm322_vm3, %v4149_v50  ;;  %3230 = vst.msk [vmem:[#allocation3 + $0xf9] sm:$0xff] %vm322_vm3, %v3221_v0  ;;  %v4150_v63 = vmax.f32 %v4142_v3, 0.0  ;;  %v3208_v38 = vmul.f32 %v8946_v26, %v10868_v56  ;;  %v3179_v13 = vpop.f32.mrb[13].mxu0  ;;  %v8270_v60 = vld [vmem:[%s11628_s4 + $0x4] sm:$0xf] }
 0x211   : > { %4156 = vst.msk [vmem:[#allocation3 + $0x139] sm:$0xff] %vm322_vm3, %v4147_v35  ;;  %3228 = vst.msk [vmem:[#allocation3 + $0xe1] sm:$0xff] %vm322_vm3, %v3219_v4  ;;  %v4148_v5 = vmax.f32 %v4140_v8, 0.0  ;;  %v3206_v39 = vmul.f32 %v10868_v56, %v3179_v13  ;;  %v9036_v16 = vpop.f32.mrb[12].mxu1  ;;  %v8947_v18 = vpop.f32.mrb[14].mxu0  ;;  %v6253_v0 = vsel %vm4205_vm5, %v8235_v10, 0 }
 0x212   : > { %4159 = vst.msk [vmem:[#allocation3 + $0x159] sm:$0xff] %vm322_vm3, %v4150_v63  ;;  %v3216_v21 = vadd.f32 %v10873_v36, %v3208_v38  ;;  %v4137_v29 = vmul.f32 %v9036_v16, %v10868_v56  ;;  %v3209_v22 = vmul.f32 %v8947_v18, %v10868_v56  ;;  %v4108_v23 = vpop.f32.mrb[13].mxu1  ;;  %v3182_v11 = vpop.f32.mrb[15].mxu0  ;;  %v7007_v35 = vsel %vm4205_vm5, %v8270_v60, 0  ;;  %v6980_v4 = vld [vmem:[%s11628_s4] sm:$0xf] }
 0x213   : > { %4157 = vst.msk [vmem:[#allocation3 + $0x141] sm:$0xff] %vm322_vm3, %v4148_v5  ;;  %v3214_v24 = vadd.f32 %v10873_v36, %v3206_v39  ;;  %v4135_v19 = vmul.f32 %v10868_v56, %v4108_v23  ;;  %v3207_v57 = vmul.f32 %v10868_v56, %v3182_v11  ;;  %v9037_v53 = vpop.f32.mrb[14].mxu1  ;;  %9125 = vmatmul.mubr.msk.bf16.gmra.mrb[20].mxu0 %vm322_vm3, %v11022_v54 }
 0x214   : > { %v3224_v12 = vmax.f32 %v3216_v21, 0.0  ;;  %v4145_v28 = vadd.f32 %v10873_v36, %v4137_v29  ;;  %v3217_v17 = vadd.f32 %v10873_v36, %v3209_v22  ;;  %v4138_v7 = vmul.f32 %v9037_v53, %v10868_v56  ;;  %v4111_v41 = vpop.f32.mrb[15].mxu1  ;;  %9220 = vmatprep.mubr.msk.bf16.mxu0 %vm322_vm3, %v11095_v20  ;;  %v8279_v53 = vld [vmem:[%s11628_s4 + $0x8] sm:$0xf] }
 0x215   : > { %v3222_v45 = vmax.f32 %v3214_v24, 0.0  ;;  %v4143_v31 = vadd.f32 %v10873_v36, %v4135_v19  ;;  %v3215_v32 = vadd.f32 %v10873_v36, %v3207_v57  ;;  %v4136_v2 = vmul.f32 %v10868_v56, %v4111_v41  ;;  %v6045_v59 = vld [vmem:[#allocation3 + $0xf0] sm:$0xff] }
 0x216   : > { %3233 = vst.msk [vmem:[#allocation3 + $0x121] sm:$0xff] %vm322_vm3, %v3224_v12  ;;  %v4153_v54 = vmax.f32 %v4145_v28, 0.0  ;;  %v3225_v61 = vmax.f32 %v3217_v17, 0.0  ;;  %v4146_v9 = vadd.f32 %v10873_v36, %v4138_v7  ;;  %v5711_v62 = vld [vmem:[#allocation3 + $0xd8] sm:$0xff]  ;;  %v7087_v19 = vsel %vm4205_vm5, %v6980_v4, 0 }
 0x217   : > { %3231 = vst.msk [vmem:[#allocation3 + $0x109] sm:$0xff] %vm322_vm3, %v3222_v45  ;;  %v4151_v52 = vmax.f32 %v4143_v31, 0.0  ;;  %v3223_v30 = vmax.f32 %v3215_v32, 0.0  ;;  %v4144_v6 = vadd.f32 %v10873_v36, %v4136_v2  ;;  %v6059_v42 = vld [vmem:[#allocation3 + $0xf9] sm:$0xff]  ;;  %v6058_v36 = vld [vmem:[#allocation3 + $0xf1] sm:$0xff] }
 0x218   : > { %4162 = vst.msk [vmem:[#allocation3 + $0x181] sm:$0xff] %vm322_vm3, %v4153_v54  ;;  %3234 = vst.msk [vmem:[#allocation3 + $0x129] sm:$0xff] %vm322_vm3, %v3225_v61  ;;  %v4154_v51 = vmax.f32 %v4146_v9, 0.0  ;;  %v5712_v56 = vld [vmem:[#allocation3 + $0xe0] sm:$0xff]  ;;  %v11234_v44 = vpack.c.bf16 %v6059_v42, %v6058_v36  ;;  %v6231_v26 = vld [vmem:[#allocation3 + $0xf2] sm:$0xff] }
 0x219   : > { %v6056_v34 = vld [vmem:[#allocation3 + $0xd9] sm:$0xff]  ;;  %v6057_v55 = vld [vmem:[#allocation3 + $0xe1] sm:$0xff]  ;;  %4160 = vst.msk [vmem:[#allocation3 + $0x169] sm:$0xff] %vm322_vm3, %v4151_v52  ;;  %3232 = vst.msk [vmem:[#allocation3 + $0x111] sm:$0xff] %vm322_vm3, %v3223_v30  ;;  %v4152_v27 = vmax.f32 %v4144_v6, 0.0  ;;  %v11229_v40 = vpack.c.bf16 %v5712_v56, %v5711_v62  ;;  %v7180_v30 = vsel %vm4205_vm5, %v8279_v53, 0 }
 0x21a   : > { %v11231_v43 = vpack.c.bf16 %v6057_v55, %v6056_v34  ;;  %4163 = vst.msk [vmem:[#allocation3 + $0x189] sm:$0xff] %vm322_vm3, %v4154_v51  ;;  %v5914_v8 = vld [vmem:[#allocation3 + $0xe2] sm:$0xff]  ;;  %v6232_v63 = vld [vmem:[#allocation3 + $0xfa] sm:$0xff]  ;;  %v6985_v57 = vld [vmem:[#allocation3 + $0x151] sm:$0xff] }
 0x21b   : > { %4161 = vst.msk [vmem:[#allocation3 + $0x171] sm:$0xff] %vm322_vm3, %v4152_v27  ;;  %9195 = vmatmul.mubr.msk.bf16.gmra.mrb[20].mxu1 %vm322_vm3, %v11229_v40  ;;  %v11299_v5 = vpack.c.bf16 %v6232_v63, %v6231_v26  ;;  %v6984_v29 = vld [vmem:[#allocation3 + $0x141] sm:$0xff]  ;;  %v6983_v22 = vld [vmem:[#allocation3 + $0x139] sm:$0xff]  ;;  %v6972_v6 = vld [vmem:[#allocation3 + $0x150] sm:$0xff] }
 0x21c   : > { %9221 = vmatmul.mubr.msk.bf16.vlgmr.msra.gmra.mrb[24].mxu0 %vm322_vm3, %v11231_v43  ;;  %9200 = vmatprep.mubr.msk.bf16.mxu1 %vm322_vm3, %v10945_v1  ;;  %v6046_v1 = vld [vmem:[#allocation3 + $0xf8] sm:$0xff]  ;;  %v11318_v24 = vpack.c.bf16 %v6984_v29, %v6983_v22  ;;  %v8250_v2 = vld [vmem:[%s11628_s4 + $0x14] sm:$0xf]  ;;  %v8309_v22 = vld [vmem:[%s11628_s4 + $0x20] sm:$0xf] }
 0x21d   : > { %9224 = vmatprep.mubr.msk.bf16.mxu0 %vm322_vm3, %v11234_v44  ;;  %9229 = vmatpush3.bf16.msra.mxu0 %v6160_v47  ;;  %v11267_v50 = vpack.c.bf16 %v6046_v1, %v6045_v59  ;;  %v6986_v23 = vld [vmem:[#allocation3 + $0x159] sm:$0xff]  ;;  %v6556_v36 = vsel %vm4205_vm5, %v8250_v2, 0 }
 0x21e   : > { %9966 = vmatprep.subr.msk.bf16.mxu0 %vm4205_vm5, %v8235_v10  ;;  %v6060_v46 = vld [vmem:[#allocation3 + $0x109] sm:$0xff]  ;;  %v11328_v12 = vpack.c.bf16 %v6986_v23, %v6985_v57  ;;  %v6968_v45 = vld [vmem:[#allocation3 + $0x120] sm:$0xff]  ;;  %v6970_v61 = vld [vmem:[#allocation3 + $0x138] sm:$0xff] }
 0x21f   : > { %v6982_v38 = vld [vmem:[#allocation3 + $0x129] sm:$0xff]  ;;  %v6971_v54 = vld [vmem:[#allocation3 + $0x140] sm:$0xff]  ;;  %v6973_v9 = vld [vmem:[#allocation3 + $0x158] sm:$0xff] }
 0x220   : > { %v6061_v48 = vld [vmem:[#allocation3 + $0x111] sm:$0xff]  ;;  %v6969_v17 = vld [vmem:[#allocation3 + $0x128] sm:$0xff]  ;;  %v11352_v52 = vpack.c.bf16 %v6971_v54, %v6970_v61  ;;  %v8284_v62 = vld [vmem:[%s11628_s4 + $0xc] sm:$0xf]  ;;  %v11362_v42 = vpack.c.bf16 %v6973_v9, %v6972_v6 }
 0x221   : > { %v11253_v33 = vpack.c.bf16 %v6061_v48, %v6060_v46  ;;  %v6233_v18 = vld [vmem:[#allocation3 + $0x10a] sm:$0xff]  ;;  %v6234_v21 = vld [vmem:[#allocation3 + $0x112] sm:$0xff]  ;;  %v11337_v31 = vpack.c.bf16 %v6969_v17, %v6968_v45  ;;  %v7154_v56 = vld [vmem:[#allocation3 + $0x122] sm:$0xff] }
 0x222   : > { %v11316_v11 = vpack.c.bf16 %v6234_v21, %v6233_v18  ;;  %v6988_v28 = vld [vmem:[#allocation3 + $0x171] sm:$0xff]  ;;  %v6987_v7 = vld [vmem:[#allocation3 + $0x169] sm:$0xff]  ;;  %v7156_v47 = vld [vmem:[#allocation3 + $0x13a] sm:$0xff] }
 0x223   : > { %9201 = vmatmul.mubr.msk.bf16.vlgmr.msra.gmra.mrb[16].mxu1 %vm322_vm3, %v10962_v15  ;;  %v8240_v15 = vld [vmem:[%s11628_s4 + $0xc] sm:$0xf]  ;;  %v11335_v41 = vpack.c.bf16 %v6988_v28, %v6987_v7  ;;  %v6975_v51 = vld [vmem:[#allocation3 + $0x170] sm:$0xff]  ;;  %v6974_v55 = vld [vmem:[#allocation3 + $0x168] sm:$0xff] }
 0x224   : > { %9225 = vmatmul.mubr.msk.bf16.gmra.mrb[28].mxu0 %vm322_vm3, %v11253_v33  ;;  %9209 = vmatpush3.bf16.msra.mxu1 %v5933_v49  ;;  %v6354_v16 = vsel %vm4205_vm5, %v8240_v15, 0  ;;  %v7155_v34 = vld [vmem:[#allocation3 + $0x12a] sm:$0xff]  ;;  %v11369_v27 = vpack.c.bf16 %v6975_v51, %v6974_v55  ;;  %v7157_v10 = vld [vmem:[#allocation3 + $0x142] sm:$0xff]  ;;  %v7158_v46 = vld [vmem:[#allocation3 + $0x152] sm:$0xff] }
 0x225   : > { %9204 = vmatprep.mubr.msk.bf16.mxu1 %vm322_vm3, %v11095_v20  ;;  %9230 = vmatprep.mubr.msk.bf16.mxu0 %vm322_vm3, %v11067_v14  ;;  %v6048_v14 = vld [vmem:[#allocation3 + $0x110] sm:$0xff]  ;;  %v6047_v20 = vld [vmem:[#allocation3 + $0x108] sm:$0xff]  ;;  %v7159_v48 = vld [vmem:[#allocation3 + $0x15a] sm:$0xff]  ;;  %v11386_v49 = vpack.c.bf16 %v7157_v10, %v7156_v47 }
 0x226   : > { %9973 = vmatprep.subr.msk.bf16.mxu1 %vm4205_vm5, %v8270_v60  ;;  %v11282_v3 = vpack.c.bf16 %v6048_v14, %v6047_v20  ;;  %v7281_v60 = vsel %vm4205_vm5, %v8284_v62, 0  ;;  %v8289_v1 = vld [vmem:[%s11628_s4 + $0x10] sm:$0xf]  ;;  %v11396_v59 = vpack.c.bf16 %v7159_v48, %v7158_v46  ;;  %v8304_v21 = vld [vmem:[%s11628_s4 + $0x1c] sm:$0xf]  ;;  %v7565_v23 = vld [vmem:[#allocation3 + $0x198] sm:$0xff] }
 0x227   : > { %v7261_v26 = vld [vmem:[#allocation3 + $0x180] sm:$0xff]  ;;  %v11516_v45 = vld [vmem:[%s11630_s6] ss:$0 sm:$0xff] }
 0x228   : > { %v7666_v57 = vld [vmem:[#allocation3 + $0x199] sm:$0xff]  ;;  %v7768_v17 = vld [vmem:[#allocation3 + $0x1a2] sm:$0xff] }
 0x22b   : > { %9205 = vmatmul.mubr.msk.bf16.gmra.mrb[20].mxu1 %vm322_vm3, %v11231_v43 }
 0x22c   : > { %9231 = vmatmul.mubr.msk.bf16.vlgmr.msra.gmra.mrb[24].mxu0 %vm322_vm3, %v11229_v40  ;;  %9210 = vmatprep.mubr.msk.bf16.mxu1 %vm322_vm3, %v11024_v58  ;;  %v5913_v58 = vld [vmem:[#allocation3 + $0xda] sm:$0xff] }
 0x22d   : > { %9234 = vmatprep.mubr.msk.bf16.mxu0 %vm322_vm3, %v11267_v50  ;;  %9239 = vmatpush3.bf16.msra.mxu0 %v6253_v0  ;;  %v11297_v13 = vpack.c.bf16 %v5914_v8, %v5913_v58  ;;  %v7160_v0 = vld [vmem:[#allocation3 + $0x16a] sm:$0xff]  ;;  %v8294_v58 = vld [vmem:[%s11628_s4 + $0x14] sm:$0xf] }
 0x22e   : > { %9967 = vmatprep.subr.msk.bf16.mxu0 %vm4205_vm5, %v8240_v15  ;;  %v7161_v15 = vld [vmem:[#allocation3 + $0x172] sm:$0xff]  ;;  %v7262_v8 = vld [vmem:[#allocation3 + $0x188] sm:$0xff] }
 0x22f   : > { %v11403_v14 = vpack.c.bf16 %v7161_v15, %v7160_v0  ;;  %v7266_v63 = vpack.c.bf16 %v7262_v8, %v7261_v26 }
 0x233   : > { %9211 = vmatmul.mubr.msk.bf16.vlgmr.msra.gmra.mrb[16].mxu1 %vm322_vm3, %v11039_v37  ;;  %v6981_v37 = vld [vmem:[#allocation3 + $0x121] sm:$0xff] }
 0x234   : > { %9235 = vmatmul.mubr.msk.bf16.gmra.mrb[28].mxu0 %vm322_vm3, %v11282_v3  ;;  %9309 = vmatpush3.bf16.msra.mxu1 %v7007_v35  ;;  %v11301_v39 = vpack.c.bf16 %v6982_v38, %v6981_v37  ;;  %v8260_v35 = vld [vmem:[%s11628_s4 + $0x1c] sm:$0xf] }
 0x235   : > { %9214 = vmatprep.mubr.msk.bf16.mxu1 %vm322_vm3, %v11123_v25  ;;  %9240 = vmatprep.mubr.msk.bf16.mxu0 %vm322_vm3, %v11123_v25  ;;  %v8245_v25 = vld [vmem:[%s11628_s4 + $0x10] sm:$0xf]  ;;  %v6759_v38 = vsel %vm4205_vm5, %v8260_v35, 0  ;;  %v7363_v37 = vld [vmem:[#allocation3 + $0x189] sm:$0xff] }
 0x236   : > { %9974 = vmatprep.subr.msk.bf16.mxu1 %vm4205_vm5, %v6980_v4  ;;  %v6455_v32 = vsel %vm4205_vm5, %v8245_v25, 0  ;;  %v7382_v4 = vsel %vm4205_vm5, %v8289_v1, 0 }
 0x23b   : > { %9215 = vmatmul.mubr.msk.bf16.gmra.mrb[20].mxu1 %vm322_vm3, %v11297_v13 }
 0x23c   : > { %9241 = vmatmul.mubr.msk.bf16.vlgmr.msra.gmra.mrb[24].mxu0 %vm322_vm3, %v11297_v13  ;;  %9310 = vmatprep.mubr.msk.bf16.mxu1 %vm322_vm3, %v11301_v39 }
 0x23d   : > { %9244 = vmatprep.mubr.msk.bf16.mxu0 %vm322_vm3, %v11299_v5  ;;  %9249 = vmatpush3.bf16.msra.mxu0 %v6354_v16  ;;  %v7362_v16 = vld [vmem:[#allocation3 + $0x181] sm:$0xff] }
 0x23e   : > { %9968 = vmatprep.subr.msk.bf16.mxu0 %vm4205_vm5, %v8245_v25  ;;  %v7367_v25 = vpack.c.bf16 %v7363_v37, %v7362_v16 }
 0x243   : > { %9311 = vmatmul.mubr.msk.bf16.vlgmr.msra.gmra.mrb[24].mxu1 %vm322_vm3, %v11318_v24 }
 0x244   : > { %9245 = vmatmul.mubr.msk.bf16.gmra.mrb[28].mxu0 %vm322_vm3, %v11316_v11  ;;  %9319 = vmatpush3.bf16.msra.mxu1 %v7087_v19  ;;  %v7787_v19 = vsel %vm4205_vm5, %v8309_v22, 0 }
 0x245   : > { %9250 = vmatprep.mubr.msk.bf16.mxu0 %vm322_vm3, %v11229_v40  ;;  %9314 = vmatprep.mubr.msk.bf16.mxu1 %vm322_vm3, %v11328_v12  ;;  %v11371_v40 = vpack.c.bf16 %v7155_v34, %v7154_v56 }
 0x246   : > { %9975 = vmatprep.subr.msk.bf16.mxu1 %vm4205_vm5, %v8279_v53  ;;  %v7667_v53 = vld [vmem:[#allocation3 + $0x1a1] sm:$0xff] }
 0x247   : > { %v7671_v28 = vpack.c.bf16 %v7667_v53, %v7666_v57 }
 0x24b   : > { %9315 = vmatmul.mubr.msk.bf16.gmra.mrb[28].mxu1 %vm322_vm3, %v11335_v41 }
 0x24c   : > { %9251 = vmatmul.mubr.msk.bf16.vlgmr.msra.gmra.mrb[24].mxu0 %vm322_vm3, %v11267_v50  ;;  %9320 = vmatprep.mubr.msk.bf16.mxu1 %vm322_vm3, %v11337_v31 }
 0x24d   : > { %9254 = vmatprep.mubr.msk.bf16.mxu0 %vm322_vm3, %v11282_v3  ;;  %9259 = vmatpush3.bf16.msra.mxu0 %v6455_v32 }
 0x24e   : > { %9969 = vmatprep.subr.msk.bf16.mxu0 %vm4205_vm5, %v8250_v2 }
 0x253   : > { %9321 = vmatmul.mubr.msk.bf16.vlgmr.msra.gmra.mrb[24].mxu1 %vm322_vm3, %v11352_v52 }
 0x254   : > { %9255 = vmatmul.mubr.msk.bf16.gmra.mrb[28].mxu0 %vm322_vm3, %v11337_v31  ;;  %9329 = vmatpush3.bf16.msra.mxu1 %v7180_v30 }
 0x255   : > { %9260 = vmatprep.mubr.msk.bf16.mxu0 %vm322_vm3, %v11231_v43  ;;  %9324 = vmatprep.mubr.msk.bf16.mxu1 %vm322_vm3, %v11362_v42  ;;  %v8255_v43 = vld [vmem:[%s11628_s4 + $0x18] sm:$0xf] }
 0x256   : > { %9976 = vmatprep.subr.msk.bf16.mxu1 %vm4205_vm5, %v8284_v62  ;;  %v6658_v20 = vsel %vm4205_vm5, %v8255_v43, 0 }
 0x25b   : > { %9325 = vmatmul.mubr.msk.bf16.gmra.mrb[28].mxu1 %vm322_vm3, %v11369_v27 }
 0x25c   : > { %9261 = vmatmul.mubr.msk.bf16.vlgmr.msra.gmra.mrb[24].mxu0 %vm322_vm3, %v11234_v44  ;;  %9330 = vmatprep.mubr.msk.bf16.mxu1 %vm322_vm3, %v11371_v40 }
 0x25d   : > { %9264 = vmatprep.mubr.msk.bf16.mxu0 %vm322_vm3, %v11253_v33  ;;  %9269 = vmatpush3.bf16.msra.mxu0 %v6556_v36 }
 0x25e   : > { %9970 = vmatprep.subr.msk.bf16.mxu0 %vm4205_vm5, %v8255_v43 }
 0x263   : > { %9331 = vmatmul.mubr.msk.bf16.vlgmr.msra.gmra.mrb[24].mxu1 %vm322_vm3, %v11386_v49 }
 0x264   : > { %9265 = vmatmul.mubr.msk.bf16.gmra.mrb[28].mxu0 %vm322_vm3, %v11301_v39  ;;  %9339 = vmatpush3.bf16.msra.mxu1 %v7281_v60 }
 0x265   : > { %9270 = vmatprep.mubr.msk.bf16.mxu0 %vm322_vm3, %v11297_v13  ;;  %9334 = vmatprep.mubr.msk.bf16.mxu1 %vm322_vm3, %v11396_v59  ;;  %v8265_v13 = vld [vmem:[%s11628_s4 + $0x20] sm:$0xf] }
 0x266   : > { %9977 = vmatprep.subr.msk.bf16.mxu1 %vm4205_vm5, %v8289_v1  ;;  %v6860_v18 = vsel %vm4205_vm5, %v8265_v13, 0 }
 0x26b   : > { %9335 = vmatmul.mubr.msk.bf16.gmra.mrb[28].mxu1 %vm322_vm3, %v11403_v14 }
 0x26c   : > { %9271 = vmatmul.mubr.msk.bf16.vlgmr.msra.gmra.mrb[24].mxu0 %vm322_vm3, %v11299_v5  ;;  %9340 = vmatprep.mubr.msk.bf16.mxu1 %vm322_vm3, %v11352_v52 }
 0x26d   : > { %9274 = vmatprep.mubr.msk.bf16.mxu0 %vm322_vm3, %v11316_v11  ;;  %9279 = vmatpush3.bf16.msra.mxu0 %v6658_v20 }
 0x26e   : > { %9971 = vmatprep.subr.msk.bf16.mxu0 %vm4205_vm5, %v8260_v35 }
 0x273   : > { %9341 = vmatmul.mubr.msk.bf16.vlgmr.msra.gmra.mrb[24].mxu1 %vm322_vm3, %v11362_v42 }
 0x274   : > { %9275 = vmatmul.mubr.msk.bf16.gmra.mrb[28].mxu0 %vm322_vm3, %v11371_v40  ;;  %9349 = vmatpush3.bf16.msra.mxu1 %v7382_v4 }
 0x275   : > { %9280 = vmatprep.mubr.msk.bf16.mxu0 %vm322_vm3, %v11267_v50  ;;  %9344 = vmatprep.mubr.msk.bf16.mxu1 %vm322_vm3, %v11369_v27  ;;  %v7483_v50 = vsel %vm4205_vm5, %v8294_v58, 0 }
 0x276   : > { %9978 = vmatprep.subr.msk.bf16.mxu1 %vm4205_vm5, %v8294_v58 }
 0x27b   : > { %9345 = vmatmul.mubr.msk.bf16.gmra.mrb[28].mxu1 %vm322_vm3, %v7266_v63 }
 0x27c   : > { %9281 = vmatmul.mubr.msk.bf16.vlgmr.msra.gmra.mrb[24].mxu0 %vm322_vm3, %v11282_v3  ;;  %9350 = vmatprep.mubr.msk.bf16.mxu1 %vm322_vm3, %v11318_v24  ;;  %v8299_v3 = vld [vmem:[%s11628_s4 + $0x18] sm:$0xf] }
 0x27d   : > { %9284 = vmatprep.mubr.msk.bf16.mxu0 %vm322_vm3, %v11337_v31  ;;  %9289 = vmatpush3.bf16.msra.mxu0 %v6759_v38 }
 0x27e   : > { %9972 = vmatprep.subr.msk.bf16.mxu0 %vm4205_vm5, %v8265_v13 }
 0x283   : > { %9351 = vmatmul.mubr.msk.bf16.vlgmr.msra.gmra.mrb[24].mxu1 %vm322_vm3, %v11328_v12 }
 0x284   : > { %9285 = vmatmul.mubr.msk.bf16.gmra.mrb[28].mxu0 %vm322_vm3, %v11352_v52  ;;  %9359 = vmatpush3.bf16.msra.mxu1 %v7483_v50 }
 0x285   : > { %9290 = vmatprep.mubr.msk.bf16.mxu0 %vm322_vm3, %v11234_v44  ;;  %9354 = vmatprep.mubr.msk.bf16.mxu1 %vm322_vm3, %v11335_v41  ;;  %v7585_v44 = vsel %vm4205_vm5, %v8299_v3, 0 }
 0x286   : > { %9979 = vmatprep.subr.msk.bf16.mxu1 %vm4205_vm5, %v8299_v3 }
 0x28b   : > { %9355 = vmatmul.mubr.msk.bf16.gmra.mrb[28].mxu1 %vm322_vm3, %v7367_v25 }
 0x28c   : > { %9291 = vmatmul.mubr.msk.bf16.vlgmr.msra.gmra.mrb[24].mxu0 %vm322_vm3, %v11253_v33  ;;  %9360 = vmatprep.mubr.msk.bf16.mxu1 %vm322_vm3, %v11386_v49  ;;  %v7463_v33 = vld [vmem:[#allocation3 + $0x182] sm:$0xff] }
 0x28d   : > { %9294 = vmatprep.mubr.msk.bf16.mxu0 %vm322_vm3, %v11301_v39  ;;  %9299 = vmatpush3.bf16.msra.mxu0 %v6860_v18  ;;  %v7464_v39 = vld [vmem:[#allocation3 + $0x18a] sm:$0xff] }
 0x28e   : > { %v7468_v29 = vpack.c.bf16 %v7464_v39, %v7463_v33 }
 0x293   : > { %9361 = vmatmul.mubr.msk.bf16.vlgmr.msra.gmra.mrb[24].mxu1 %vm322_vm3, %v11396_v59 }
 0x294   : > { %9295 = vmatmul.mubr.msk.bf16.gmra.mrb[28].mxu0 %vm322_vm3, %v11318_v24  ;;  %9369 = vmatpush3.bf16.msra.mxu1 %v7585_v44 }
 0x295   : > { %9300 = vmatprep.mubr.msk.bf16.mxu0 %vm322_vm3, %v11299_v5  ;;  %9364 = vmatprep.mubr.msk.bf16.mxu1 %vm322_vm3, %v11403_v14  ;;  %v7686_v5 = vsel %vm4205_vm5, %v8304_v21, 0 }
 0x296   : > { %9980 = vmatprep.subr.msk.bf16.mxu1 %vm4205_vm5, %v8304_v21 }
 0x29b   : > { %9365 = vmatmul.mubr.msk.bf16.gmra.mrb[28].mxu1 %vm322_vm3, %v7468_v29 }
 0x29c   : > { %9301 = vmatmul.mubr.msk.bf16.vlgmr.msra.gmra.mrb[24].mxu0 %vm322_vm3, %v11316_v11  ;;  %9370 = vmatprep.mubr.msk.bf16.mxu1 %vm322_vm3, %v11362_v42  ;;  %v7566_v11 = vld [vmem:[#allocation3 + $0x1a0] sm:$0xff] }
 0x29d   : > { %9304 = vmatprep.mubr.msk.bf16.mxu0 %vm322_vm3, %v11371_v40  ;;  %v7570_v24 = vpack.c.bf16 %v7566_v11, %v7565_v23 }
 0x2a3   : > { %9371 = vmatmul.mubr.msk.bf16.vlgmr.msra.gmra.mrb[24].mxu1 %vm322_vm3, %v11369_v27 }
 0x2a4   : > { %9305 = vmatmul.mubr.msk.bf16.gmra.mrb[28].mxu0 %vm322_vm3, %v11386_v49  ;;  %9379 = vmatpush3.bf16.msra.mxu1 %v7686_v5 }
 0x2a5   : > { %9374 = vmatprep.mubr.msk.bf16.mxu1 %vm322_vm3, %v7266_v63  ;;  %9981 = vmatprep.subr.msk.bf16.mxu1 %vm4205_vm5, %v8309_v22 }
 0x2ab   : > { %9375 = vmatmul.mubr.msk.bf16.gmra.mrb[28].mxu1 %vm322_vm3, %v7570_v24 }
 0x2ac   : > { %9380 = vmatprep.mubr.msk.bf16.mxu1 %vm322_vm3, %v11328_v12  ;;  %v7767_v12 = vld [vmem:[#allocation3 + $0x19a] sm:$0xff] }
 0x2ad   : > { %v7772_v7 = vpack.c.bf16 %v7768_v17, %v7767_v12 }
 0x2b3   : > { %9381 = vmatmul.mubr.msk.bf16.vlgmr.msra.gmra.mrb[24].mxu1 %vm322_vm3, %v11335_v41  ;;  %v11511_v41 = vld [vmem:[%s11629_s5] ss:$0 sm:$0xff] }
 0x2b4   : > { %9389 = vmatpush3.bf16.msra.mxu1 %v7787_v19  ;;  %9384 = vmatprep.mubr.msk.bf16.mxu1 %vm322_vm3, %v7367_v25 }
 0x2bb   : > { %9385 = vmatmul.mubr.msk.bf16.gmra.mrb[28].mxu1 %vm322_vm3, %v7671_v28 }
 0x2bc   : > { %9390 = vmatprep.mubr.msk.bf16.mxu1 %vm322_vm3, %v11396_v59 }
 0x2c3   : > { %9391 = vmatmul.mubr.msk.bf16.vlgmr.msra.gmra.mrb[24].mxu1 %vm322_vm3, %v11403_v14 }
 0x2c4   : > { %9394 = vmatprep.mubr.msk.bf16.mxu1 %vm322_vm3, %v7468_v29 }
 0x2cb   : > { %9395 = vmatmul.mubr.msk.bf16.gmra.mrb[28].mxu1 %vm322_vm3, %v7772_v7 }
 0x2de   : > { %v9122_v31 = vpop.f32.mrb[16].mxu0 }
 0x2df   : > { %v5077_v32 = vmul.f32 %v9122_v31, %v11511_v41  ;;  %v5030_v2 = vpop.f32.mrb[17].mxu0 }
 0x2e0   : > { %v5075_v54 = vmul.f32 %v11511_v41, %v5030_v2  ;;  %v9123_v61 = vpop.f32.mrb[18].mxu0 }
 0x2e1   : > { %v5091_v9 = vadd.f32 %v11516_v45, %v5077_v32  ;;  %v5078_v52 = vmul.f32 %v9123_v61, %v11511_v41  ;;  %v5033_v30 = vpop.f32.mrb[19].mxu0 }
 0x2e2   : > { %v5089_v6 = vadd.f32 %v11516_v45, %v5075_v54  ;;  %v5076_v62 = vmul.f32 %v11511_v41, %v5033_v30 }
 0x2e3   : > { %v5099_v42 = vmax.f32 %v5091_v9, 0.0  ;;  %v5092_v51 = vadd.f32 %v11516_v45, %v5078_v52 }
 0x2e4   : > { %v5097_v56 = vmax.f32 %v5089_v6, 0.0  ;;  %v5090_v34 = vadd.f32 %v11516_v45, %v5076_v62 }
 0x2e5   : > { %5107 = vst [vmem:[%s11527_s21 + $0x10] sm:$0xff] %v5099_v42  ;;  %v5100_v55 = vmax.f32 %v5092_v51, 0.0 }
 0x2e6   : > { %5105 = vst [vmem:[%s11527_s21] sm:$0xff] %v5097_v56  ;;  %v5098_v27 = vmax.f32 %v5090_v34, 0.0  ;;  %v9126_v40 = vpop.f32.mrb[20].mxu0 }
 0x2e7   : > { %5108 = vst [vmem:[%s11527_s21 + $0x18] sm:$0xff] %v5100_v55  ;;  %v5081_v36 = vmul.f32 %v9126_v40, %v11511_v41  ;;  %v5046_v43 = vpop.f32.mrb[21].mxu0 }
 0x2e8   : > { %5106 = vst [vmem:[%s11527_s21 + $0x8] sm:$0xff] %v5098_v27  ;;  %v5079_v47 = vmul.f32 %v11511_v41, %v5046_v43  ;;  %v9127_v10 = vpop.f32.mrb[22].mxu0 }
 0x2e9   : > { %v5095_v46 = vadd.f32 %v11516_v45, %v5081_v36  ;;  %v5082_v48 = vmul.f32 %v9127_v10, %v11511_v41  ;;  %v5049_v49 = vpop.f32.mrb[23].mxu0 }
 0x2ea   : > { %v5093_v60 = vadd.f32 %v11516_v45, %v5079_v47  ;;  %v5080_v1 = vmul.f32 %v11511_v41, %v5049_v49 }
 0x2eb   : > { %v5103_v59 = vmax.f32 %v5095_v46, 0.0  ;;  %v5096_v0 = vadd.f32 %v11516_v45, %v5082_v48 }
 0x2ec   : > { %v5101_v15 = vmax.f32 %v5093_v60, 0.0  ;;  %v5094_v14 = vadd.f32 %v11516_v45, %v5080_v1 }
 0x2ed   : > { %5111 = vst [vmem:[%s11527_s21 + $0x30] sm:$0xff] %v5103_v59  ;;  %v5104_v20 = vmax.f32 %v5096_v0, 0.0 }
 0x2ee   : > { %5109 = vst [vmem:[%s11527_s21 + $0x20] sm:$0xff] %v5101_v15  ;;  %v5102_v35 = vmax.f32 %v5094_v14, 0.0 }
 0x2ef   : > { %5112 = vst [vmem:[%s11527_s21 + $0x38] sm:$0xff] %v5104_v20 }
 0x2f0   : > { %5110 = vst [vmem:[%s11527_s21 + $0x28] sm:$0xff] %v5102_v35 }
 0x306   : > { %v9212_v4 = vpop.f32.mrb[16].mxu1 }
 0x307   : > { %v6010_v58 = vmul.f32 %v9212_v4, %v11511_v41  ;;  %v5969_v8 = vpop.f32.mrb[17].mxu1 }
 0x308   : > { %v6008_v26 = vmul.f32 %v11511_v41, %v5969_v8  ;;  %v9213_v63 = vpop.f32.mrb[18].mxu1 }
 0x309   : > { %v6018_v38 = vadd.f32 %v11516_v45, %v6010_v58  ;;  %v6011_v13 = vmul.f32 %v9213_v63, %v11511_v41  ;;  %v5972_v50 = vpop.f32.mrb[19].mxu1 }
 0x30a   : > { %v6016_v3 = vadd.f32 %v11516_v45, %v6008_v26  ;;  %v6009_v37 = vmul.f32 %v11511_v41, %v5972_v50 }
 0x30b   : > { %v6026_v16 = vmax.f32 %v6018_v38, 0.0  ;;  %v6019_v25 = vadd.f32 %v11516_v45, %v6011_v13 }
 0x30c   : > { %v6024_v18 = vmax.f32 %v6016_v3, 0.0  ;;  %v6017_v44 = vadd.f32 %v11516_v45, %v6009_v37 }
 0x30d   : > { %6034 = vst [vmem:[%s11527_s21 + $0x50] sm:$0xff] %v6026_v16  ;;  %v6027_v21 = vmax.f32 %v6019_v25, 0.0 }
 0x30e   : > { %6032 = vst [vmem:[%s11527_s21 + $0x40] sm:$0xff] %v6024_v18  ;;  %v6025_v33 = vmax.f32 %v6017_v44, 0.0  ;;  %v9216_v39 = vpop.f32.mrb[20].mxu1 }
 0x30f   : > { %6035 = vst [vmem:[%s11527_s21 + $0x58] sm:$0xff] %v6027_v21  ;;  %v6014_v29 = vmul.f32 %v9216_v39, %v11511_v41  ;;  %v5985_v5 = vpop.f32.mrb[21].mxu1 }
 0x310   : > { %6033 = vst [vmem:[%s11527_s21 + $0x48] sm:$0xff] %v6025_v33  ;;  %v6012_v22 = vmul.f32 %v11511_v41, %v5985_v5  ;;  %v9217_v23 = vpop.f32.mrb[22].mxu1 }
 0x311   : > { %v6022_v11 = vadd.f32 %v11516_v45, %v6014_v29  ;;  %v6015_v24 = vmul.f32 %v9217_v23, %v11511_v41  ;;  %v5988_v19 = vpop.f32.mrb[23].mxu1 }
 0x312   : > { %v6020_v57 = vadd.f32 %v11516_v45, %v6012_v22  ;;  %v6013_v53 = vmul.f32 %v11511_v41, %v5988_v19 }
 0x313   : > { %v6030_v28 = vmax.f32 %v6022_v11, 0.0  ;;  %v6023_v12 = vadd.f32 %v11516_v45, %v6015_v24 }
 0x314   : > { %v6028_v17 = vmax.f32 %v6020_v57, 0.0  ;;  %v6021_v7 = vadd.f32 %v11516_v45, %v6013_v53 }
 0x315   : > { %6038 = vst [vmem:[%s11527_s21 + $0x70] sm:$0xff] %v6030_v28  ;;  %v6031_v31 = vmax.f32 %v6023_v12, 0.0 }
 0x316   : > { %6036 = vst [vmem:[%s11527_s21 + $0x60] sm:$0xff] %v6028_v17  ;;  %v6029_v32 = vmax.f32 %v6021_v7, 0.0 }
 0x317   : > { %6039 = vst [vmem:[%s11527_s21 + $0x78] sm:$0xff] %v6031_v31 }
 0x318   : > { %6037 = vst [vmem:[%s11527_s21 + $0x68] sm:$0xff] %v6029_v32 }
 0x36f   : > { %v9302_v2 = vpop.f32.mrb[24].mxu0 }
 0x370   : > { %v6937_v54 = vmul.f32 %v9302_v2, %v11511_v41  ;;  %v6896_v61 = vpop.f32.mrb[25].mxu0 }
 0x371   : > { %v6935_v9 = vmul.f32 %v11511_v41, %v6896_v61  ;;  %v9303_v52 = vpop.f32.mrb[26].mxu0 }
 0x372   : > { %v6945_v30 = vadd.f32 %v11516_v45, %v6937_v54  ;;  %v6938_v6 = vmul.f32 %v9303_v52, %v11511_v41  ;;  %v6899_v62 = vpop.f32.mrb[27].mxu0 }
 0x373   : > { %v6943_v42 = vadd.f32 %v11516_v45, %v6935_v9  ;;  %v6936_v51 = vmul.f32 %v11511_v41, %v6899_v62 }
 0x374   : > { %v6953_v56 = vmax.f32 %v6945_v30, 0.0  ;;  %v6946_v34 = vadd.f32 %v11516_v45, %v6938_v6 }
 0x375   : > { %v6951_v55 = vmax.f32 %v6943_v42, 0.0  ;;  %v6944_v27 = vadd.f32 %v11516_v45, %v6936_v51 }
 0x376   : > { %6961 = vst [vmem:[%s11527_s21 + $0x90] sm:$0xff] %v6953_v56  ;;  %v6954_v40 = vmax.f32 %v6946_v34, 0.0 }
 0x377   : > { %6959 = vst [vmem:[%s11527_s21 + $0x80] sm:$0xff] %v6951_v55  ;;  %v6952_v36 = vmax.f32 %v6944_v27, 0.0  ;;  %v9306_v43 = vpop.f32.mrb[28].mxu0 }
 0x378   : > { %6962 = vst [vmem:[%s11527_s21 + $0x98] sm:$0xff] %v6954_v40  ;;  %v6941_v47 = vmul.f32 %v9306_v43, %v11511_v41  ;;  %v6912_v10 = vpop.f32.mrb[29].mxu0 }
 0x379   : > { %6960 = vst [vmem:[%s11527_s21 + $0x88] sm:$0xff] %v6952_v36  ;;  %v6939_v46 = vmul.f32 %v11511_v41, %v6912_v10  ;;  %v9307_v48 = vpop.f32.mrb[30].mxu0 }
 0x37a   : > { %v6949_v49 = vadd.f32 %v11516_v45, %v6941_v47  ;;  %v6942_v60 = vmul.f32 %v9307_v48, %v11511_v41  ;;  %v6915_v1 = vpop.f32.mrb[31].mxu0 }
 0x37b   : > { %v6947_v59 = vadd.f32 %v11516_v45, %v6939_v46  ;;  %v6940_v0 = vmul.f32 %v11511_v41, %v6915_v1 }
 0x37c   : > { %v6957_v15 = vmax.f32 %v6949_v49, 0.0  ;;  %v6950_v14 = vadd.f32 %v11516_v45, %v6942_v60 }
 0x37d   : > { %v6955_v20 = vmax.f32 %v6947_v59, 0.0  ;;  %v6948_v35 = vadd.f32 %v11516_v45, %v6940_v0 }
 0x37e   : > { %6965 = vst [vmem:[%s11527_s21 + $0xb0] sm:$0xff] %v6957_v15  ;;  %v6958_v4 = vmax.f32 %v6950_v14, 0.0 }
 0x37f   : > { %6963 = vst [vmem:[%s11527_s21 + $0xa0] sm:$0xff] %v6955_v20  ;;  %v6956_v58 = vmax.f32 %v6948_v35, 0.0 }
 0x380   : > { %6966 = vst [vmem:[%s11527_s21 + $0xb8] sm:$0xff] %v6958_v4 }
 0x381   : > { %6964 = vst [vmem:[%s11527_s21 + $0xa8] sm:$0xff] %v6956_v58 }
 0x396   : > { %v9392_v8 = vpop.f32.mrb[24].mxu1 }
 0x397   : > { %v7864_v26 = vmul.f32 %v9392_v8, %v11511_v41  ;;  %v7823_v63 = vpop.f32.mrb[25].mxu1 }
 0x398   : > { %v7862_v38 = vmul.f32 %v11511_v41, %v7823_v63  ;;  %v9393_v13 = vpop.f32.mrb[26].mxu1 }
 0x399   : > { %v7872_v50 = vadd.f32 %v11516_v45, %v7864_v26  ;;  %v7865_v3 = vmul.f32 %v9393_v13, %v11511_v41  ;;  %v7826_v37 = vpop.f32.mrb[27].mxu1 }
 0x39a   : > { %v7870_v16 = vadd.f32 %v11516_v45, %v7862_v38  ;;  %v7863_v25 = vmul.f32 %v11511_v41, %v7826_v37 }
 0x39b   : > { %v7880_v18 = vmax.f32 %v7872_v50, 0.0  ;;  %v7873_v44 = vadd.f32 %v11516_v45, %v7865_v3 }
 0x39c   : > { %v7878_v21 = vmax.f32 %v7870_v16, 0.0  ;;  %v7871_v33 = vadd.f32 %v11516_v45, %v7863_v25 }
 0x39d   : > { %7888 = vst [vmem:[%s11527_s21 + $0xd0] sm:$0xff] %v7880_v18  ;;  %v7881_v39 = vmax.f32 %v7873_v44, 0.0 }
 0x39e   : > { %7886 = vst [vmem:[%s11527_s21 + $0xc0] sm:$0xff] %v7878_v21  ;;  %v7879_v29 = vmax.f32 %v7871_v33, 0.0  ;;  %v9396_v5 = vpop.f32.mrb[28].mxu1 }
 0x39f   : > { %7889 = vst [vmem:[%s11527_s21 + $0xd8] sm:$0xff] %v7881_v39  ;;  %v7868_v22 = vmul.f32 %v9396_v5, %v11511_v41  ;;  %v7839_v23 = vpop.f32.mrb[29].mxu1 }
 0x3a0   : > { %7887 = vst [vmem:[%s11527_s21 + $0xc8] sm:$0xff] %v7879_v29  ;;  %v7866_v11 = vmul.f32 %v11511_v41, %v7839_v23  ;;  %v9397_v24 = vpop.f32.mrb[30].mxu1 }
 0x3a1   : > { %v7876_v19 = vadd.f32 %v11516_v45, %v7868_v22  ;;  %v7869_v57 = vmul.f32 %v9397_v24, %v11511_v41  ;;  %v7842_v53 = vpop.f32.mrb[31].mxu1 }
 0x3a2   : > { %v7874_v28 = vadd.f32 %v11516_v45, %v7866_v11  ;;  %v7867_v12 = vmul.f32 %v11511_v41, %v7842_v53 }
 0x3a3   : > { %v7884_v17 = vmax.f32 %v7876_v19, 0.0  ;;  %v7877_v7 = vadd.f32 %v11516_v45, %v7869_v57 }
 0x3a4   : > { %v7882_v31 = vmax.f32 %v7874_v28, 0.0  ;;  %v7875_v32 = vadd.f32 %v11516_v45, %v7867_v12 }
 0x3a5   : > { %7892 = vst [vmem:[%s11527_s21 + $0xf0] sm:$0xff] %v7884_v17  ;;  %v7885_v2 = vmax.f32 %v7877_v7, 0.0 }
 0x3a6   : > { %7890 = vst [vmem:[%s11527_s21 + $0xe0] sm:$0xff] %v7882_v31  ;;  %v7883_v54 = vmax.f32 %v7875_v32, 0.0 }
 0x3a7   : > { %7893 = vst [vmem:[%s11527_s21 + $0xf8] sm:$0xff] %v7885_v2 }
 0x3a8   : > { %7891 = vst [vmem:[%s11527_s21 + $0xe8] sm:$0xff] %v7883_v54 }
 0x3a9 PF: > { %s17_s24 = sadd.s32 1, %s9997_s24  }
 0x3aa   : > { %p14_p4 = scmp.ge.s32.totalorder %s17_s24, 4  }
 0x3ac   :  { %16 = sbr.rel (!%p14_p4) target bundleno = 1 (0x1), region = 118 }

</bundles_post_ra>
